<compile_context>
chip_gen: v7x
topology: tpu7x:2x2x1
jax: 0.10.0
libtpu: 0.0.40
codegen_flags: <defaults>
</compile_context>

<pallas_src>
import functools
import math

import jax
import jax.numpy as jnp
from jax import lax
from jax.experimental import pallas as pl
from jax.experimental.pallas import tpu as pltpu

BN_EPS = 1e-5


# ----------------------------------------------------------------------------
# In-kernel helpers (traced inside the Pallas kernel body, VMEM-resident)
# ----------------------------------------------------------------------------
def _upsample2x(t):
    """(H, W, C) f32 -> (2H, 2W, C) f32.  Matches F.interpolate(scale=2,
    'bilinear', align_corners=False):
        out[2k]   = 0.25*in[k-1] + 0.75*in[k]   (edge clamped)
        out[2k+1] = 0.75*in[k]   + 0.25*in[k+1] (edge clamped)
    Columns (the sublane axis) are interleaved first, while the tensor is
    still half width; the row interleave is a cheap outer-dim shuffle."""
    h, w, c = t.shape
    left = jnp.concatenate([t[:, :1], t[:, :-1]], axis=1)
    right = jnp.concatenate([t[:, 1:], t[:, -1:]], axis=1)
    c_even = 0.25 * left + 0.75 * t
    c_odd = 0.75 * t + 0.25 * right
    t = jnp.stack([c_even, c_odd], axis=2).reshape(h, 2 * w, c)
    up = jnp.concatenate([t[:1], t[:-1]], axis=0)
    dn = jnp.concatenate([t[1:], t[-1:]], axis=0)
    r_even = 0.25 * up + 0.75 * t
    r_odd = 0.75 * t + 0.25 * dn
    return jnp.stack([r_even, r_odd], axis=1).reshape(2 * h, 2 * w, c)


def _zero_vhalo(pad_ref):
    """Zero the top/bottom halo rows (rows 0 and H+1) of a conv scratch.
    Done every grid step so steps are fully independent (megacore-safe)."""
    hp, w, ck = pad_ref.shape
    z = jnp.zeros((1, w, ck), pad_ref.dtype)
    pad_ref[0:1, :, :] = z
    pad_ref[hp - 1:hp, :, :] = z


def _store_shifted(pad_ref, act, lane0):
    """Write act (H, W, C) f32 into a conv scratch as three column-shifted
    bf16 copies at lane blocks [lane0 + s*C, lane0 + (s+1)*C), s = kx = 0,1,2,
    interior rows 1..H.  Block s holds act[:, j+s-1] with a zero column at the
    image border, so every 3x3 tap becomes a lane-aligned full-width load."""
    h, w, c = act.shape
    bf16 = jnp.bfloat16
    zc = jnp.zeros_like(act[:, :1])
    left_nb = jnp.concatenate([zc, act[:, :-1]], axis=1)    # x[:, j-1]
    right_nb = jnp.concatenate([act[:, 1:], zc], axis=1)    # x[:, j+1]
    pad_ref[1:h + 1, :, lane0:lane0 + c] = left_nb.astype(bf16)
    pad_ref[1:h + 1, :, lane0 + c:lane0 + 2 * c] = act.astype(bf16)
    pad_ref[1:h + 1, :, lane0 + 2 * c:lane0 + 3 * c] = right_nb.astype(bf16)


def _conv3x3_rows(pad_ref, w_ref, h, w):
    """3x3 / stride 1 / pad 1 conv as THREE row-tap MXU matmuls over a
    column-shift-expanded scratch (no im2col, no per-tap copies).
      pad_ref: (H+2, W, 3*Cin) bf16 (rows 0 / H+1 = zero vertical halo)
      w_ref:   (3, 3*Cin, Cout) bf16, K ordered kx-major / cin-minor.
    Returns the (H*W, Cout) f32 accumulator (no bias / activation)."""
    ck = pad_ref.shape[-1]
    cout = w_ref.shape[-1]
    acc = jnp.zeros((h * w, cout), jnp.float32)
    for dy in range(3):
        rows = pad_ref[dy:dy + h, :, :]            # aligned (H, W, 3*Cin) load
        acc = acc + jnp.dot(rows.reshape(h * w, ck), w_ref[dy],
                            preferred_element_type=jnp.float32)
    return acc


# ----------------------------------------------------------------------------
# The fused RegSegHead kernel (one grid step == one batch image)
# ----------------------------------------------------------------------------
def _regseg_head_kernel(x4_ref, x8_ref, x16_ref,
                        w_h4_ref, b_h4_ref, w_h8_ref, b_h8_ref,
                        w_h16_ref, b_h16_ref,
                        w_c8_ref, b_c8_ref, w_c4_ref, b_c4_ref,
                        w_cls_ref, b_cls_ref,
                        out_ref,
                        pad8_ref, pad4_ref,
                        *, H4, W4, H8, W8, H16, W16):
    f32 = jnp.float32
    bf16 = jnp.bfloat16

    def head1x1(x_ref, w_ref, b_ref):
        # 1x1 conv + folded eval-mode BN + ReLU, computed channels-first
        # straight off the NCHW block ((Cout,Cin)@(Cin,HW) on the MXU, bf16 in
        # / f32 acc), then one small in-VMEM f32 transpose to channels-last.
        acc = jnp.dot(w_ref[...], x_ref[0].astype(bf16),
                      preferred_element_type=f32)              # (Cout, HW)
        act = jnp.maximum(acc + b_ref[...], 0.0)
        return jnp.transpose(act, (1, 0))                      # (HW, Cout) f32

    # --- 1x1 heads ------------------------------------------------------------
    h16 = head1x1(x16_ref, w_h16_ref, b_h16_ref)               # (H16*W16, 128)
    h8 = head1x1(x8_ref, w_h8_ref, b_h8_ref)                   # (H8*W8, 128)
    h4 = head1x1(x4_ref, w_h4_ref, b_h4_ref)                   # (H4*W4, 8)

    # --- /16 -> /8: fused bilinear upsample + residual add ----------------------
    s8 = h8.reshape(H8, W8, 128) + _upsample2x(h16.reshape(H16, W16, 128))

    # --- conv8: 3x3, 128 -> 64, ReLU (3 row taps, K = 384) ----------------------
    _zero_vhalo(pad8_ref)
    _store_shifted(pad8_ref, s8, 0)
    y8 = jnp.maximum(_conv3x3_rows(pad8_ref, w_c8_ref, H8, W8) + b_c8_ref[...],
                     0.0)                                       # (H8*W8, 64)

    # --- /8 -> /4 upsample; concat fused via disjoint lane groups of pad4 -------
    _zero_vhalo(pad4_ref)
    up8 = _upsample2x(y8.reshape(H8, W8, 64))                   # (H4, W4, 64)
    _store_shifted(pad4_ref, up8, 0)                            # lanes [0, 192)
    _store_shifted(pad4_ref, h4.reshape(H4, W4, 8), 3 * 64)     # lanes [192, 216)

    # --- conv4: 3x3, (64+8) -> 64, ReLU (3 row taps, K = 216) -------------------
    y4 = jnp.maximum(_conv3x3_rows(pad4_ref, w_c4_ref, H4, W4) + b_c4_ref[...],
                     0.0)                                       # (H4*W4, 64)

    # --- classifier 1x1, emitted channels-first (lane-dense store) --------------
    logits = lax.dot_general(w_cls_ref[...], y4.astype(bf16),
                             dimension_numbers=(((1,), (1,)), ((), ())),
                             preferred_element_type=f32)        # (ncls, H4*W4)
    out_ref[0] = (logits + b_cls_ref[...]).astype(out_ref.dtype)


# ----------------------------------------------------------------------------
# Wrapper
# ----------------------------------------------------------------------------
def _vmem_limit_bytes(params, C4, C8, C16, H4, W4, H8, W8, H16, W16, ncls):
    def rup(n, m):
        return -(-n // m) * m
    hw4, hw8, hw16 = H4 * W4, H8 * W8, H16 * W16
    blocks = 2 * 4 * (C4 * hw4 + C8 * hw8 + C16 * hw16
                      + rup(ncls, 8) * rup(hw4, 128))            # dbl-buffered io
    weights = 2 * sum(int(v.size) * v.dtype.itemsize for v in params.values())
    scratch = 2 * ((H8 + 2) * rup(W8, 16) * rup(3 * 128, 128)
                   + (H4 + 2) * rup(W4, 16) * rup(3 * 72, 128))  # bf16 scratches
    live = 4 * (hw4 * (64 * 5 + 8 * 2) + hw8 * (128 * 4 + 64 * 2)
                + hw16 * 128 * 2)                                # f32 temporaries
    est = blocks + weights + scratch + live
    return int(min(64 * 2 ** 20, max(2 * est, 8 * 2 ** 20)))


def regseg_head_forward(params, x4, x8, x16):
    B, C4, H4, W4 = x4.shape
    _, C8, H8, W8 = x8.shape
    _, C16, H16, W16 = x16.shape
    # TODO(synk): only the exact-2x strides RegSeg produces are supported by
    # the fused in-kernel bilinear upsample.
    assert H4 == 2 * H8 and W4 == 2 * W8 and H8 == 2 * H16 and W8 == 2 * W16
    num_classes = params["w_cls"].shape[0]

    # NCHW -> (B, C, H*W) is metadata-only; the kernel consumes channels-first
    # blocks directly, so there are no standalone HBM transpose ops.
    x4f = x4.reshape(B, C4, H4 * W4)
    x8f = x8.reshape(B, C8, H8 * W8)
    x16f = x16.reshape(B, C16, H16 * W16)

    kernel = functools.partial(_regseg_head_kernel, H4=H4, W4=W4, H8=H8, W8=W8,
                               H16=H16, W16=W16)

    weight_order = ("w_h4", "b_h4", "w_h8", "b_h8", "w_h16", "b_h16",
                    "w_c8", "b_c8", "w_c4", "b_c4", "w_cls", "b_cls")

    def full_spec(shape):
        nd = len(shape)
        return pl.BlockSpec(shape, lambda b, _n=nd: (0,) * _n)

    in_specs = [
        pl.BlockSpec((1, C4, H4 * W4), lambda b: (b, 0, 0)),
        pl.BlockSpec((1, C8, H8 * W8), lambda b: (b, 0, 0)),
        pl.BlockSpec((1, C16, H16 * W16), lambda b: (b, 0, 0)),
    ] + [full_spec(params[k].shape) for k in weight_order]

    vmem_limit = _vmem_limit_bytes(params, C4, C8, C16, H4, W4, H8, W8,
                                   H16, W16, num_classes)

    out = pl.pallas_call(
        kernel,
        out_shape=jax.ShapeDtypeStruct((B, num_classes, H4 * W4), jnp.float32),
        grid=(B,),
        in_specs=in_specs,
        out_specs=pl.BlockSpec((1, num_classes, H4 * W4), lambda b: (b, 0, 0)),
        scratch_shapes=[
            pltpu.VMEM((H8 + 2, W8, 3 * 128), jnp.bfloat16),   # conv8 input
            pltpu.VMEM((H4 + 2, W4, 3 * 72), jnp.bfloat16),    # conv4 input
        ],
        compiler_params=pltpu.CompilerParams(
            dimension_semantics=("parallel",),
            vmem_limit_bytes=vmem_limit),
    )(x4f, x8f, x16f, *[params[k] for k in weight_order])

    # The kernel already emitted channels-first data; this reshape is free.
    return out.reshape(B, num_classes, H4, W4)


# ----------------------------------------------------------------------------
# Parameter construction (deterministic, mirrors RegSegHead._init_weight)
# ----------------------------------------------------------------------------
def init_params(num_classes, in_channels=(48, 128, 320), seed=0):
    key = jax.random.PRNGKey(seed)
    ks = jax.random.split(key, 6)
    bn = 1.0 / math.sqrt(1.0 + BN_EPS)  # eval-mode BN fold (mean 0, var 1)

    def kaiming(k, cout, cin, kh, kw):
        std = math.sqrt(2.0 / (cin * kh * kw))
        return jax.random.normal(k, (cout, cin, kh, kw), jnp.float32) * std

    w_h4 = kaiming(ks[0], 8, in_channels[0], 1, 1) * bn
    w_h8 = kaiming(ks[1], 128, in_channels[1], 1, 1) * bn
    w_h16 = kaiming(ks[2], 128, in_channels[2], 1, 1) * bn
    w_c8 = kaiming(ks[3], 64, 128, 3, 3) * bn
    w_c4 = kaiming(ks[4], 64, 64 + 8, 3, 3) * bn
    w_cls = kaiming(ks[5], num_classes, 64, 1, 1)  # plain conv (bias=0), no BN

    bf16, f32 = jnp.bfloat16, jnp.float32

    def head_w(w):  # (Cout, Cin, 1, 1) -> (Cout, Cin), channels-first matmul
        return w[:, :, 0, 0].astype(bf16)

    def conv_w_rowtaps(w):
        # (Cout, Cin, 3, 3) -> (3, 3*Cin, Cout): one K = 3*Cin matrix per
        # kernel row, K ordered kx-major / cin-minor to match the kernel's
        # column-shift-expanded scratch lane layout.
        t = jnp.transpose(w, (2, 3, 1, 0))                     # (ky,kx,Cin,Cout)
        return t.reshape(3, 3 * w.shape[1], w.shape[0]).astype(bf16)

    # conv4: the two concat sources keep separate lane groups in K:
    # x8-path (64 ch, kx-major) then x4-path (8 ch, kx-major).
    t4 = jnp.transpose(w_c4, (2, 3, 1, 0))                     # (3, 3, 72, 64)
    w_c4_k = jnp.concatenate(
        [t4[:, :, :64, :].reshape(3, 3 * 64, 64),
         t4[:, :, 64:, :].reshape(3, 3 * 8, 64)], axis=1).astype(bf16)

    return dict(
        w_h4=head_w(w_h4), b_h4=jnp.zeros((8, 1), f32),
        w_h8=head_w(w_h8), b_h8=jnp.zeros((128, 1), f32),
        w_h16=head_w(w_h16), b_h16=jnp.zeros((128, 1), f32),
        w_c8=conv_w_rowtaps(w_c8), b_c8=jnp.zeros((1, 64), f32),
        w_c4=w_c4_k, b_c4=jnp.zeros((1, 64), f32),
        w_cls=w_cls[:, :, 0, 0].astype(bf16),                   # (ncls, 64)
        b_cls=jnp.zeros((num_classes, 1), f32),
    )


# ----------------------------------------------------------------------------
# Plain-XLA reference (used only for the numerical self-check)
# ----------------------------------------------------------------------------
def _src_index(out_size, in_size):
    scale = in_size / out_size
    src = (jnp.arange(out_size, dtype=jnp.float32) + 0.5) * scale - 0.5
    src = jnp.maximum(src, 0.0)
    i0 = jnp.minimum(jnp.floor(src).astype(jnp.int32), in_size - 1)
    i1 = jnp.minimum(i0 + 1, in_size - 1)
    w1 = src - i0.astype(jnp.float32)
    return i0, i1, 1.0 - w1, w1


def _bilinear_resize_ref(x, oh, ow):
    B, H, W, C = x.shape
    iy0, iy1, wy0, wy1 = _src_index(oh, H)
    ix0, ix1, wx0, wx1 = _src_index(ow, W)
    xh = x[:, iy0] * wy0[None, :, None, None] + x[:, iy1] * wy1[None, :, None, None]
    return (xh[:, :, ix0] * wx0[None, None, :, None]
            + xh[:, :, ix1] * wx1[None, None, :, None])


def _reference_forward(params, x4, x8, x16):
    f32 = jnp.float32
    nhwc = lambda t: jnp.transpose(t, (0, 2, 3, 1))
    x4, x8, x16 = nhwc(x4), nhwc(x8), nhwc(x16)

    def conv1x1(x, w, b):  # w: (Cout, Cin)
        return jnp.einsum("bhwc,dc->bhwd", x, w.astype(f32)) + b.reshape(-1)

    def conv3x3(x, w_hwio, b):
        y = lax.conv_general_dilated(
            x, w_hwio.astype(f32), window_strides=(1, 1),
            padding=((1, 1), (1, 1)),
            dimension_numbers=("NHWC", "HWIO", "NHWC"))
        return y + b.reshape(-1)

    relu = lambda t: jnp.maximum(t, 0.0)
    w_c8 = params["w_c8"].reshape(3, 3, 128, 64)
    w_c4 = jnp.concatenate(
        [params["w_c4"][:, :3 * 64, :].reshape(3, 3, 64, 64),
         params["w_c4"][:, 3 * 64:, :].reshape(3, 3, 8, 64)], axis=2)

    h16 = relu(conv1x1(x16, params["w_h16"], params["b_h16"]))
    h8 = relu(conv1x1(x8, params["w_h8"], params["b_h8"]))
    h4 = relu(conv1x1(x4, params["w_h4"], params["b_h4"]))
    up16 = _bilinear_resize_ref(h16, h8.shape[1], h8.shape[2])
    y8 = relu(conv3x3(h8 + up16, w_c8, params["b_c8"]))
    up8 = _bilinear_resize_ref(y8, h4.shape[1], h4.shape[2])
    cat = jnp.concatenate([up8, h4], axis=-1)
    y4 = relu(conv3x3(cat, w_c4, params["b_c4"]))
    logits = jnp.einsum("bhwc,dc->bdhw", y4, params["w_cls"].astype(f32))
    return logits + params["b_cls"].reshape(1, -1, 1, 1)


if __name__ == "__main__":
    num_classes = 3
    B = 2
    key = jax.random.PRNGKey(0)
    k4, k8, k16 = jax.random.split(key, 3)
    x4 = jax.random.normal(k4, (B, 48, 16, 16), jnp.float32)
    x8 = jax.random.normal(k8, (B, 128, 8, 8), jnp.float32)
    x16 = jax.random.normal(k16, (B, 320, 4, 4), jnp.float32)

    params = init_params(num_classes)
    fwd = jax.jit(functools.partial(regseg_head_forward, params))
    out = jax.block_until_ready(fwd(x4, x8, x16))
    assert out.shape == (B, num_classes, 16, 16), out.shape
    assert out.dtype == jnp.float32

    # Numerical self-check vs. plain-XLA reference (tolerances cover the bf16
    # activation casts at the MXU; structural bugs would give O(1) errors).
    ref = jax.block_until_ready(
        jax.jit(functools.partial(_reference_forward, params))(x4, x8, x16))
    diff = jnp.abs(out - ref)
    max_err = float(jnp.max(diff))
    mean_err = float(jnp.mean(diff))
    assert max_err < 0.5, f"max abs err {max_err}"
    assert mean_err < 0.1, f"mean abs err {mean_err}"
    print("KERNEL_OK")
</pallas_src>

<mosaic_0001>
module attributes {stable_mosaic.version = 11 : i64} {
  func.func @_regseg_head_kernel(%arg0: i32, %arg1: memref<1x48x256xf32, #tpu.memory_space<vmem>>, %arg2: memref<1x128x64xf32, #tpu.memory_space<vmem>>, %arg3: memref<1x320x16xf32, #tpu.memory_space<vmem>>, %arg4: memref<8x48xbf16, #tpu.memory_space<vmem>>, %arg5: memref<8x1xf32, #tpu.memory_space<vmem>>, %arg6: memref<128x128xbf16, #tpu.memory_space<vmem>>, %arg7: memref<128x1xf32, #tpu.memory_space<vmem>>, %arg8: memref<128x320xbf16, #tpu.memory_space<vmem>>, %arg9: memref<128x1xf32, #tpu.memory_space<vmem>>, %arg10: memref<3x384x64xbf16, #tpu.memory_space<vmem>>, %arg11: memref<1x64xf32, #tpu.memory_space<vmem>>, %arg12: memref<3x216x64xbf16, #tpu.memory_space<vmem>>, %arg13: memref<1x64xf32, #tpu.memory_space<vmem>>, %arg14: memref<3x64xbf16, #tpu.memory_space<vmem>>, %arg15: memref<3x1xf32, #tpu.memory_space<vmem>>, %arg16: memref<1x3x256xf32, #tpu.memory_space<vmem>>, %arg17: memref<10x8x384xbf16, #tpu.memory_space<vmem>>, %arg18: memref<18x16x216xbf16, #tpu.memory_space<vmem>>) attributes {dimension_semantics = [#tpu.dimension_semantics<parallel>], iteration_bounds = array<i64: 2>, scalar_prefetch = 0 : i64, scratch_operands = 2 : i64, tpu.core_type = #tpu.core_type<tc>, window_params = [{transform_indices = @transform_0, window_bounds = array<i64: 1, 48, 256>}, {transform_indices = @transform_1, window_bounds = array<i64: 1, 128, 64>}, {transform_indices = @transform_2, window_bounds = array<i64: 1, 320, 16>}, {pipeline_mode = #tpu.pipeline_mode<synchronous>, transform_indices = @transform_3, window_bounds = array<i64: 8, 48>}, {pipeline_mode = #tpu.pipeline_mode<synchronous>, transform_indices = @transform_4, window_bounds = array<i64: 8, 1>}, {pipeline_mode = #tpu.pipeline_mode<synchronous>, transform_indices = @transform_5, window_bounds = array<i64: 128, 128>}, {pipeline_mode = #tpu.pipeline_mode<synchronous>, transform_indices = @transform_6, window_bounds = array<i64: 128, 1>}, {pipeline_mode = #tpu.pipeline_mode<synchronous>, transform_indices = @transform_7, window_bounds = array<i64: 128, 320>}, {pipeline_mode = #tpu.pipeline_mode<synchronous>, transform_indices = @transform_8, window_bounds = array<i64: 128, 1>}, {pipeline_mode = #tpu.pipeline_mode<synchronous>, transform_indices = @transform_9, window_bounds = array<i64: 3, 384, 64>}, {pipeline_mode = #tpu.pipeline_mode<synchronous>, transform_indices = @transform_10, window_bounds = array<i64: 1, 64>}, {pipeline_mode = #tpu.pipeline_mode<synchronous>, transform_indices = @transform_11, window_bounds = array<i64: 3, 216, 64>}, {pipeline_mode = #tpu.pipeline_mode<synchronous>, transform_indices = @transform_12, window_bounds = array<i64: 1, 64>}, {pipeline_mode = #tpu.pipeline_mode<synchronous>, transform_indices = @transform_13, window_bounds = array<i64: 3, 64>}, {pipeline_mode = #tpu.pipeline_mode<synchronous>, transform_indices = @transform_14, window_bounds = array<i64: 3, 1>}, {transform_indices = @transform_15, window_bounds = array<i64: 1, 3, 256>}]} {
    %c0 = arith.constant 0 : index
    %c0_0 = arith.constant 0 : index
    %0 = vector.load %arg8[%c0, %c0_0] : memref<128x320xbf16, #tpu.memory_space<vmem>>, vector<128x320xbf16>
    %c0_1 = arith.constant 0 : index
    %c0_2 = arith.constant 0 : index
    %c0_3 = arith.constant 0 : index
    %1 = vector.load %arg3[%c0_1, %c0_2, %c0_3] : memref<1x320x16xf32, #tpu.memory_space<vmem>>, vector<1x320x16xf32>
    %2 = vector.shape_cast %1 : vector<1x320x16xf32> to vector<320x16xf32>
    %3 = arith.truncf %2 : vector<320x16xf32> to vector<320x16xbf16>
    %cst = arith.constant dense<0.000000e+00> : vector<128x16xf32>
    %4 = tpu.matmul %0, %3, %cst {dimension_numbers = #tpu.dot_dimension_numbers<[1], [0], [0], [1], [0, 0, 1, 1], [], []>} : vector<128x320xbf16>, vector<320x16xbf16>, vector<128x16xf32> -> vector<128x16xf32>
    %c0_4 = arith.constant 0 : index
    %c0_5 = arith.constant 0 : index
    %5 = vector.load %arg9[%c0_4, %c0_5] : memref<128x1xf32, #tpu.memory_space<vmem>>, vector<128x1xf32>
    %6 = vector.broadcast %5 : vector<128x1xf32> to vector<128x16xf32>
    %7 = arith.addf %4, %6 : vector<128x16xf32>
    %cst_6 = arith.constant 0.000000e+00 : f32
    %8 = vector.broadcast %cst_6 : f32 to vector<128x16xf32>
    %9 = arith.maximumf %7, %8 : vector<128x16xf32>
    %10 = tpu.transpose %9, [1, 0] : vector<128x16xf32> -> vector<16x128xf32>
    %c0_7 = arith.constant 0 : index
    %c0_8 = arith.constant 0 : index
    %11 = vector.load %arg6[%c0_7, %c0_8] : memref<128x128xbf16, #tpu.memory_space<vmem>>, vector<128x128xbf16>
    %c0_9 = arith.constant 0 : index
    %c0_10 = arith.constant 0 : index
    %c0_11 = arith.constant 0 : index
    %12 = vector.load %arg2[%c0_9, %c0_10, %c0_11] : memref<1x128x64xf32, #tpu.memory_space<vmem>>, vector<1x128x64xf32>
    %13 = vector.shape_cast %12 : vector<1x128x64xf32> to vector<128x64xf32>
    %14 = arith.truncf %13 : vector<128x64xf32> to vector<128x64xbf16>
    %cst_12 = arith.constant dense<0.000000e+00> : vector<128x64xf32>
    %15 = tpu.matmul %11, %14, %cst_12 {dimension_numbers = #tpu.dot_dimension_numbers<[1], [0], [0], [1], [0, 0, 1, 1], [], []>} : vector<128x128xbf16>, vector<128x64xbf16>, vector<128x64xf32> -> vector<128x64xf32>
    %c0_13 = arith.constant 0 : index
    %c0_14 = arith.constant 0 : index
    %16 = vector.load %arg7[%c0_13, %c0_14] : memref<128x1xf32, #tpu.memory_space<vmem>>, vector<128x1xf32>
    %17 = vector.broadcast %16 : vector<128x1xf32> to vector<128x64xf32>
    %18 = arith.addf %15, %17 : vector<128x64xf32>
    %cst_15 = arith.constant 0.000000e+00 : f32
    %19 = vector.broadcast %cst_15 : f32 to vector<128x64xf32>
    %20 = arith.maximumf %18, %19 : vector<128x64xf32>
    %21 = tpu.transpose %20, [1, 0] : vector<128x64xf32> -> vector<64x128xf32>
    %c0_16 = arith.constant 0 : index
    %c0_17 = arith.constant 0 : index
    %22 = vector.load %arg4[%c0_16, %c0_17] : memref<8x48xbf16, #tpu.memory_space<vmem>>, vector<8x48xbf16>
    %c0_18 = arith.constant 0 : index
    %c0_19 = arith.constant 0 : index
    %c0_20 = arith.constant 0 : index
    %23 = vector.load %arg1[%c0_18, %c0_19, %c0_20] : memref<1x48x256xf32, #tpu.memory_space<vmem>>, vector<1x48x256xf32>
    %24 = vector.shape_cast %23 : vector<1x48x256xf32> to vector<48x256xf32>
    %25 = arith.truncf %24 : vector<48x256xf32> to vector<48x256xbf16>
    %cst_21 = arith.constant dense<0.000000e+00> : vector<8x256xf32>
    %26 = tpu.matmul %22, %25, %cst_21 {dimension_numbers = #tpu.dot_dimension_numbers<[1], [0], [0], [1], [0, 0, 1, 1], [], []>} : vector<8x48xbf16>, vector<48x256xbf16>, vector<8x256xf32> -> vector<8x256xf32>
    %c0_22 = arith.constant 0 : index
    %c0_23 = arith.constant 0 : index
    %27 = vector.load %arg5[%c0_22, %c0_23] : memref<8x1xf32, #tpu.memory_space<vmem>>, vector<8x1xf32>
    %28 = vector.broadcast %27 : vector<8x1xf32> to vector<8x256xf32>
    %29 = arith.addf %26, %28 : vector<8x256xf32>
    %cst_24 = arith.constant 0.000000e+00 : f32
    %30 = vector.broadcast %cst_24 : f32 to vector<8x256xf32>
    %31 = arith.maximumf %29, %30 : vector<8x256xf32>
    %32 = tpu.transpose %31, [1, 0] : vector<8x256xf32> -> vector<256x8xf32>
    %33 = vector.shape_cast %21 : vector<64x128xf32> to vector<8x8x128xf32>
    %34 = vector.shape_cast %10 : vector<16x128xf32> to vector<4x4x128xf32>
    %35 = vector.extract_strided_slice %34 {offsets = [0, 0, 0], sizes = [4, 1, 128], strides = [1, 1, 1]} : vector<4x4x128xf32> to vector<4x1x128xf32>
    %36 = vector.extract_strided_slice %34 {offsets = [0, 0, 0], sizes = [4, 3, 128], strides = [1, 1, 1]} : vector<4x4x128xf32> to vector<4x3x128xf32>
    %37 = tpu.concatenate %35, %36 in 1 : vector<4x1x128xf32>, vector<4x3x128xf32> -> vector<4x4x128xf32>
    %38 = vector.extract_strided_slice %34 {offsets = [0, 1, 0], sizes = [4, 3, 128], strides = [1, 1, 1]} : vector<4x4x128xf32> to vector<4x3x128xf32>
    %39 = vector.extract_strided_slice %34 {offsets = [0, 3, 0], sizes = [4, 1, 128], strides = [1, 1, 1]} : vector<4x4x128xf32> to vector<4x1x128xf32>
    %40 = tpu.concatenate %38, %39 in 1 : vector<4x3x128xf32>, vector<4x1x128xf32> -> vector<4x4x128xf32>
    %cst_25 = arith.constant 2.500000e-01 : f32
    %41 = vector.broadcast %cst_25 : f32 to vector<4x4x128xf32>
    %42 = arith.mulf %41, %37 : vector<4x4x128xf32>
    %cst_26 = arith.constant 7.500000e-01 : f32
    %43 = vector.broadcast %cst_26 : f32 to vector<4x4x128xf32>
    %44 = arith.mulf %43, %34 : vector<4x4x128xf32>
    %45 = arith.addf %42, %44 : vector<4x4x128xf32>
    %cst_27 = arith.constant 7.500000e-01 : f32
    %46 = vector.broadcast %cst_27 : f32 to vector<4x4x128xf32>
    %47 = arith.mulf %46, %34 : vector<4x4x128xf32>
    %cst_28 = arith.constant 2.500000e-01 : f32
    %48 = vector.broadcast %cst_28 : f32 to vector<4x4x128xf32>
    %49 = arith.mulf %48, %40 : vector<4x4x128xf32>
    %50 = arith.addf %47, %49 : vector<4x4x128xf32>
    %51 = vector.shape_cast %45 : vector<4x4x128xf32> to vector<4x4x1x128xf32>
    %52 = vector.shape_cast %50 : vector<4x4x128xf32> to vector<4x4x1x128xf32>
    %53 = tpu.concatenate %51, %52 in 2 : vector<4x4x1x128xf32>, vector<4x4x1x128xf32> -> vector<4x4x2x128xf32>
    %54 = vector.shape_cast %53 : vector<4x4x2x128xf32> to vector<4x8x128xf32>
    %55 = vector.extract_strided_slice %54 {offsets = [0, 0, 0], sizes = [1, 8, 128], strides = [1, 1, 1]} : vector<4x8x128xf32> to vector<1x8x128xf32>
    %56 = vector.extract_strided_slice %54 {offsets = [0, 0, 0], sizes = [3, 8, 128], strides = [1, 1, 1]} : vector<4x8x128xf32> to vector<3x8x128xf32>
    %57 = tpu.concatenate %55, %56 in 0 : vector<1x8x128xf32>, vector<3x8x128xf32> -> vector<4x8x128xf32>
    %58 = vector.extract_strided_slice %54 {offsets = [1, 0, 0], sizes = [3, 8, 128], strides = [1, 1, 1]} : vector<4x8x128xf32> to vector<3x8x128xf32>
    %59 = vector.extract_strided_slice %54 {offsets = [3, 0, 0], sizes = [1, 8, 128], strides = [1, 1, 1]} : vector<4x8x128xf32> to vector<1x8x128xf32>
    %60 = tpu.concatenate %58, %59 in 0 : vector<3x8x128xf32>, vector<1x8x128xf32> -> vector<4x8x128xf32>
    %cst_29 = arith.constant 2.500000e-01 : f32
    %61 = vector.broadcast %cst_29 : f32 to vector<4x8x128xf32>
    %62 = arith.mulf %61, %57 : vector<4x8x128xf32>
    %cst_30 = arith.constant 7.500000e-01 : f32
    %63 = vector.broadcast %cst_30 : f32 to vector<4x8x128xf32>
    %64 = arith.mulf %63, %54 : vector<4x8x128xf32>
    %65 = arith.addf %62, %64 : vector<4x8x128xf32>
    %cst_31 = arith.constant 7.500000e-01 : f32
    %66 = vector.broadcast %cst_31 : f32 to vector<4x8x128xf32>
    %67 = arith.mulf %66, %54 : vector<4x8x128xf32>
    %cst_32 = arith.constant 2.500000e-01 : f32
    %68 = vector.broadcast %cst_32 : f32 to vector<4x8x128xf32>
    %69 = arith.mulf %68, %60 : vector<4x8x128xf32>
    %70 = arith.addf %67, %69 : vector<4x8x128xf32>
    %71 = vector.shape_cast %65 : vector<4x8x128xf32> to vector<4x1x8x128xf32>
    %72 = vector.shape_cast %70 : vector<4x8x128xf32> to vector<4x1x8x128xf32>
    %73 = tpu.concatenate %71, %72 in 1 : vector<4x1x8x128xf32>, vector<4x1x8x128xf32> -> vector<4x2x8x128xf32>
    %74 = vector.shape_cast %73 : vector<4x2x8x128xf32> to vector<8x8x128xf32>
    %75 = arith.addf %33, %74 : vector<8x8x128xf32>
    %cst_33 = arith.constant 0.000000e+00 : bf16
    %76 = vector.broadcast %cst_33 : bf16 to vector<1x8x384xbf16>
    %c0_34 = arith.constant 0 : index
    %c0_35 = arith.constant 0 : index
    %c0_36 = arith.constant 0 : index
    %77 = vector.load %arg17[%c0_34, %c0_35, %c0_36] : memref<10x8x384xbf16, #tpu.memory_space<vmem>>, vector<1x8x384xbf16>
    tpu.vector_store %arg17[%c0_34, %c0_35, %c0_36], %76 {strides = array<i32>} : memref<10x8x384xbf16, #tpu.memory_space<vmem>>, vector<1x8x384xbf16>,
    %c9 = arith.constant 9 : index
    %c0_37 = arith.constant 0 : index
    %c0_38 = arith.constant 0 : index
    %78 = vector.load %arg17[%c9, %c0_37, %c0_38] : memref<10x8x384xbf16, #tpu.memory_space<vmem>>, vector<1x8x384xbf16>
    tpu.vector_store %arg17[%c9, %c0_37, %c0_38], %76 {strides = array<i32>} : memref<10x8x384xbf16, #tpu.memory_space<vmem>>, vector<1x8x384xbf16>,
    %cst_39 = arith.constant 0.000000e+00 : f32
    %79 = vector.broadcast %cst_39 : f32 to vector<8x1x128xf32>
    %80 = vector.extract_strided_slice %75 {offsets = [0, 0, 0], sizes = [8, 7, 128], strides = [1, 1, 1]} : vector<8x8x128xf32> to vector<8x7x128xf32>
    %81 = tpu.concatenate %79, %80 in 1 : vector<8x1x128xf32>, vector<8x7x128xf32> -> vector<8x8x128xf32>
    %82 = vector.extract_strided_slice %75 {offsets = [0, 1, 0], sizes = [8, 7, 128], strides = [1, 1, 1]} : vector<8x8x128xf32> to vector<8x7x128xf32>
    %83 = tpu.concatenate %82, %79 in 1 : vector<8x7x128xf32>, vector<8x1x128xf32> -> vector<8x8x128xf32>
    %84 = arith.truncf %81 : vector<8x8x128xf32> to vector<8x8x128xbf16>
    %c1 = arith.constant 1 : index
    %c0_40 = arith.constant 0 : index
    %c0_41 = arith.constant 0 : index
    %85 = vector.load %arg17[%c1, %c0_40, %c0_41] : memref<10x8x384xbf16, #tpu.memory_space<vmem>>, vector<8x8x128xbf16>
    tpu.vector_store %arg17[%c1, %c0_40, %c0_41], %84 {strides = array<i32>} : memref<10x8x384xbf16, #tpu.memory_space<vmem>>, vector<8x8x128xbf16>,
    %86 = arith.truncf %75 : vector<8x8x128xf32> to vector<8x8x128xbf16>
    %c1_42 = arith.constant 1 : index
    %c0_43 = arith.constant 0 : index
    %c128 = arith.constant 128 : index
    %87 = vector.load %arg17[%c1_42, %c0_43, %c128] : memref<10x8x384xbf16, #tpu.memory_space<vmem>>, vector<8x8x128xbf16>
    tpu.vector_store %arg17[%c1_42, %c0_43, %c128], %86 {strides = array<i32>} : memref<10x8x384xbf16, #tpu.memory_space<vmem>>, vector<8x8x128xbf16>,
    %88 = arith.truncf %83 : vector<8x8x128xf32> to vector<8x8x128xbf16>
    %c1_44 = arith.constant 1 : index
    %c0_45 = arith.constant 0 : index
    %c256 = arith.constant 256 : index
    %89 = vector.load %arg17[%c1_44, %c0_45, %c256] : memref<10x8x384xbf16, #tpu.memory_space<vmem>>, vector<8x8x128xbf16>
    tpu.vector_store %arg17[%c1_44, %c0_45, %c256], %88 {strides = array<i32>} : memref<10x8x384xbf16, #tpu.memory_space<vmem>>, vector<8x8x128xbf16>,
    %cst_46 = arith.constant 0.000000e+00 : f32
    %90 = vector.broadcast %cst_46 : f32 to vector<64x64xf32>
    %c0_47 = arith.constant 0 : index
    %c0_48 = arith.constant 0 : index
    %c0_49 = arith.constant 0 : index
    %91 = vector.load %arg17[%c0_47, %c0_48, %c0_49] : memref<10x8x384xbf16, #tpu.memory_space<vmem>>, vector<8x8x384xbf16>
    %92 = vector.shape_cast %91 : vector<8x8x384xbf16> to vector<64x384xbf16>
    %c0_50 = arith.constant 0 : index
    %c0_51 = arith.constant 0 : index
    %c0_52 = arith.constant 0 : index
    %93 = vector.load %arg10[%c0_50, %c0_51, %c0_52] : memref<3x384x64xbf16, #tpu.memory_space<vmem>>, vector<1x384x64xbf16>
    %94 = vector.shape_cast %93 : vector<1x384x64xbf16> to vector<384x64xbf16>
    %cst_53 = arith.constant dense<0.000000e+00> : vector<64x64xf32>
    %95 = tpu.matmul %92, %94, %cst_53 {dimension_numbers = #tpu.dot_dimension_numbers<[1], [0], [0], [1], [0, 0, 1, 1], [], []>} : vector<64x384xbf16>, vector<384x64xbf16>, vector<64x64xf32> -> vector<64x64xf32>
    %96 = arith.addf %90, %95 : vector<64x64xf32>
    %c1_54 = arith.constant 1 : index
    %c0_55 = arith.constant 0 : index
    %c0_56 = arith.constant 0 : index
    %97 = vector.load %arg17[%c1_54, %c0_55, %c0_56] : memref<10x8x384xbf16, #tpu.memory_space<vmem>>, vector<8x8x384xbf16>
    %98 = vector.shape_cast %97 : vector<8x8x384xbf16> to vector<64x384xbf16>
    %c1_57 = arith.constant 1 : index
    %c0_58 = arith.constant 0 : index
    %c0_59 = arith.constant 0 : index
    %99 = vector.load %arg10[%c1_57, %c0_58, %c0_59] : memref<3x384x64xbf16, #tpu.memory_space<vmem>>, vector<1x384x64xbf16>
    %100 = vector.shape_cast %99 : vector<1x384x64xbf16> to vector<384x64xbf16>
    %cst_60 = arith.constant dense<0.000000e+00> : vector<64x64xf32>
    %101 = tpu.matmul %98, %100, %cst_60 {dimension_numbers = #tpu.dot_dimension_numbers<[1], [0], [0], [1], [0, 0, 1, 1], [], []>} : vector<64x384xbf16>, vector<384x64xbf16>, vector<64x64xf32> -> vector<64x64xf32>
    %102 = arith.addf %96, %101 : vector<64x64xf32>
    %c2 = arith.constant 2 : index
    %c0_61 = arith.constant 0 : index
    %c0_62 = arith.constant 0 : index
    %103 = vector.load %arg17[%c2, %c0_61, %c0_62] : memref<10x8x384xbf16, #tpu.memory_space<vmem>>, vector<8x8x384xbf16>
    %104 = vector.shape_cast %103 : vector<8x8x384xbf16> to vector<64x384xbf16>
    %c2_63 = arith.constant 2 : index
    %c0_64 = arith.constant 0 : index
    %c0_65 = arith.constant 0 : index
    %105 = vector.load %arg10[%c2_63, %c0_64, %c0_65] : memref<3x384x64xbf16, #tpu.memory_space<vmem>>, vector<1x384x64xbf16>
    %106 = vector.shape_cast %105 : vector<1x384x64xbf16> to vector<384x64xbf16>
    %cst_66 = arith.constant dense<0.000000e+00> : vector<64x64xf32>
    %107 = tpu.matmul %104, %106, %cst_66 {dimension_numbers = #tpu.dot_dimension_numbers<[1], [0], [0], [1], [0, 0, 1, 1], [], []>} : vector<64x384xbf16>, vector<384x64xbf16>, vector<64x64xf32> -> vector<64x64xf32>
    %108 = arith.addf %102, %107 : vector<64x64xf32>
    %c0_67 = arith.constant 0 : index
    %c0_68 = arith.constant 0 : index
    %109 = vector.load %arg11[%c0_67, %c0_68] : memref<1x64xf32, #tpu.memory_space<vmem>>, vector<1x64xf32>
    %110 = vector.broadcast %109 : vector<1x64xf32> to vector<64x64xf32>
    %111 = arith.addf %108, %110 : vector<64x64xf32>
    %cst_69 = arith.constant 0.000000e+00 : f32
    %112 = vector.broadcast %cst_69 : f32 to vector<64x64xf32>
    %113 = arith.maximumf %111, %112 : vector<64x64xf32>
    %cst_70 = arith.constant 0.000000e+00 : bf16
    %114 = vector.broadcast %cst_70 : bf16 to vector<1x16x216xbf16>
    %c0_71 = arith.constant 0 : index
    %c0_72 = arith.constant 0 : index
    %c0_73 = arith.constant 0 : index
    %115 = vector.load %arg18[%c0_71, %c0_72, %c0_73] : memref<18x16x216xbf16, #tpu.memory_space<vmem>>, vector<1x16x216xbf16>
    tpu.vector_store %arg18[%c0_71, %c0_72, %c0_73], %114 {strides = array<i32>} : memref<18x16x216xbf16, #tpu.memory_space<vmem>>, vector<1x16x216xbf16>,
    %c17 = arith.constant 17 : index
    %c0_74 = arith.constant 0 : index
    %c0_75 = arith.constant 0 : index
    %116 = vector.load %arg18[%c17, %c0_74, %c0_75] : memref<18x16x216xbf16, #tpu.memory_space<vmem>>, vector<1x16x216xbf16>
    tpu.vector_store %arg18[%c17, %c0_74, %c0_75], %114 {strides = array<i32>} : memref<18x16x216xbf16, #tpu.memory_space<vmem>>, vector<1x16x216xbf16>,
    %117 = vector.shape_cast %113 : vector<64x64xf32> to vector<8x8x64xf32>
    %118 = vector.extract_strided_slice %117 {offsets = [0, 0, 0], sizes = [8, 1, 64], strides = [1, 1, 1]} : vector<8x8x64xf32> to vector<8x1x64xf32>
    %119 = vector.extract_strided_slice %117 {offsets = [0, 0, 0], sizes = [8, 7, 64], strides = [1, 1, 1]} : vector<8x8x64xf32> to vector<8x7x64xf32>
    %120 = tpu.concatenate %118, %119 in 1 : vector<8x1x64xf32>, vector<8x7x64xf32> -> vector<8x8x64xf32>
    %121 = vector.extract_strided_slice %117 {offsets = [0, 1, 0], sizes = [8, 7, 64], strides = [1, 1, 1]} : vector<8x8x64xf32> to vector<8x7x64xf32>
    %122 = vector.extract_strided_slice %117 {offsets = [0, 7, 0], sizes = [8, 1, 64], strides = [1, 1, 1]} : vector<8x8x64xf32> to vector<8x1x64xf32>
    %123 = tpu.concatenate %121, %122 in 1 : vector<8x7x64xf32>, vector<8x1x64xf32> -> vector<8x8x64xf32>
    %cst_76 = arith.constant 2.500000e-01 : f32
    %124 = vector.broadcast %cst_76 : f32 to vector<8x8x64xf32>
    %125 = arith.mulf %124, %120 : vector<8x8x64xf32>
    %cst_77 = arith.constant 7.500000e-01 : f32
    %126 = vector.broadcast %cst_77 : f32 to vector<8x8x64xf32>
    %127 = arith.mulf %126, %117 : vector<8x8x64xf32>
    %128 = arith.addf %125, %127 : vector<8x8x64xf32>
    %cst_78 = arith.constant 7.500000e-01 : f32
    %129 = vector.broadcast %cst_78 : f32 to vector<8x8x64xf32>
    %130 = arith.mulf %129, %117 : vector<8x8x64xf32>
    %cst_79 = arith.constant 2.500000e-01 : f32
    %131 = vector.broadcast %cst_79 : f32 to vector<8x8x64xf32>
    %132 = arith.mulf %131, %123 : vector<8x8x64xf32>
    %133 = arith.addf %130, %132 : vector<8x8x64xf32>
    %134 = vector.shape_cast %128 : vector<8x8x64xf32> to vector<8x8x1x64xf32>
    %135 = vector.shape_cast %133 : vector<8x8x64xf32> to vector<8x8x1x64xf32>
    %136 = tpu.concatenate %134, %135 in 2 : vector<8x8x1x64xf32>, vector<8x8x1x64xf32> -> vector<8x8x2x64xf32>
    %137 = vector.shape_cast %136 : vector<8x8x2x64xf32> to vector<8x16x64xf32>
    %138 = vector.extract_strided_slice %137 {offsets = [0, 0, 0], sizes = [1, 16, 64], strides = [1, 1, 1]} : vector<8x16x64xf32> to vector<1x16x64xf32>
    %139 = vector.extract_strided_slice %137 {offsets = [0, 0, 0], sizes = [7, 16, 64], strides = [1, 1, 1]} : vector<8x16x64xf32> to vector<7x16x64xf32>
    %140 = tpu.concatenate %138, %139 in 0 : vector<1x16x64xf32>, vector<7x16x64xf32> -> vector<8x16x64xf32>
    %141 = vector.extract_strided_slice %137 {offsets = [1, 0, 0], sizes = [7, 16, 64], strides = [1, 1, 1]} : vector<8x16x64xf32> to vector<7x16x64xf32>
    %142 = vector.extract_strided_slice %137 {offsets = [7, 0, 0], sizes = [1, 16, 64], strides = [1, 1, 1]} : vector<8x16x64xf32> to vector<1x16x64xf32>
    %143 = tpu.concatenate %141, %142 in 0 : vector<7x16x64xf32>, vector<1x16x64xf32> -> vector<8x16x64xf32>
    %cst_80 = arith.constant 2.500000e-01 : f32
    %144 = vector.broadcast %cst_80 : f32 to vector<8x16x64xf32>
    %145 = arith.mulf %144, %140 : vector<8x16x64xf32>
    %cst_81 = arith.constant 7.500000e-01 : f32
    %146 = vector.broadcast %cst_81 : f32 to vector<8x16x64xf32>
    %147 = arith.mulf %146, %137 : vector<8x16x64xf32>
    %148 = arith.addf %145, %147 : vector<8x16x64xf32>
    %cst_82 = arith.constant 7.500000e-01 : f32
    %149 = vector.broadcast %cst_82 : f32 to vector<8x16x64xf32>
    %150 = arith.mulf %149, %137 : vector<8x16x64xf32>
    %cst_83 = arith.constant 2.500000e-01 : f32
    %151 = vector.broadcast %cst_83 : f32 to vector<8x16x64xf32>
    %152 = arith.mulf %151, %143 : vector<8x16x64xf32>
    %153 = arith.addf %150, %152 : vector<8x16x64xf32>
    %154 = vector.shape_cast %148 : vector<8x16x64xf32> to vector<8x1x16x64xf32>
    %155 = vector.shape_cast %153 : vector<8x16x64xf32> to vector<8x1x16x64xf32>
    %156 = tpu.concatenate %154, %155 in 1 : vector<8x1x16x64xf32>, vector<8x1x16x64xf32> -> vector<8x2x16x64xf32>
    %157 = vector.shape_cast %156 : vector<8x2x16x64xf32> to vector<16x16x64xf32>
    %cst_84 = arith.constant 0.000000e+00 : f32
    %158 = vector.broadcast %cst_84 : f32 to vector<16x1x64xf32>
    %159 = vector.extract_strided_slice %157 {offsets = [0, 0, 0], sizes = [16, 15, 64], strides = [1, 1, 1]} : vector<16x16x64xf32> to vector<16x15x64xf32>
    %160 = tpu.concatenate %158, %159 in 1 : vector<16x1x64xf32>, vector<16x15x64xf32> -> vector<16x16x64xf32>
    %161 = vector.extract_strided_slice %157 {offsets = [0, 1, 0], sizes = [16, 15, 64], strides = [1, 1, 1]} : vector<16x16x64xf32> to vector<16x15x64xf32>
    %162 = tpu.concatenate %161, %158 in 1 : vector<16x15x64xf32>, vector<16x1x64xf32> -> vector<16x16x64xf32>
    %163 = arith.truncf %160 : vector<16x16x64xf32> to vector<16x16x64xbf16>
    %c1_85 = arith.constant 1 : index
    %c0_86 = arith.constant 0 : index
    %c0_87 = arith.constant 0 : index
    %164 = vector.load %arg18[%c1_85, %c0_86, %c0_87] : memref<18x16x216xbf16, #tpu.memory_space<vmem>>, vector<16x16x64xbf16>
    tpu.vector_store %arg18[%c1_85, %c0_86, %c0_87], %163 {strides = array<i32>} : memref<18x16x216xbf16, #tpu.memory_space<vmem>>, vector<16x16x64xbf16>,
    %165 = arith.truncf %157 : vector<16x16x64xf32> to vector<16x16x64xbf16>
    %c1_88 = arith.constant 1 : index
    %c0_89 = arith.constant 0 : index
    %c64 = arith.constant 64 : index
    %166 = vector.load %arg18[%c1_88, %c0_89, %c64] : memref<18x16x216xbf16, #tpu.memory_space<vmem>>, vector<16x16x64xbf16>
    tpu.vector_store %arg18[%c1_88, %c0_89, %c64], %165 {strides = array<i32>} : memref<18x16x216xbf16, #tpu.memory_space<vmem>>, vector<16x16x64xbf16>,
    %167 = arith.truncf %162 : vector<16x16x64xf32> to vector<16x16x64xbf16>
    %c1_90 = arith.constant 1 : index
    %c0_91 = arith.constant 0 : index
    %c128_92 = arith.constant 128 : index
    %168 = vector.load %arg18[%c1_90, %c0_91, %c128_92] : memref<18x16x216xbf16, #tpu.memory_space<vmem>>, vector<16x16x64xbf16>
    tpu.vector_store %arg18[%c1_90, %c0_91, %c128_92], %167 {strides = array<i32>} : memref<18x16x216xbf16, #tpu.memory_space<vmem>>, vector<16x16x64xbf16>,
    %169 = vector.shape_cast %32 : vector<256x8xf32> to vector<16x16x8xf32>
    %cst_93 = arith.constant 0.000000e+00 : f32
    %170 = vector.broadcast %cst_93 : f32 to vector<16x1x8xf32>
    %171 = vector.extract_strided_slice %169 {offsets = [0, 0, 0], sizes = [16, 15, 8], strides = [1, 1, 1]} : vector<16x16x8xf32> to vector<16x15x8xf32>
    %172 = tpu.concatenate %170, %171 in 1 : vector<16x1x8xf32>, vector<16x15x8xf32> -> vector<16x16x8xf32>
    %173 = vector.extract_strided_slice %169 {offsets = [0, 1, 0], sizes = [16, 15, 8], strides = [1, 1, 1]} : vector<16x16x8xf32> to vector<16x15x8xf32>
    %174 = tpu.concatenate %173, %170 in 1 : vector<16x15x8xf32>, vector<16x1x8xf32> -> vector<16x16x8xf32>
    %175 = arith.truncf %172 : vector<16x16x8xf32> to vector<16x16x8xbf16>
    %c1_94 = arith.constant 1 : index
    %c0_95 = arith.constant 0 : index
    %c192 = arith.constant 192 : index
    %176 = vector.load %arg18[%c1_94, %c0_95, %c192] : memref<18x16x216xbf16, #tpu.memory_space<vmem>>, vector<16x16x8xbf16>
    tpu.vector_store %arg18[%c1_94, %c0_95, %c192], %175 {strides = array<i32>} : memref<18x16x216xbf16, #tpu.memory_space<vmem>>, vector<16x16x8xbf16>,
    %177 = arith.truncf %169 : vector<16x16x8xf32> to vector<16x16x8xbf16>
    %c1_96 = arith.constant 1 : index
    %c0_97 = arith.constant 0 : index
    %c200 = arith.constant 200 : index
    %178 = vector.load %arg18[%c1_96, %c0_97, %c200] : memref<18x16x216xbf16, #tpu.memory_space<vmem>>, vector<16x16x8xbf16>
    tpu.vector_store %arg18[%c1_96, %c0_97, %c200], %177 {strides = array<i32>} : memref<18x16x216xbf16, #tpu.memory_space<vmem>>, vector<16x16x8xbf16>,
    %179 = arith.truncf %174 : vector<16x16x8xf32> to vector<16x16x8xbf16>
    %c1_98 = arith.constant 1 : index
    %c0_99 = arith.constant 0 : index
    %c208 = arith.constant 208 : index
    %180 = vector.load %arg18[%c1_98, %c0_99, %c208] : memref<18x16x216xbf16, #tpu.memory_space<vmem>>, vector<16x16x8xbf16>
    tpu.vector_store %arg18[%c1_98, %c0_99, %c208], %179 {strides = array<i32>} : memref<18x16x216xbf16, #tpu.memory_space<vmem>>, vector<16x16x8xbf16>,
    %cst_100 = arith.constant 0.000000e+00 : f32
    %181 = vector.broadcast %cst_100 : f32 to vector<256x64xf32>
    %c0_101 = arith.constant 0 : index
    %c0_102 = arith.constant 0 : index
    %c0_103 = arith.constant 0 : index
    %182 = vector.load %arg18[%c0_101, %c0_102, %c0_103] : memref<18x16x216xbf16, #tpu.memory_space<vmem>>, vector<16x16x216xbf16>
    %183 = vector.shape_cast %182 : vector<16x16x216xbf16> to vector<256x216xbf16>
    %c0_104 = arith.constant 0 : index
    %c0_105 = arith.constant 0 : index
    %c0_106 = arith.constant 0 : index
    %184 = vector.load %arg12[%c0_104, %c0_105, %c0_106] : memref<3x216x64xbf16, #tpu.memory_space<vmem>>, vector<1x216x64xbf16>
    %185 = vector.shape_cast %184 : vector<1x216x64xbf16> to vector<216x64xbf16>
    %cst_107 = arith.constant dense<0.000000e+00> : vector<256x64xf32>
    %186 = tpu.matmul %183, %185, %cst_107 {dimension_numbers = #tpu.dot_dimension_numbers<[1], [0], [0], [1], [0, 0, 1, 1], [], []>} : vector<256x216xbf16>, vector<216x64xbf16>, vector<256x64xf32> -> vector<256x64xf32>
    %187 = arith.addf %181, %186 : vector<256x64xf32>
    %c1_108 = arith.constant 1 : index
    %c0_109 = arith.constant 0 : index
    %c0_110 = arith.constant 0 : index
    %188 = vector.load %arg18[%c1_108, %c0_109, %c0_110] : memref<18x16x216xbf16, #tpu.memory_space<vmem>>, vector<16x16x216xbf16>
    %189 = vector.shape_cast %188 : vector<16x16x216xbf16> to vector<256x216xbf16>
    %c1_111 = arith.constant 1 : index
    %c0_112 = arith.constant 0 : index
    %c0_113 = arith.constant 0 : index
    %190 = vector.load %arg12[%c1_111, %c0_112, %c0_113] : memref<3x216x64xbf16, #tpu.memory_space<vmem>>, vector<1x216x64xbf16>
    %191 = vector.shape_cast %190 : vector<1x216x64xbf16> to vector<216x64xbf16>
    %cst_114 = arith.constant dense<0.000000e+00> : vector<256x64xf32>
    %192 = tpu.matmul %189, %191, %cst_114 {dimension_numbers = #tpu.dot_dimension_numbers<[1], [0], [0], [1], [0, 0, 1, 1], [], []>} : vector<256x216xbf16>, vector<216x64xbf16>, vector<256x64xf32> -> vector<256x64xf32>
    %193 = arith.addf %187, %192 : vector<256x64xf32>
    %c2_115 = arith.constant 2 : index
    %c0_116 = arith.constant 0 : index
    %c0_117 = arith.constant 0 : index
    %194 = vector.load %arg18[%c2_115, %c0_116, %c0_117] : memref<18x16x216xbf16, #tpu.memory_space<vmem>>, vector<16x16x216xbf16>
    %195 = vector.shape_cast %194 : vector<16x16x216xbf16> to vector<256x216xbf16>
    %c2_118 = arith.constant 2 : index
    %c0_119 = arith.constant 0 : index
    %c0_120 = arith.constant 0 : index
    %196 = vector.load %arg12[%c2_118, %c0_119, %c0_120] : memref<3x216x64xbf16, #tpu.memory_space<vmem>>, vector<1x216x64xbf16>
    %197 = vector.shape_cast %196 : vector<1x216x64xbf16> to vector<216x64xbf16>
    %cst_121 = arith.constant dense<0.000000e+00> : vector<256x64xf32>
    %198 = tpu.matmul %195, %197, %cst_121 {dimension_numbers = #tpu.dot_dimension_numbers<[1], [0], [0], [1], [0, 0, 1, 1], [], []>} : vector<256x216xbf16>, vector<216x64xbf16>, vector<256x64xf32> -> vector<256x64xf32>
    %199 = arith.addf %193, %198 : vector<256x64xf32>
    %c0_122 = arith.constant 0 : index
    %c0_123 = arith.constant 0 : index
    %200 = vector.load %arg13[%c0_122, %c0_123] : memref<1x64xf32, #tpu.memory_space<vmem>>, vector<1x64xf32>
    %201 = vector.broadcast %200 : vector<1x64xf32> to vector<256x64xf32>
    %202 = arith.addf %199, %201 : vector<256x64xf32>
    %cst_124 = arith.constant 0.000000e+00 : f32
    %203 = vector.broadcast %cst_124 : f32 to vector<256x64xf32>
    %204 = arith.maximumf %202, %203 : vector<256x64xf32>
    %c0_125 = arith.constant 0 : index
    %c0_126 = arith.constant 0 : index
    %205 = vector.load %arg14[%c0_125, %c0_126] : memref<3x64xbf16, #tpu.memory_space<vmem>>, vector<3x64xbf16>
    %206 = arith.truncf %204 : vector<256x64xf32> to vector<256x64xbf16>
    %cst_127 = arith.constant dense<0.000000e+00> : vector<3x256xf32>
    %207 = tpu.matmul %205, %206, %cst_127 {dimension_numbers = #tpu.dot_dimension_numbers<[1], [1], [0], [0], [0, 0, 1, 0], [], []>} : vector<3x64xbf16>, vector<256x64xbf16>, vector<3x256xf32> -> vector<3x256xf32>
    %c0_128 = arith.constant 0 : index
    %c0_129 = arith.constant 0 : index
    %208 = vector.load %arg15[%c0_128, %c0_129] : memref<3x1xf32, #tpu.memory_space<vmem>>, vector<3x1xf32>
    %209 = vector.broadcast %208 : vector<3x1xf32> to vector<3x256xf32>
    %210 = arith.addf %207, %209 : vector<3x256xf32>
    %c0_130 = arith.constant 0 : index
    %c0_131 = arith.constant 0 : index
    %c0_132 = arith.constant 0 : index
    %211 = vector.load %arg16[%c0_130, %c0_131, %c0_132] : memref<1x3x256xf32, #tpu.memory_space<vmem>>, vector<1x3x256xf32>
    %212 = vector.shape_cast %211 : vector<1x3x256xf32> to vector<3x256xf32>
    %213 = vector.shape_cast %210 : vector<3x256xf32> to vector<1x3x256xf32>
    tpu.vector_store %arg16[%c0_130, %c0_131, %c0_132], %213 {strides = array<i32>} : memref<1x3x256xf32, #tpu.memory_space<vmem>>, vector<1x3x256xf32>,
    return
  }
  func.func @transform_0(%arg0: i32) -> (i32, i32, i32) {
    %c0_i32 = arith.constant 0 : i32
    %c0_i32_0 = arith.constant 0 : i32
    %c0_i32_1 = arith.constant 0 : i32
    return %arg0, %c0_i32, %c0_i32_0 : i32, i32, i32
  }
  func.func @transform_1(%arg0: i32) -> (i32, i32, i32) {
    %c0_i32 = arith.constant 0 : i32
    %c0_i32_0 = arith.constant 0 : i32
    %c0_i32_1 = arith.constant 0 : i32
    return %arg0, %c0_i32, %c0_i32_0 : i32, i32, i32
  }
  func.func @transform_2(%arg0: i32) -> (i32, i32, i32) {
    %c0_i32 = arith.constant 0 : i32
    %c0_i32_0 = arith.constant 0 : i32
    %c0_i32_1 = arith.constant 0 : i32
    return %arg0, %c0_i32, %c0_i32_0 : i32, i32, i32
  }
  func.func @transform_3(%arg0: i32) -> (i32, i32) {
    %c0_i32 = arith.constant 0 : i32
    %c0_i32_0 = arith.constant 0 : i32
    %c0_i32_1 = arith.constant 0 : i32
    return %c0_i32, %c0_i32_0 : i32, i32
  }
  func.func @transform_4(%arg0: i32) -> (i32, i32) {
    %c0_i32 = arith.constant 0 : i32
    %c0_i32_0 = arith.constant 0 : i32
    %c0_i32_1 = arith.constant 0 : i32
    return %c0_i32, %c0_i32_0 : i32, i32
  }
  func.func @transform_5(%arg0: i32) -> (i32, i32) {
    %c0_i32 = arith.constant 0 : i32
    %c0_i32_0 = arith.constant 0 : i32
    %c0_i32_1 = arith.constant 0 : i32
    return %c0_i32, %c0_i32_0 : i32, i32
  }
  func.func @transform_6(%arg0: i32) -> (i32, i32) {
    %c0_i32 = arith.constant 0 : i32
    %c0_i32_0 = arith.constant 0 : i32
    %c0_i32_1 = arith.constant 0 : i32
    return %c0_i32, %c0_i32_0 : i32, i32
  }
  func.func @transform_7(%arg0: i32) -> (i32, i32) {
    %c0_i32 = arith.constant 0 : i32
    %c0_i32_0 = arith.constant 0 : i32
    %c0_i32_1 = arith.constant 0 : i32
    return %c0_i32, %c0_i32_0 : i32, i32
  }
  func.func @transform_8(%arg0: i32) -> (i32, i32) {
    %c0_i32 = arith.constant 0 : i32
    %c0_i32_0 = arith.constant 0 : i32
    %c0_i32_1 = arith.constant 0 : i32
    return %c0_i32, %c0_i32_0 : i32, i32
  }
  func.func @transform_9(%arg0: i32) -> (i32, i32, i32) {
    %c0_i32 = arith.constant 0 : i32
    %c0_i32_0 = arith.constant 0 : i32
    %c0_i32_1 = arith.constant 0 : i32
    %c0_i32_2 = arith.constant 0 : i32
    return %c0_i32, %c0_i32_0, %c0_i32_1 : i32, i32, i32
  }
  func.func @transform_10(%arg0: i32) -> (i32, i32) {
    %c0_i32 = arith.constant 0 : i32
    %c0_i32_0 = arith.constant 0 : i32
    %c0_i32_1 = arith.constant 0 : i32
    return %c0_i32, %c0_i32_0 : i32, i32
  }
  func.func @transform_11(%arg0: i32) -> (i32, i32, i32) {
    %c0_i32 = arith.constant 0 : i32
    %c0_i32_0 = arith.constant 0 : i32
    %c0_i32_1 = arith.constant 0 : i32
    %c0_i32_2 = arith.constant 0 : i32
    return %c0_i32, %c0_i32_0, %c0_i32_1 : i32, i32, i32
  }
  func.func @transform_12(%arg0: i32) -> (i32, i32) {
    %c0_i32 = arith.constant 0 : i32
    %c0_i32_0 = arith.constant 0 : i32
    %c0_i32_1 = arith.constant 0 : i32
    return %c0_i32, %c0_i32_0 : i32, i32
  }
  func.func @transform_13(%arg0: i32) -> (i32, i32) {
    %c0_i32 = arith.constant 0 : i32
    %c0_i32_0 = arith.constant 0 : i32
    %c0_i32_1 = arith.constant 0 : i32
    return %c0_i32, %c0_i32_0 : i32, i32
  }
  func.func @transform_14(%arg0: i32) -> (i32, i32) {
    %c0_i32 = arith.constant 0 : i32
    %c0_i32_0 = arith.constant 0 : i32
    %c0_i32_1 = arith.constant 0 : i32
    return %c0_i32, %c0_i32_0 : i32, i32
  }
  func.func @transform_15(%arg0: i32) -> (i32, i32, i32) {
    %c0_i32 = arith.constant 0 : i32
    %c0_i32_0 = arith.constant 0 : i32
    %c0_i32_1 = arith.constant 0 : i32
    return %arg0, %c0_i32, %c0_i32_0 : i32, i32, i32
  }
}

</mosaic_0001>

<bundles_post_ra>
// kernel: regseg_head_forward.1
= control target key start
LH: loop header
LB: loop body
LE: loop exit
PB: predicated region body
PF: predicated region fallthrough
CT: control target
= control target key end

     0   :  { %s9325_s18 = smov 0   ;;  %s12774_s0 = inlined_call_operand.vmem [shape: f32[2,48,256], index: 0, kind: input, shape index: {}]   ;;  %s12775_s1 = inlined_call_operand.vmem [shape: f32[2,128,64], index: 1, kind: input, shape index: {}]   ;;  %s12776_s2 = inlined_call_operand.vmem [shape: f32[2,320,16], index: 2, kind: input, shape index: {}]   ;;  %s12777_s3 = inlined_call_operand.vmem [shape: bf16[8,48], index: 3, kind: input, shape index: {}]   ;;  %s12778_s4 = inlined_call_operand.vmem [shape: f32[8,1], index: 4, kind: input, shape index: {}]   ;;  %s12779_s5 = inlined_call_operand.vmem [shape: bf16[128,128], index: 5, kind: input, shape index: {}]   ;;  %s12780_s6 = inlined_call_operand.vmem [shape: f32[128,1], index: 6, kind: input, shape index: {}, may-alias: {6,8}]   ;;  %s12781_s7 = inlined_call_operand.vmem [shape: bf16[128,320], index: 7, kind: input, shape index: {}]   ;;  %s12782_s8 = inlined_call_operand.vmem [shape: f32[128,1], index: 8, kind: input, shape index: {}, may-alias: {6,8}]   ;;  %s12783_s9 = inlined_call_operand.vmem [shape: bf16[3,384,64], index: 9, kind: input, shape index: {}]   ;;  %s12784_s10 = inlined_call_operand.vmem [shape: f32[1,64], index: 10, kind: input, shape index: {}, may-alias: {10,12}]   ;;  %s12785_s11 = inlined_call_operand.vmem [shape: bf16[3,216,64], index: 11, kind: input, shape index: {}]   ;;  %s12786_s12 = inlined_call_operand.vmem [shape: f32[1,64], index: 12, kind: input, shape index: {}, may-alias: {10,12}]   ;;  %s12787_s13 = inlined_call_operand.vmem [shape: bf16[3,64], index: 13, kind: input, shape index: {}]   ;;  %s12788_s14 = inlined_call_operand.vmem [shape: f32[3,1], index: 14, kind: input, shape index: {}]   ;;  %s12789_s15 = inlined_call_operand.vmem [shape: f32[2,3,256], index: 15, kind: output, shape index: {}]  }
   0x1 LB: > { %s8080_s19 = sadd.s32 4294967295, %s9237_s18   ;;  %p8084_p0 = scmp.ge.s32.totalorder %s9237_s18, 1  ;;  %s9237_s18 = sphi %s9325_s18, %s25_s18  }
   0x2   : > { %p457_p1 = scmp.lt.s32.totalorder %s9237_s18, 3 }
   0x4   : > { %p458_p2 = pnand %p8084_p0, %p457_p1 }
   0x6   : > { %461 = sbr.rel (%p458_p2) target bundleno = 1744 (0x6d0), region = 80 }
   0xd   : > { %p515_p3 = scmp.lt.s32.totalorder %s8080_s19, 1  ;;  %v9048_v0 = vld [vmem:[%s12781_s7 + $0x64] ss:$12 sps:$4 sm:$0xff]   ;;  %v9239_v2 = vmov 0   ;;  %v9046_v53 = vld [vmem:[%s12781_s7 + $0x60] ss:$12 sps:$4 sm:$0xff]  }
   0xe   : > { %v9051_v1 = vld [vmem:[%s12781_s7 + $0x4] ss:$12 sps:$4 sm:$0xff]   ;;  %8962 = vset.pattern.permute.xlu0 %v9239_v2  ;;  %2188 = vst [vmem:[#allocation2] sm:$0xff] %v9239_v2  ;;  %2189 = vst [vmem:[#allocation2 + $0x8] sm:$0xf] %v9239_v2  ;;  %8963 = vset.pattern.permute.xlu1 %v9239_v2  ;;  %v629_v61 = vld [vmem:[%s12782_s8 + $0x8] sm:$0xff] }
   0xf   : > { %s13103_s19 = smov (!%p515_p3, %s8080_s19), 1  ;;  %2192 = vst [vmem:[#allocation2 + $0x74] sm:$0xf] %v9239_v2  ;;  %933 = vmatprep.mubr.bf16.mxu1 %v9048_v0  ;;  %901 = vmatprep.mubr.bf16.mxu0 %v9051_v1  ;;  %v9049_v54 = vld [vmem:[%s12781_s7] ss:$12 sps:$4 sm:$0xff]   ;;  %v630_v60 = vld [vmem:[%s12782_s8 + $0x10] sm:$0xff] }
  0x10   : > { %s8946_s24 = smul.u32 320, %s13103_s19  ;;  %v628_v56 = vld [vmem:[%s12782_s8] sm:$0xff]  ;;  %v9052_v57 = vld [vmem:[%s12781_s7 + $0x7c] ss:$12 sps:$4 sm:$0xff]   ;;  %656 = vperm.xlu1 %8963, %v630_v60   ;;  %s8485_s25 = sshll.u32 %s13103_s19, 7  ;;  %vm844_vm0 = vcmask 523264  }
  0x11   : > { %646 = vperm.xlu0 %8962, %v628_v56   ;;  %v9055_v62 = vld [vmem:[%s12781_s7 + $0x1c] ss:$12 sps:$4 sm:$0xff]   ;;  %s9436_s23 = scalar_lea.vmem %s12775_s1, %s8485_s25  ;;  %v1159_v56 = vld [vmem:[%s12780_s6 + $0x40] sm:$0xff]  ;;  %s8945_s20 = smul.u32 96, %s13103_s19  ;;  %vm1465_vm1 = vcmask 392192   ;;  %vm1590_vm2 = vcmask 1040384  }
  0x12   : > { %s9345_s27 = scalar_lea.vmem %s12776_s2, %s8946_s24  ;;  %v631_v2 = vld [vmem:[%s12782_s8 + $0x18] sm:$0xff]  ;;  %v9075_v60 = vld [vmem:[%s12781_s7 + $0x80] ss:$12 sps:$4 sm:$0xff]   ;;  %vm1603_vm3 = vcmask 1042432   ;;  %vm2241_vm4 = vcmask 1046528   ;;  %s9242_s30 = smov 72  }
  0x13   : > { %v584_v3 = vld [vmem:[%s9345_s27 + $0x80] sm:$0xff]  ;;  %v585_v4 = vld [vmem:[%s9345_s27 + $0x88] sm:$0xff]  ;;  %v586_v8 = vld [vmem:[%s9345_s27 + $0x90] sm:$0xff]  ;;  %s519_s22 = scalar_lea.vmem %s12774_s0, %s8945_s20  ;;  %s9244_s16 = smov 80   ;;  %vm6507_vm5 = vcmask 589312   ;;  %vm6604_vm6 = vcmask 654912  }
  0x14   : > { %v568_v5 = vld [vmem:[%s9345_s27] sm:$0xff]  ;;  %v616_v6 = vpack.c.bf16 %v585_v4, %v584_v3  ;;  %v569_v7 = vld [vmem:[%s9345_s27 + $0x8] sm:$0xff]  ;;  %v587_v9 = vld [vmem:[%s9345_s27 + $0x98] sm:$0xff]  ;;  %661 = vperm.xlu1 %8963, %v631_v2   ;;  %vm6701_vm7 = vcmask 720512   ;;  %vm6966_vm8 = vcmask 1043456   ;;  %vm3540_vm9 = vcmask 719872  }
  0x15   : > { %v608_v10 = vpack.c.bf16 %v569_v7, %v568_v5  ;;  %v617_v11 = vpack.c.bf16 %v587_v9, %v586_v8  ;;  %v570_v12 = vld [vmem:[%s9345_s27 + $0x10] sm:$0xff]  ;;  %v571_v13 = vld [vmem:[%s9345_s27 + $0x18] sm:$0xff]  ;;  %v588_v14 = vld [vmem:[%s9345_s27 + $0xa0] sm:$0xff]  ;;  %651 = vperm.xlu0 %8962, %v629_v61   ;;  %vm6154_vm10 = vcmask 1048064   ;;  %s8486_s21 = sshll.u32 %s13103_s19, 3 }
  0x16   : > { %8881 = vmatprep.subr.bf16.mxu1 %v616_v6  ;;  %8487 = vmatprep.subr.bf16.mxu0 %v616_v6  ;;  %v589_v15 = vld [vmem:[%s9345_s27 + $0xa8] sm:$0xff]  ;;  %v609_v16 = vpack.c.bf16 %v571_v13, %v570_v12  ;;  %v572_v18 = vld [vmem:[%s9345_s27 + $0x20] sm:$0xff]  ;;  %v590_v20 = vld [vmem:[%s9345_s27 + $0xb0] sm:$0xff]  ;;  %s534_s24 = scalar_lea.vmem %s12789_s15, %s8486_s21 }
  0x17   : > { %8889 = vmatpush3.bf16.msra.mxu1 %v608_v10  ;;  %8488 = vmatpush3.bf16.msra.mxu0 %v608_v10  ;;  %v618_v17 = vpack.c.bf16 %v589_v15, %v588_v14  ;;  %v573_v19 = vld [vmem:[%s9345_s27 + $0x28] sm:$0xff]  ;;  %v591_v21 = vld [vmem:[%s9345_s27 + $0xb8] sm:$0xff]  ;;  %v574_v24 = vld [vmem:[%s9345_s27 + $0x30] sm:$0xff] }
  0x18   : > { %8882 = vmatprep.subr.bf16.mxu1 %v617_v11  ;;  %8489 = vmatprep.subr.bf16.mxu0 %v617_v11  ;;  %v610_v22 = vpack.c.bf16 %v573_v19, %v572_v18  ;;  %v619_v23 = vpack.c.bf16 %v591_v21, %v590_v20  ;;  %v575_v25 = vld [vmem:[%s9345_s27 + $0x38] sm:$0xff]  ;;  %v592_v26 = vld [vmem:[%s9345_s27 + $0xc0] sm:$0xff]  ;;  %v593_v27 = vld [vmem:[%s9345_s27 + $0xc8] sm:$0xff] }
  0x19   : > { %v611_v28 = vpack.c.bf16 %v575_v25, %v574_v24  ;;  %v576_v29 = vld [vmem:[%s9345_s27 + $0x40] sm:$0xff]  ;;  %v620_v30 = vpack.c.bf16 %v593_v27, %v592_v26  ;;  %v577_v31 = vld [vmem:[%s9345_s27 + $0x48] sm:$0xff]  ;;  %v594_v32 = vld [vmem:[%s9345_s27 + $0xd0] sm:$0xff] }
  0x1a   : > { %v595_v33 = vld [vmem:[%s9345_s27 + $0xd8] sm:$0xff]  ;;  %v612_v34 = vpack.c.bf16 %v577_v31, %v576_v29  ;;  %v578_v35 = vld [vmem:[%s9345_s27 + $0x50] sm:$0xff]  ;;  %v596_v38 = vld [vmem:[%s9345_s27 + $0xe0] sm:$0xff] }
  0x1b   : > { %8890 = vmatpush3.bf16.msra.mxu1 %v609_v16  ;;  %8490 = vmatpush3.bf16.msra.mxu0 %v609_v16  ;;  %v579_v36 = vld [vmem:[%s9345_s27 + $0x58] sm:$0xff]  ;;  %v621_v37 = vpack.c.bf16 %v595_v33, %v594_v32  ;;  %v597_v39 = vld [vmem:[%s9345_s27 + $0xe8] sm:$0xff]  ;;  %v580_v41 = vld [vmem:[%s9345_s27 + $0x60] sm:$0xff] }
  0x1c   : > { %8883 = vmatprep.subr.bf16.mxu1 %v618_v17  ;;  %8491 = vmatprep.subr.bf16.mxu0 %v618_v17  ;;  %v613_v40 = vpack.c.bf16 %v579_v36, %v578_v35  ;;  %v622_v42 = vpack.c.bf16 %v597_v39, %v596_v38  ;;  %v581_v43 = vld [vmem:[%s9345_s27 + $0x68] sm:$0xff]  ;;  %v598_v44 = vld [vmem:[%s9345_s27 + $0xf0] sm:$0xff]  ;;  %v599_v45 = vld [vmem:[%s9345_s27 + $0xf8] sm:$0xff] }
  0x1d   : > { %v614_v46 = vpack.c.bf16 %v581_v43, %v580_v41  ;;  %v623_v47 = vpack.c.bf16 %v599_v45, %v598_v44  ;;  %v582_v48 = vld [vmem:[%s9345_s27 + $0x70] sm:$0xff]  ;;  %v583_v49 = vld [vmem:[%s9345_s27 + $0x78] sm:$0xff]  ;;  %v600_v50 = vld [vmem:[%s9345_s27 + $0x100] sm:$0xff] }
  0x1e   : > { %v601_v51 = vld [vmem:[%s9345_s27 + $0x108] sm:$0xff]  ;;  %v615_v52 = vpack.c.bf16 %v583_v49, %v582_v48  ;;  %v602_v58 = vld [vmem:[%s9345_s27 + $0x110] sm:$0xff]  ;;  %v603_v59 = vld [vmem:[%s9345_s27 + $0x118] sm:$0xff] }
  0x1f   : > { %8891 = vmatpush3.bf16.msra.mxu1 %v610_v22  ;;  %8492 = vmatpush3.bf16.msra.mxu0 %v610_v22  ;;  %v624_v55 = vpack.c.bf16 %v601_v51, %v600_v50  ;;  %v604_v63 = vld [vmem:[%s9345_s27 + $0x120] sm:$0xff]  ;;  %v625_v0 = vpack.c.bf16 %v603_v59, %v602_v58  ;;  %v605_v1 = vld [vmem:[%s9345_s27 + $0x128] sm:$0xff]  ;;  %v606_v6 = vld [vmem:[%s9345_s27 + $0x130] sm:$0xff] }
  0x20   : > { %8884 = vmatprep.subr.bf16.mxu1 %v619_v23  ;;  %8493 = vmatprep.subr.bf16.mxu0 %v619_v23  ;;  %v632_v3 = vld [vmem:[%s12782_s8 + $0x20] sm:$0xff]  ;;  %v607_v7 = vld [vmem:[%s9345_s27 + $0x138] sm:$0xff]  ;;  %v626_v8 = vpack.c.bf16 %v605_v1, %v604_v63  ;;  %v633_v9 = vld [vmem:[%s12782_s8 + $0x28] sm:$0xff] }
  0x21   : > { %v9054_v4 = vld [vmem:[%s12781_s7 + $0x78] ss:$12 sps:$4 sm:$0xff]   ;;  %666 = vperm.xlu0 %8962, %v632_v3   ;;  %v634_v10 = vld [vmem:[%s12782_s8 + $0x30] sm:$0xff]  ;;  %671 = vperm.xlu1 %8963, %v633_v9   ;;  %v627_v13 = vpack.c.bf16 %v607_v7, %v606_v6  ;;  %v1128_v16 = vld [vmem:[%s9436_s23 + $0x8] sm:$0xff] }
  0x22   : > { %v9057_v5 = vld [vmem:[%s12781_s7 + $0x18] ss:$12 sps:$4 sm:$0xff]   ;;  %v9058_v11 = vld [vmem:[%s12781_s7 + $0x94] ss:$12 sps:$4 sm:$0xff]   ;;  %v637_v19 = vld [vmem:[%s12782_s8 + $0x48] sm:$0xff] }
  0x23   : > { %8892 = vmatpush3.bf16.msra.mxu1 %v611_v28  ;;  %8494 = vmatpush3.bf16.msra.mxu0 %v611_v28  ;;  %v9061_v12 = vld [vmem:[%s12781_s7 + $0x34] ss:$12 sps:$4 sm:$0xff]   ;;  %v635_v14 = vld [vmem:[%s12782_s8 + $0x38] sm:$0xff]  ;;  %v641_v27 = vld [vmem:[%s12782_s8 + $0x68] sm:$0xff] }
  0x24   : > { %8885 = vmatprep.subr.bf16.mxu1 %v620_v30  ;;  %8495 = vmatprep.subr.bf16.mxu0 %v620_v30  ;;  %v1127_v15 = vld [vmem:[%s9436_s23] sm:$0xff]  ;;  %v9060_v20 = vld [vmem:[%s12781_s7 + $0x90] ss:$12 sps:$4 sm:$0xff]   ;;  %v9064_v23 = vld [vmem:[%s12781_s7 + $0xac] ss:$12 sps:$4 sm:$0xff]  }
  0x25   : > { %676 = vperm.xlu0 %8962, %v634_v10   ;;  %v636_v17 = vld [vmem:[%s12782_s8 + $0x40] sm:$0xff]  ;;  %681 = vperm.xlu1 %8963, %v635_v14   ;;  %v1143_v18 = vpack.c.bf16 %v1128_v16, %v1127_v15  ;;  %v9063_v21 = vld [vmem:[%s12781_s7 + $0x30] ss:$12 sps:$4 sm:$0xff]   ;;  %v9067_v24 = vld [vmem:[%s12781_s7 + $0x4c] ss:$12 sps:$4 sm:$0xff]  }
  0x26   : > { %v638_v22 = vld [vmem:[%s12782_s8 + $0x50] sm:$0xff]  ;;  %v639_v25 = vld [vmem:[%s12782_s8 + $0x58] sm:$0xff]  ;;  %v640_v26 = vld [vmem:[%s12782_s8 + $0x60] sm:$0xff] }
  0x27   : > { %8893 = vmatpush3.bf16.msra.mxu1 %v612_v34  ;;  %8496 = vmatpush3.bf16.msra.mxu0 %v612_v34  ;;  %v9066_v28 = vld [vmem:[%s12781_s7 + $0xa8] ss:$12 sps:$4 sm:$0xff]   ;;  %v643_v32 = vld [vmem:[%s12782_s8 + $0x78] sm:$0xff]  ;;  %v1151_v33 = vld [vmem:[%s12780_s6] sm:$0xff] }
  0x28   : > { %8886 = vmatprep.subr.bf16.mxu1 %v621_v37  ;;  %8497 = vmatprep.subr.bf16.mxu0 %v621_v37  ;;  %v9069_v29 = vld [vmem:[%s12781_s7 + $0x48] ss:$12 sps:$4 sm:$0xff]   ;;  %v1130_v35 = vld [vmem:[%s9436_s23 + $0x18] sm:$0xff]  ;;  %v9071_v37 = vld [vmem:[%s12781_s7 + $0x20] ss:$12 sps:$4 sm:$0xff]  }
  0x29   : > { %686 = vperm.xlu0 %8962, %v636_v17   ;;  %691 = vperm.xlu1 %8963, %v637_v19   ;;  %v642_v30 = vld [vmem:[%s12782_s8 + $0x70] sm:$0xff]  ;;  %v1152_v36 = vld [vmem:[%s12780_s6 + $0x8] sm:$0xff]  ;;  %v9072_v39 = vld [vmem:[%s12781_s7 + $0x38] ss:$12 sps:$4 sm:$0xff]  }
  0x2a   : > { %v9070_v31 = vld [vmem:[%s12781_s7 + $0x8] ss:$12 sps:$4 sm:$0xff]   ;;  %v1155_v44 = vld [vmem:[%s12780_s6 + $0x20] sm:$0xff]  ;;  %v9073_v48 = vld [vmem:[%s12781_s7 + $0x50] ss:$12 sps:$4 sm:$0xff]  }
  0x2b   : > { %8894 = vmatpush3.bf16.msra.mxu1 %v613_v40  ;;  %8498 = vmatpush3.bf16.msra.mxu0 %v613_v40  ;;  %v1129_v34 = vld [vmem:[%s9436_s23 + $0x10] sm:$0xff]  ;;  %v1131_v40 = vld [vmem:[%s9436_s23 + $0x20] sm:$0xff]  ;;  %v1132_v41 = vld [vmem:[%s9436_s23 + $0x28] sm:$0xff] }
  0x2c   : > { %8887 = vmatprep.subr.bf16.mxu1 %v622_v42  ;;  %8499 = vmatprep.subr.bf16.mxu0 %v622_v42  ;;  %v1153_v38 = vld [vmem:[%s12780_s6 + $0x10] sm:$0xff]  ;;  %v1154_v42 = vld [vmem:[%s12780_s6 + $0x18] sm:$0xff]  ;;  %v1144_v43 = vpack.c.bf16 %v1130_v35, %v1129_v34  ;;  %v1145_v49 = vpack.c.bf16 %v1132_v41, %v1131_v40  ;;  %v1160_v59 = vld [vmem:[%s12780_s6 + $0x48] sm:$0xff] }
  0x2d   : > { %696 = vperm.xlu0 %8962, %v638_v22   ;;  %701 = vperm.xlu1 %8963, %v639_v25   ;;  %v1133_v45 = vld [vmem:[%s9436_s23 + $0x30] sm:$0xff]  ;;  %v1138_v58 = vld [vmem:[%s9436_s23 + $0x58] sm:$0xff]  ;;  %v1140_v1 = vld [vmem:[%s9436_s23 + $0x68] sm:$0xff] }
  0x2e   : > { %v1157_v50 = vld [vmem:[%s12780_s6 + $0x30] sm:$0xff]  ;;  %v9076_v63 = vld [vmem:[%s12781_s7 + $0x98] ss:$12 sps:$4 sm:$0xff]   ;;  %v1164_v7 = vld [vmem:[%s12780_s6 + $0x68] sm:$0xff] }
  0x2f   : > { %8895 = vmatpush3.bf16.msra.mxu1 %v614_v46  ;;  %8500 = vmatpush3.bf16.msra.mxu0 %v614_v46  ;;  %v1134_v46 = vld [vmem:[%s9436_s23 + $0x38] sm:$0xff]  ;;  %v9074_v51 = vld [vmem:[%s12781_s7 + $0x68] ss:$12 sps:$4 sm:$0xff]   ;;  %v9082_v17 = vld [vmem:[%s12779_s5 + $0x20] sm:$0xff]  }
  0x30   : > { %8888 = vmatprep.subr.bf16.mxu1 %v623_v47  ;;  %8501 = vmatprep.subr.bf16.mxu0 %v623_v47  ;;  %v1156_v47 = vld [vmem:[%s12780_s6 + $0x28] sm:$0xff]  ;;  %v1162_v2 = vld [vmem:[%s12780_s6 + $0x58] sm:$0xff]  ;;  %v1165_v10 = vld [vmem:[%s12780_s6 + $0x70] sm:$0xff] }
  0x31   : > { %706 = vperm.xlu0 %8962, %v640_v26   ;;  %711 = vperm.xlu1 %8963, %v641_v27   ;;  %v1142_v6 = vld [vmem:[%s9436_s23 + $0x78] sm:$0xff]  ;;  %v9079_v14 = vld [vmem:[%s12779_s5 + $0x8] sm:$0xff]   ;;  %v9080_v15 = vld [vmem:[%s12779_s5 + $0x10] sm:$0xff]  }
  0x32   : > { %v9081_v16 = vld [vmem:[%s12779_s5 + $0x18] sm:$0xff]   ;;  %v9084_v19 = vld [vmem:[%s12779_s5 + $0x30] sm:$0xff]   ;;  %v1442_v22 = vld [vmem:[%s519_s22 + $0x8] sm:$0xff] }
  0x33   : > { %8896 = vmatpush3.bf16.msra.mxu1 %v615_v52  ;;  %8502 = vmatpush3.bf16.msra.mxu0 %v615_v52  ;;  %v1135_v52 = vld [vmem:[%s9436_s23 + $0x40] sm:$0xff]  ;;  %v1443_v26 = vld [vmem:[%s519_s22 + $0x10] sm:$0xff]  ;;  %v1450_v34 = vld [vmem:[%s519_s22 + $0x48] sm:$0xff] }
  0x34   : > { %8753 = vmatprep.subr.bf16.mxu1 %v624_v55  ;;  %v1441_v25 = vld [vmem:[%s519_s22] sm:$0xff]  ;;  %v1452_v35 = vld [vmem:[%s519_s22 + $0x58] sm:$0xff] }
  0x35   : > { %716 = vperm.xlu0 %8962, %v642_v30   ;;  %721 = vperm.xlu1 %8963, %v643_v32   ;;  %v1453_v27 = vpack.c.bf16 %v1443_v26, %v1441_v25  ;;  %v1447_v32 = vld [vmem:[%s519_s22 + $0x30] sm:$0xff]  ;;  %v1440_v40 = vld [vmem:[%s12777_s3] sm:$0xf] }
  0x36   : > { %934 = vmatmul.mubr.bf16.vlgmr.msra.gmra.mrb[0].mxu1 %v9046_v53  ;;  %902 = vmatmul.mubr.bf16.vlgmr.msra.gmra.mrb[0].mxu0 %v9049_v54  ;;  %v1136_v53 = vld [vmem:[%s9436_s23 + $0x48] sm:$0xff]  ;;  %v1158_v54 = vld [vmem:[%s12780_s6 + $0x38] sm:$0xff] }
  0x37   : > { %941 = vmatprep.mubr.bf16.mxu1 %v9052_v57  ;;  %909 = vmatprep.mubr.bf16.mxu0 %v9055_v62  ;;  %v1137_v57 = vld [vmem:[%s9436_s23 + $0x50] sm:$0xff]  ;;  %v1147_v61 = vpack.c.bf16 %v1136_v53, %v1135_v52 }
  0x38   : > { %8754 = vmatpush3.bf16.msra.mxu1 %v624_v55  ;;  %v1146_v55 = vpack.c.bf16 %v1134_v46, %v1133_v45  ;;  %v1161_v62 = vld [vmem:[%s12780_s6 + $0x50] sm:$0xff]  ;;  %v1148_v3 = vpack.c.bf16 %v1138_v58, %v1137_v57 }
  0x39   : > { %8755 = vmatprep.subr.bf16.mxu1 %v625_v0  ;;  %1169 = vperm.xlu0 %8962, %v1151_v33  }
  0x3a   : > { %1174 = vperm.xlu1 %8963, %v1152_v36   ;;  %v1458_v36 = vpack.c.bf16 %v1452_v35, %v1450_v34 }
  0x3c   : > { %8756 = vmatpush3.bf16.msra.mxu1 %v625_v0  ;;  %v1139_v0 = vld [vmem:[%s9436_s23 + $0x60] sm:$0xff] }
  0x3d   : > { %8757 = vmatprep.subr.bf16.mxu1 %v626_v8  ;;  %1179 = vperm.xlu0 %8962, %v1153_v38   ;;  %v1149_v9 = vpack.c.bf16 %v1140_v1, %v1139_v0  ;;  %v1451_v38 = vld [vmem:[%s519_s22 + $0x50] sm:$0xff] }
  0x3e   : > { %942 = vmatmul.mubr.bf16.gmra.mrb[4].mxu1 %v9054_v4  ;;  %910 = vmatmul.mubr.bf16.gmra.mrb[4].mxu0 %v9057_v5  ;;  %v1163_v4 = vld [vmem:[%s12780_s6 + $0x60] sm:$0xff]  ;;  %v1141_v5 = vld [vmem:[%s9436_s23 + $0x70] sm:$0xff]  ;;  %s9243_s23 = smov 64  }
  0x3f   : > { %949 = vmatprep.mubr.bf16.mxu1 %v9058_v11  ;;  %917 = vmatprep.mubr.bf16.mxu0 %v9061_v12  ;;  %v9078_v11 = vld [vmem:[%s12779_s5] sm:$0xff]   ;;  %v1166_v12 = vld [vmem:[%s12780_s6 + $0x78] sm:$0xff] }
  0x40   : > { %8758 = vmatpush3.bf16.msra.mxu1 %v626_v8  ;;  %1184 = vperm.xlu1 %8963, %v1154_v42   ;;  %v9077_v8 = vld [vmem:[%s12781_s7 + $0xb0] ss:$12 sps:$4 sm:$0xff]  }
  0x41   : > { %8759 = vmatprep.subr.bf16.mxu1 %v627_v13  ;;  %1189 = vperm.xlu0 %8962, %v1155_v44  }
  0x44   : > { %8760 = vmatpush3.bf16.msra.mxu1 %v627_v13  ;;  %1194 = vperm.xlu1 %8963, %v1156_v47   ;;  %v1150_v13 = vpack.c.bf16 %v1142_v6, %v1141_v5 }
  0x45   : > { %8777 = vmatprep.subr.bf16.mxu1 %v1143_v18  ;;  %1199 = vperm.xlu0 %8962, %v1157_v50  }
  0x46   : > { %950 = vmatmul.mubr.bf16.gmra.mrb[8].mxu1 %v9060_v20  ;;  %918 = vmatmul.mubr.bf16.gmra.mrb[8].mxu0 %v9063_v21  ;;  %v9085_v20 = vld [vmem:[%s12779_s5 + $0x38] sm:$0xff]   ;;  %v9226_v21 = vld [vmem:[#allocation2] sm:$0xff] }
  0x47   : > { %957 = vmatprep.mubr.bf16.mxu1 %v9064_v23  ;;  %925 = vmatprep.mubr.bf16.mxu0 %v9067_v24  ;;  %v1444_v23 = vld [vmem:[%s519_s22 + $0x18] sm:$0xff] }
  0x48   : > { %1204 = vperm.xlu1 %8963, %v1158_v54   ;;  %v1454_v24 = vpack.c.bf16 %v1444_v23, %v1442_v22 }
  0x49   : > { %1209 = vperm.xlu0 %8962, %v1159_v56  }
  0x4c   : > { %1214 = vperm.xlu1 %8963, %v1160_v59  }
  0x4d   : > { %1219 = vperm.xlu0 %8962, %v1161_v62  }
  0x4e   : > { %958 = vmatmul.mubr.bf16.gmra.mrb[12].mxu1 %v9066_v28  ;;  %926 = vmatmul.mubr.bf16.gmra.mrb[12].mxu0 %v9069_v29  ;;  %v1446_v28 = vld [vmem:[%s519_s22 + $0x28] sm:$0xff]  ;;  %v1448_v29 = vld [vmem:[%s519_s22 + $0x38] sm:$0xff] }
  0x4f   : > { %8761 = vmatprep.mubr.msk.bf16.mxu1 %vm844_vm0, %v9070_v31  ;;  %v1456_v30 = vpack.c.bf16 %v1448_v29, %v1446_v28  ;;  %v1445_v31 = vld [vmem:[%s519_s22 + $0x20] sm:$0xff] }
  0x50   : > { %1224 = vperm.xlu1 %8963, %v1162_v2   ;;  %v1455_v33 = vpack.c.bf16 %v1447_v32, %v1445_v31 }
  0x51   : > { %1229 = vperm.xlu0 %8962, %v1163_v4  }
  0x54   : > { %1234 = vperm.xlu1 %8963, %v1164_v7  }
  0x55   : > { %1239 = vperm.xlu0 %8962, %v1165_v10  }
  0x56   : > { %8762 = vmatmul.mubr.msk.bf16.vlgmr.msra.gmra.mrb[16].mxu1 %vm844_vm0, %v9071_v37  ;;  %v1449_v37 = vld [vmem:[%s519_s22 + $0x40] sm:$0xff] }
  0x57   : > { %8778 = vmatpush3.bf16.msra.mxu1 %v1143_v18  ;;  %8765 = vmatprep.mubr.msk.bf16.mxu1 %vm844_vm0, %v9072_v39  ;;  %v9083_v18 = vld [vmem:[%s12779_s5 + $0x28] sm:$0xff]   ;;  %v1457_v39 = vpack.c.bf16 %v1451_v38, %v1449_v37 }
  0x58   : > { %8779 = vmatprep.subr.bf16.mxu1 %v1144_v43  ;;  %1244 = vperm.xlu1 %8963, %v1166_v12  }
  0x5b   : > { %8780 = vmatpush3.bf16.msra.mxu1 %v1144_v43 }
  0x5c   : > { %8781 = vmatprep.subr.bf16.mxu1 %v1145_v49 }
  0x5e   : > { %8766 = vmatmul.mubr.msk.bf16.gmra.mrb[20].mxu1 %vm844_vm0, %v9073_v48 }
  0x5f   : > { %8782 = vmatpush3.bf16.msra.mxu1 %v1145_v49  ;;  %8769 = vmatprep.mubr.msk.bf16.mxu1 %vm844_vm0, %v9074_v51 }
  0x60   : > { %8783 = vmatprep.subr.bf16.mxu1 %v1146_v55 }
  0x63   : > { %8784 = vmatpush3.bf16.msra.mxu1 %v1146_v55 }
  0x64   : > { %8785 = vmatprep.subr.bf16.mxu1 %v1147_v61 }
  0x66   : > { %8770 = vmatmul.mubr.msk.bf16.gmra.mrb[24].mxu1 %vm844_vm0, %v9075_v60 }
  0x67   : > { %8786 = vmatpush3.bf16.msra.mxu1 %v1147_v61  ;;  %8773 = vmatprep.mubr.msk.bf16.mxu1 %vm844_vm0, %v9076_v63 }
  0x68   : > { %8787 = vmatprep.subr.bf16.mxu1 %v1148_v3 }
  0x6b   : > { %8788 = vmatpush3.bf16.msra.mxu1 %v1148_v3 }
  0x6c   : > { %8789 = vmatprep.subr.bf16.mxu1 %v1149_v9 }
  0x6e   : > { %8774 = vmatmul.mubr.msk.bf16.gmra.mrb[28].mxu1 %vm844_vm0, %v9077_v8 }
  0x6f   : > { %8790 = vmatpush3.bf16.msra.mxu1 %v1149_v9  ;;  %8793 = vmatprep.mubr.bf16.mxu1 %v9078_v11 }
  0x70   : > { %8791 = vmatprep.subr.bf16.mxu1 %v1150_v13 }
  0x73   : > { %8792 = vmatpush3.bf16.msra.mxu1 %v1150_v13 }
  0x74   : > { %1469 = vmatprep.subr.bf16.mxu1 %v1454_v24 }
  0x76   : > { %8794 = vmatmul.mubr.bf16.vlgmr.msra.gmra.mrb[32].mxu1 %v9079_v14 }
  0x77   : > { %8797 = vmatprep.mubr.bf16.mxu1 %v9080_v15  ;;  %1470 = vmatpush1.bf16.msra.mxu1 %v1453_v27 }
  0x78   : > { %1471 = vmatprep.subr.bf16.mxu1 %v1456_v30 }
  0x7b   : > { %1472 = vmatpush1.bf16.msra.mxu1 %v1455_v33 }
  0x7c   : > { %1473 = vmatprep.subr.bf16.mxu1 %v1458_v36 }
  0x7e   : > { %8798 = vmatmul.mubr.bf16.gmra.mrb[36].mxu1 %v9081_v16 }
  0x7f   : > { %8801 = vmatprep.mubr.bf16.mxu1 %v9082_v17  ;;  %1474 = vmatpush1.bf16.msra.mxu1 %v1457_v39 }
  0x86   : > { %8802 = vmatmul.mubr.bf16.gmra.mrb[40].mxu1 %v9083_v18 }
  0x87   : > { %8805 = vmatprep.mubr.bf16.mxu1 %v9084_v19 }
  0x8e   : > { %8806 = vmatmul.mubr.bf16.gmra.mrb[44].mxu1 %v9085_v20 }
  0x8f   : > { %1501 = vmatprep.mubr.bf16.mxu1 %v9226_v21  ;;  %v657_v54 = vpop.permute.xlu1 %656 }
  0x90   : > { %v647_v53 = vpop.permute.xlu0 %646 }
  0x93   : > { %v662_v4 = vpop.permute.xlu1 %661 }
  0x94   : > { %v652_v3 = vpop.permute.xlu0 %651 }
  0x96   : > { %8131 = vmatmul.mubr.msk.bf16.vlgmr.msra.gmra.mrb[48].mxu1 %vm1465_vm1, %v1440_v40 }
  0xa0   : > { %v667_v17 = vpop.permute.xlu0 %666  ;;  %v672_v18 = vpop.permute.xlu1 %671 }
  0xa4   : > { %v677_v32 = vpop.permute.xlu0 %676  ;;  %v682_v35 = vpop.permute.xlu1 %681 }
 0x109   : > { %v8527_v41 = vpop.f32.mrb[0].mxu1  ;;  %v8503_v42 = vpop.f32.mrb[0].mxu0 }
 0x10a   : > { %v8528_v43 = vpop.f32.mrb[1].mxu1  ;;  %v8504_v44 = vpop.f32.mrb[1].mxu0 }
 0x10b   : > { %v9610_v45 = vadd.f32 %v8528_v43, %v8527_v41  ;;  %v8530_v46 = vpop.f32.mrb[2].mxu1  ;;  %v8505_v47 = vadd.f32 %v8504_v44, %v8503_v42  ;;  %v8506_v48 = vpop.f32.mrb[2].mxu0 }
 0x10c   : > { %v8531_v49 = vpop.f32.mrb[3].mxu1  ;;  %v8507_v50 = vpop.f32.mrb[3].mxu0 }
 0x10d   : > { %v9612_v51 = vadd.f32 %v8531_v49, %v8530_v46  ;;  %v8508_v52 = vadd.f32 %v8507_v50, %v8506_v48  ;;  %v904_v33 = vadd.f32 %v8505_v47, %v647_v53  ;;  %v687_v44 = vpop.permute.xlu0 %686  ;;  %v692_v49 = vpop.permute.xlu1 %691 }
 0x10f   : > { %v907_v37 = vadd.f32 %v8508_v52, %v652_v3 }
 0x111   : > { %v8533_v55 = vpop.f32.mrb[4].mxu1  ;;  %v8509_v56 = vpop.f32.mrb[4].mxu0 }
 0x112   : > { %v8534_v57 = vpop.f32.mrb[5].mxu1  ;;  %v8510_v58 = vpop.f32.mrb[5].mxu0 }
 0x113   : > { %v9614_v59 = vadd.f32 %v8534_v57, %v8533_v55  ;;  %v8536_v60 = vpop.f32.mrb[6].mxu1  ;;  %v8511_v61 = vadd.f32 %v8510_v58, %v8509_v56  ;;  %v8512_v62 = vpop.f32.mrb[6].mxu0 }
 0x114   : > { %v8537_v63 = vpop.f32.mrb[7].mxu1  ;;  %v8513_v0 = vpop.f32.mrb[7].mxu0 }
 0x115   : > { %v9616_v1 = vadd.f32 %v8537_v63, %v8536_v60  ;;  %v8514_v2 = vadd.f32 %v8513_v0, %v8512_v62  ;;  %v912_v31 = vadd.f32 %v8511_v61, %v657_v54  ;;  %v697_v52 = vpop.permute.xlu0 %696  ;;  %v702_v0 = vpop.permute.xlu1 %701 }
 0x117   : > { %v915_v34 = vadd.f32 %v8514_v2, %v662_v4  ;;  %v944_v4 = vadd.f32 %v9614_v59, %v697_v52 }
 0x119   : > { %v8539_v5 = vpop.f32.mrb[8].mxu1  ;;  %v8515_v6 = vpop.f32.mrb[8].mxu0 }
 0x11a   : > { %v8540_v7 = vpop.f32.mrb[9].mxu1  ;;  %v8516_v8 = vpop.f32.mrb[9].mxu0 }
 0x11b   : > { %v9618_v9 = vadd.f32 %v8540_v7, %v8539_v5  ;;  %v8542_v10 = vpop.f32.mrb[10].mxu1  ;;  %v8517_v11 = vadd.f32 %v8516_v8, %v8515_v6  ;;  %v8518_v12 = vpop.f32.mrb[10].mxu0  ;;  %v936_v8 = vadd.f32 %v9610_v45, %v687_v44  ;;  %v9086_v45 = vld [vmem:[%s12783_s9 + $0x100] sm:$0xff]  }
 0x11c   : > { %v8543_v13 = vpop.f32.mrb[11].mxu1  ;;  %v8519_v14 = vpop.f32.mrb[11].mxu0  ;;  %8579 = vmatprep.subr.bf16.mxu0 %v9086_v45  ;;  %v9099_v45 = vld [vmem:[%s12783_s9 + $0x158] sm:$0xff]  }
 0x11d   : > { %v9620_v15 = vadd.f32 %v8543_v13, %v8542_v10  ;;  %v8520_v16 = vadd.f32 %v8519_v14, %v8518_v12  ;;  %v920_v56 = vadd.f32 %v8517_v11, %v667_v17  ;;  %v707_v5 = vpop.permute.xlu0 %706  ;;  %v947_v12 = vadd.f32 %v9616_v1, %v702_v0  ;;  %v712_v13 = vpop.permute.xlu1 %711  ;;  %v9088_v1 = vld [vmem:[%s12783_s9 + $0x108] sm:$0xff]  }
 0x11e   : > { %v939_v17 = vadd.f32 %v9612_v51, %v692_v49  ;;  %v9090_v51 = vld [vmem:[%s12783_s9 + $0x140] sm:$0xff]  }
 0x11f   : > { %v923_v61 = vadd.f32 %v8520_v16, %v672_v18  ;;  %8809 = vmatprep.subr.bf16.mxu1 %v9090_v51 }
 0x120   : > { %8810 = vmatpush3.bf16.msra.mxu1 %v9090_v51 }
 0x121   : > { %v8545_v19 = vpop.f32.mrb[12].mxu1  ;;  %v8521_v20 = vpop.f32.mrb[12].mxu0 }
 0x122   : > { %v8546_v21 = vpop.f32.mrb[13].mxu1  ;;  %v8522_v22 = vpop.f32.mrb[13].mxu0 }
 0x123   : > { %v9622_v23 = vadd.f32 %v8546_v21, %v8545_v19  ;;  %v8548_v24 = vpop.f32.mrb[14].mxu1  ;;  %v8523_v25 = vadd.f32 %v8522_v22, %v8521_v20  ;;  %v8524_v26 = vpop.f32.mrb[14].mxu0  ;;  %v9087_v21 = vld [vmem:[%s12783_s9 + $0xc0] sm:$0xff]  }
 0x124   : > { %v8549_v27 = vpop.f32.mrb[15].mxu1  ;;  %v8525_v28 = vpop.f32.mrb[15].mxu0  ;;  %8580 = vmatpush3.bf16.msra.mxu0 %v9087_v21  ;;  %v9100_v21 = vld [vmem:[%s12783_s9 + $0x128] sm:$0xff]  }
 0x125   : > { %v9624_v29 = vadd.f32 %v8549_v27, %v8548_v24  ;;  %v8526_v30 = vadd.f32 %v8525_v28, %v8524_v26  ;;  %v928_v50 = vadd.f32 %v8523_v25, %v677_v32  ;;  %v717_v22 = vpop.permute.xlu0 %716  ;;  %v722_v25 = vpop.permute.xlu1 %721  ;;  %v952_v28 = vadd.f32 %v9618_v9, %v707_v5  ;;  %8581 = vmatprep.subr.bf16.mxu0 %v9088_v1 }
 0x126   : > { %v960_v24 = vadd.f32 %v9622_v23, %v717_v22  ;;  %v9091_v23 = vld [vmem:[%s12783_s9 + $0x110] sm:$0xff]   ;;  %v9101_v22 = vld [vmem:[%s12783_s9 + $0xe8] sm:$0xff]  }
 0x127   : > { %v931_v57 = vadd.f32 %v8526_v30, %v682_v35  ;;  %v9089_v30 = vld [vmem:[%s12783_s9 + $0xc8] sm:$0xff]   ;;  %v955_v35 = vadd.f32 %v9620_v15, %v712_v13 }
 0x128   : > { %8582 = vmatpush3.bf16.msra.mxu0 %v9089_v30 }
 0x129   : > { %v8763_v36 = vpop.f32.mrb[16].mxu1  ;;  %8583 = vmatprep.subr.bf16.mxu0 %v9091_v23 }
 0x12a   : > { %v1009_v38 = vadd.f32 %v8763_v36, %v912_v31  ;;  %v1000_v39 = vpop.f32.mrb[17].mxu1 }
 0x12b   : > { %v1001_v40 = vadd.f32 %v1000_v39, %v904_v33  ;;  %v8764_v41 = vpop.f32.mrb[18].mxu1  ;;  %v963_v33 = vadd.f32 %v9624_v29, %v722_v25  ;;  %v9092_v29 = vld [vmem:[%s12783_s9 + $0xd0] sm:$0xff]  }
 0x12c   : > { %v1012_v42 = vadd.f32 %v8764_v41, %v915_v34  ;;  %v1003_v43 = vpop.f32.mrb[19].mxu1  ;;  %v1065_v2 = vmax.f32 %v1009_v38, 0.0  ;;  %8584 = vmatpush3.bf16.msra.mxu0 %v9092_v29 }
 0x12d   : > { %v1063_v46 = vmax.f32 %v1001_v40, 0.0  ;;  %v1004_v48 = vadd.f32 %v1003_v43, %v907_v37 }
 0x12e   : > { %v1066_v6 = vmax.f32 %v1012_v42, 0.0  ;;  %v1170_v42 = vpop.permute.xlu0 %1169 }
 0x12f   : > { %1079 = vxpose.xlu0.b32.start [1/16] (narrow) %v1063_v46, 16  ;;  %v1064_v55 = vmax.f32 %v1004_v48, 0.0  ;;  %v1175_v46 = vpop.permute.xlu1 %1174 }
 0x131   : > { %v8767_v54 = vpop.f32.mrb[20].mxu1 }
 0x132   : > { %v9626_v47 = vadd.f32 %v8767_v54, %v928_v50  ;;  %v1016_v53 = vpop.f32.mrb[21].mxu1  ;;  %v9093_v54 = vld [vmem:[%s12783_s9 + $0x148] sm:$0xff]  }
 0x133   : > { %v1017_v58 = vadd.f32 %v1016_v53, %v920_v56  ;;  %v8768_v60 = vpop.f32.mrb[22].mxu1  ;;  %1080 = vxpose.xlu0.b32.cont [2/16] (narrow) %v1064_v55, 16  ;;  %v1180_v56 = vpop.permute.xlu0 %1179  ;;  %8811 = vmatprep.subr.bf16.mxu1 %v9093_v54 }
 0x134   : > { %v1028_v62 = vadd.f32 %v8768_v60, %v931_v57  ;;  %v1019_v63 = vpop.f32.mrb[23].mxu1  ;;  %v1069_v38 = vmax.f32 %v9626_v47, 0.0  ;;  %8812 = vmatpush3.bf16.msra.mxu1 %v9093_v54 }
 0x135   : > { %v1020_v3 = vadd.f32 %v1019_v63, %v923_v61  ;;  %v1067_v59 = vmax.f32 %v1017_v58, 0.0  ;;  %v9094_v58 = vld [vmem:[%s12783_s9 + $0x118] sm:$0xff]   ;;  %v1185_v63 = vpop.permute.xlu1 %1184 }
 0x136   : > { %v1070_v40 = vmax.f32 %v1028_v62, 0.0  ;;  %v9095_v61 = vld [vmem:[%s12783_s9 + $0xd8] sm:$0xff]   ;;  %8585 = vmatprep.subr.bf16.mxu0 %v9094_v58  ;;  %v9108_v58 = vld [vmem:[%s12783_s9 + $0x170] sm:$0xff]  }
 0x137   : > { %1081 = vxpose.xlu0.b32.cont [3/16] (narrow) %v1065_v2, 16  ;;  %v1068_v26 = vmax.f32 %v1020_v3, 0.0  ;;  %8586 = vmatpush3.bf16.msra.mxu0 %v9095_v61  ;;  %v1190_v5 = vpop.permute.xlu0 %1189 }
 0x139   : > { %v8771_v7 = vpop.f32.mrb[24].mxu1 }
 0x13a   : > { %v9630_v10 = vadd.f32 %v8771_v7, %v944_v4  ;;  %v1032_v11 = vpop.f32.mrb[25].mxu1 }
 0x13b   : > { %v1033_v14 = vadd.f32 %v1032_v11, %v936_v8  ;;  %v8772_v16 = vpop.f32.mrb[26].mxu1  ;;  %1082 = vxpose.xlu0.b32.cont [4/16] (narrow) %v1066_v6, 16  ;;  %v1200_v1 = vpop.permute.xlu0 %1199 }
 0x13c   : > { %v9634_v18 = vadd.f32 %v8772_v16, %v947_v12  ;;  %v1035_v19 = vpop.f32.mrb[27].mxu1  ;;  %v1073_v2 = vmax.f32 %v9630_v10, 0.0  ;;  %v9096_v12 = vld [vmem:[%s12783_s9 + $0x150] sm:$0xff]   ;;  %v1195_v10 = vpop.permute.xlu1 %1194 }
 0x13d   : > { %v1036_v20 = vadd.f32 %v1035_v19, %v939_v17  ;;  %v1071_v49 = vmax.f32 %v1033_v14, 0.0  ;;  %8813 = vmatprep.subr.bf16.mxu1 %v9096_v12  ;;  %v9097_v17 = vld [vmem:[%s12783_s9 + $0x120] sm:$0xff]  }
 0x13e   : > { %v1074_v6 = vmax.f32 %v9634_v18, 0.0  ;;  %8814 = vmatpush3.bf16.msra.mxu1 %v9096_v12  ;;  %8587 = vmatprep.subr.bf16.mxu0 %v9097_v17  ;;  %v9241_v17 = vmov 1983009808  }
 0x13f   : > { %1083 = vxpose.xlu0.b32.cont [5/16] (narrow) %v1067_v59, 16  ;;  %v1072_v47 = vmax.f32 %v1036_v20, 0.0  ;;  %v9098_v20 = vld [vmem:[%s12783_s9 + $0xe0] sm:$0xff]   ;;  %8815 = vmatprep.subr.bf16.mxu1 %v9099_v45 }
 0x140   : > { %8588 = vmatpush3.bf16.msra.mxu0 %v9098_v20  ;;  %v1205_v30 = vpop.permute.xlu1 %1204 }
 0x141   : > { %v8775_v27 = vpop.f32.mrb[28].mxu1  ;;  %8589 = vmatprep.subr.bf16.mxu0 %v9100_v21 }
 0x142   : > { %v9653_v31 = vadd.f32 %v8775_v27, %v960_v24  ;;  %v1048_v32 = vpop.f32.mrb[29].mxu1  ;;  %8816 = vmatpush3.bf16.msra.mxu1 %v9099_v45 }
 0x143   : > { %v9659_v34 = vadd.f32 %v1048_v32, %v952_v28  ;;  %v8776_v9 = vpop.f32.mrb[30].mxu1  ;;  %1084 = vxpose.xlu0.b32.cont [6/16] (narrow) %v1068_v26, 16 }
 0x144   : > { %v9662_v36 = vadd.f32 %v8776_v9, %v963_v33  ;;  %v1051_v37 = vpop.f32.mrb[31].mxu1  ;;  %8590 = vmatpush3.bf16.msra.mxu0 %v9101_v22  ;;  %v1077_v33 = vmax.f32 %v9653_v31, 0.0  ;;  %v1210_v9 = vpop.permute.xlu0 %1209 }
 0x145   : > { %v9665_v39 = vadd.f32 %v1051_v37, %v955_v35  ;;  %v1075_v18 = vmax.f32 %v9659_v34, 0.0  ;;  %v9102_v35 = vld [vmem:[%s12783_s9 + $0x160] sm:$0xff]   ;;  %v9103_v37 = vld [vmem:[%s12783_s9 + $0x130] sm:$0xff]  }
 0x146   : > { %8817 = vmatprep.subr.bf16.mxu1 %v9102_v35  ;;  %8591 = vmatprep.subr.bf16.mxu0 %v9103_v37 }
 0x147   : > { %1085 = vxpose.xlu0.b32.cont [7/16] (narrow) %v1069_v38, 16  ;;  %v1076_v51 = vmax.f32 %v9665_v39, 0.0  ;;  %v9104_v38 = vld [vmem:[%s12783_s9 + $0xf0] sm:$0xff]   ;;  %v1078_v39 = vmax.f32 %v9662_v36, 0.0  ;;  %8818 = vmatpush3.bf16.msra.mxu1 %v9102_v35  ;;  %v9107_v36 = vld [vmem:[%s12783_s9 + $0xf8] sm:$0xff]  }
 0x148   : > { %8592 = vmatpush3.bf16.msra.mxu0 %v9104_v38 }
 0x149   : > { %v8795_v41 = vpop.f32.mrb[32].mxu1 }
 0x14a   : > { %v1329_v43 = vpop.f32.mrb[33].mxu1  ;;  %v1338_v53 = vadd.f32 %v8795_v41, %v1180_v56 }
 0x14b   : > { %v1330_v15 = vadd.f32 %v1329_v43, %v1170_v42  ;;  %1086 = vxpose.xlu0.b32.cont [8/16] (narrow) %v1070_v40, 16  ;;  %v8796_v44 = vpop.f32.mrb[34].mxu1  ;;  %v1215_v40 = vpop.permute.xlu1 %1214  ;;  %v9105_v43 = vld [vmem:[%s12783_s9 + $0x168] sm:$0xff]  }
 0x14c   : > { %v1332_v48 = vpop.f32.mrb[35].mxu1  ;;  %v1394_v3 = vmax.f32 %v1338_v53, 0.0  ;;  %v1341_v4 = vadd.f32 %v8796_v44, %v1185_v63  ;;  %8819 = vmatprep.subr.bf16.mxu1 %v9105_v43  ;;  %v1220_v44 = vpop.permute.xlu0 %1219 }
 0x14d   : > { %v1392_v50 = vmax.f32 %v1330_v15, 0.0  ;;  %v1333_v55 = vadd.f32 %v1332_v48, %v1175_v46  ;;  %v9106_v15 = vld [vmem:[%s12783_s9 + $0x138] sm:$0xff]   ;;  %8820 = vmatpush3.bf16.msra.mxu1 %v9105_v43 }
 0x14e   : > { %v1395_v7 = vmax.f32 %v1341_v4, 0.0  ;;  %8593 = vmatprep.subr.bf16.mxu0 %v9106_v15  ;;  %8821 = vmatprep.subr.bf16.mxu1 %v9108_v58 }
 0x14f   : > { %1087 = vxpose.xlu0.b32.cont [9/16] (narrow) %v1071_v49, 16  ;;  %1408 = vxpose.xlu1.b32.start [1/16] (narrow) %v1392_v50, 64  ;;  %v1393_v57 = vmax.f32 %v1333_v55, 0.0  ;;  %v1225_v49 = vpop.permute.xlu1 %1224 }
 0x150   : > { %8594 = vmatpush3.bf16.msra.mxu0 %v9107_v36  ;;  %v1230_v54 = vpop.permute.xlu0 %1229 }
 0x151   : > { %v8799_v52 = vpop.f32.mrb[36].mxu1  ;;  %8822 = vmatpush3.bf16.msra.mxu1 %v9108_v58 }
 0x152   : > { %v1345_v60 = vpop.f32.mrb[37].mxu1  ;;  %v1354_v24 = vadd.f32 %v8799_v52, %v1200_v1 }
 0x153   : > { %1088 = vxpose.xlu0.b32.cont [10/16] (narrow) %v1072_v47, 16  ;;  %v8800_v62 = vpop.f32.mrb[38].mxu1  ;;  %1409 = vxpose.xlu1.b32.cont [2/16] (narrow) %v1393_v57, 64  ;;  %v1346_v8 = vadd.f32 %v1345_v60, %v1190_v5  ;;  %v1235_v53 = vpop.permute.xlu1 %1234  ;;  %v9112_v60 = vld [vmem:[%s12783_s9 + $0x40] sm:$0xff]  }
 0x154   : > { %v1348_v0 = vpop.f32.mrb[39].mxu1  ;;  %v1398_v23 = vmax.f32 %v1354_v24, 0.0  ;;  %v1357_v34 = vadd.f32 %v8800_v62, %v1205_v30  ;;  %v1240_v61 = vpop.permute.xlu0 %1239  ;;  %v9114_v62 = vld [vmem:[%s12783_s9 + $0x178] sm:$0xff]   ;;  %8631 = vmatprep.subr.bf16.mxu0 %v9112_v60 }
 0x155   : > { %v1396_v19 = vmax.f32 %v1346_v8, 0.0  ;;  %v1349_v59 = vadd.f32 %v1348_v0, %v1195_v10  ;;  %8823 = vmatprep.subr.bf16.mxu1 %v9114_v62 }
 0x156   : > { %v1399_v31 = vmax.f32 %v1357_v34, 0.0  ;;  %8824 = vmatpush3.bf16.msra.mxu1 %v9114_v62 }
 0x157   : > { %1089 = vxpose.xlu0.b32.cont [11/16] (narrow) %v1073_v2, 16  ;;  %1410 = vxpose.xlu1.b32.cont [3/16] (narrow) %v1394_v3, 64  ;;  %v1397_v25 = vmax.f32 %v1349_v59, 0.0  ;;  %v9741_v2 = vld [vmem:[%s12783_s9 + $0x80] sm:$0xff]   ;;  %v1245_v3 = vpop.permute.xlu1 %1244 }
 0x158   : > { %8833 = vmatprep.subr.bf16.mxu1 %v9741_v2 }
 0x159   : > { %v9681_v11 = vpop.f32.mrb[40].mxu1 }
 0x15a   : > { %v1361_v13 = vpop.f32.mrb[41].mxu1  ;;  %v1370_v46 = vadd.f32 %v9681_v11, %v1220_v44 }
 0x15b   : > { %1090 = vxpose.xlu0.b32.cont [12/16] (narrow) %v1074_v6, 16  ;;  %v9686_v14 = vpop.f32.mrb[42].mxu1  ;;  %1411 = vxpose.xlu1.b32.cont [4/16] (narrow) %v1395_v7, 64  ;;  %v1362_v29 = vadd.f32 %v1361_v13, %v1210_v9  ;;  %v1459_v7 = vld [vmem:[%s12778_s4] sm:$0xff] }
 0x15c   : > { %v1364_v16 = vpop.f32.mrb[43].mxu1  ;;  %v1402_v50 = vmax.f32 %v1370_v46, 0.0  ;;  %v1373_v55 = vadd.f32 %v9686_v14, %v1225_v49  ;;  %v9240_v14 = vmov 1966171168  }
 0x15d   : > { %v1400_v41 = vmax.f32 %v1362_v29, 0.0  ;;  %v1365_v42 = vadd.f32 %v1364_v16, %v1215_v40  ;;  %v1633_v10 = vunpack.c.l.s4 %v9240_v14  ;;  %v1635_v16 = vlaneseq }
 0x15e   : > { %v1403_v56 = vmax.f32 %v1373_v55, 0.0 }
 0x15f   : > { %1091 = vxpose.xlu0.b32.cont [13/16] (narrow) %v1075_v18, 16  ;;  %1412 = vxpose.xlu1.b32.cont [5/16] (narrow) %v1396_v19, 64  ;;  %v1401_v48 = vmax.f32 %v1365_v42, 0.0  ;;  %v2039_v18 = vunpack.c.l.s4 %v9241_v17  ;;  %v1634_v19 = vunpack.c.0.s8 %v1633_v10  ;;  %v1636_v59 = vshrl.u32 %v1635_v16, 7 }
 0x161   : > { %v8807_v26 = vpop.f32.mrb[44].mxu1  ;;  %v2040_v20 = vunpack.c.0.s8 %v2039_v18 }
 0x162   : > { %v1377_v27 = vpop.f32.mrb[45].mxu1  ;;  %v1386_v63 = vadd.f32 %v8807_v26, %v1240_v61 }
 0x163   : > { %1092 = vxpose.xlu0.b32.cont [14/16] (narrow) %v1076_v51, 16  ;;  %v9705_v28 = vpop.f32.mrb[46].mxu1  ;;  %1413 = vxpose.xlu1.b32.cont [6/16] (narrow) %v1397_v25, 64  ;;  %v1378_v47 = vadd.f32 %v1377_v27, %v1230_v54  ;;  %v9752_v51 = vsub.s32 %v1634_v19, %v1636_v59  ;;  %v9754_v25 = vsub.s32 0, %v1636_v59  ;;  %v9758_v30 = vsub.s32 %v2040_v20, %v1636_v59 }
 0x164   : > { %v1380_v32 = vpop.f32.mrb[47].mxu1  ;;  %v1406_v4 = vmax.f32 %v1386_v63, 0.0  ;;  %v1389_v5 = vadd.f32 %v9705_v28, %v1245_v3 }
 0x165   : > { %v1404_v57 = vmax.f32 %v1378_v47, 0.0  ;;  %v1381_v52 = vadd.f32 %v1380_v32, %v1235_v53 }
 0x166   : > { %v1407_v6 = vmax.f32 %v1389_v5, 0.0 }
 0x167   : > { %1093 = vxpose.xlu0.b32.cont [15/16] (narrow) %v1077_v33, 16  ;;  %1414 = vxpose.xlu1.b32.cont [7/16] (narrow) %v1398_v23, 64  ;;  %v1405_v0 = vmax.f32 %v1381_v52, 0.0 }
 0x169   : > { %v9748_v8 = vpop.f32.mrb[48].mxu1 }
 0x16a   : > { %v9750_v11 = vpop.f32.mrb[49].mxu1 }
 0x16b   : > { %1094 = vxpose.xlu0.b32.end [16/16] (narrow) %v1078_v39, 16  ;;  %1415 = vxpose.xlu1.b32.cont [8/16] (narrow) %v1399_v31, 64  ;;  %v1507_v12 = vpop.f32.mrb[50].mxu1 }
 0x16c   : > { %v1508_v13 = vpop.f32.mrb[51].mxu1 }
 0x16f   : > { %1416 = vxpose.xlu1.b32.cont [9/16] (narrow) %v1400_v41, 64 }
 0x173   : > { %1417 = vxpose.xlu1.b32.cont [10/16] (narrow) %v1401_v48, 64 }
 0x177   : > { %1418 = vxpose.xlu1.b32.cont [11/16] (narrow) %v1402_v50, 64 }
 0x17b   : > { %1419 = vxpose.xlu1.b32.cont [12/16] (narrow) %v1403_v56, 64 }
 0x17f   : > { %1420 = vxpose.xlu1.b32.cont [13/16] (narrow) %v1404_v57, 64 }
 0x183   : > { %1421 = vxpose.xlu1.b32.cont [14/16] (narrow) %v1405_v0, 64 }
 0x187   : > { %1422 = vxpose.xlu1.b32.cont [15/16] (narrow) %v1406_v4, 64 }
 0x18b   : > { %1423 = vxpose.xlu1.b32.end [16/16] (narrow) %v1407_v6, 64 }
 0x194   : > { %1462 = vperm.xlu0 %8962, %v1459_v7  }
 0x1af   : > { %v1095_v45 = vpop.trf.xlu0 }
 0x1b0   : > { %v1578_v21 = vcombine.high %v1095_v45, %v1095_v45  ;;  %v1582_v1 = vrot.slane %v1095_v45, 7  ;;  %v1595_v22 = vrot.slane %v1095_v45, 1  ;;  %v1612_v24 = vmul.f32 0.75, %v1095_v45 }
 0x1b2   : > { %v1591_v26 = vsel %vm1590_vm2, %v1095_v45, %v1582_v1  ;;  %v1596_v27 = vrot.slane %v1578_v21, 1  ;;  %v1604_v28 = vsel %vm1603_vm3, %v1595_v22, %v1095_v45  ;;  %v1583_v32 = vrot.slane %v1578_v21, 7 }
 0x1b3   : > { %v1608_v33 = vmul.f32 0.25, %v1591_v26  ;;  %v1620_v23 = vmul.f32 0.25, %v1604_v28  ;;  %v1096_v34 = vpop.trf.xlu0  ;;  %v1613_v9 = vmul.f32 0.75, %v1578_v21 }
 0x1b4   : > { %v1605_v35 = vsel %vm1603_vm3, %v1596_v27, %v1578_v21  ;;  %v9761_v37 = vcombine.high %v1096_v34, %v1096_v34  ;;  %v1584_v38 = vrot.slane %v1096_v34, 7  ;;  %v1597_v39 = vrot.slane %v1096_v34, 1 }
 0x1b5   : > { %v1616_v31 = vadd.f32 %v1612_v24, %v1608_v33  ;;  %v1621_v29 = vmul.f32 0.25, %v1605_v35  ;;  %v1624_v40 = vadd.f32 %v1620_v23, %v1612_v24  ;;  %v1614_v41 = vmul.f32 0.75, %v1096_v34 }
 0x1b6   : > { %v1585_v42 = vrot.slane %v9761_v37, 7  ;;  %v1593_v43 = vsel %vm1590_vm2, %v1096_v34, %v1584_v38  ;;  %v1598_v15 = vrot.slane %v9761_v37, 1  ;;  %v1606_v36 = vsel %vm1603_vm3, %v1597_v39, %v1096_v34 }
 0x1b7   : > { %v1638_v44 = vrot.slane %v1616_v31, %v9752_v51  ;;  %v1754_v46 = vrot.slane %v1624_v40, %v9752_v51  ;;  %v1610_v48 = vmul.f32 0.25, %v1593_v43  ;;  %v1622_v49 = vmul.f32 0.25, %v1606_v36 }
 0x1b8   : > { %v1592_v50 = vsel %vm1590_vm2, %v1578_v21, %v1583_v32  ;;  %v1625_v55 = vadd.f32 %v1621_v29, %v1613_v9  ;;  %v9772_v54 = vsel %vm1590_vm2, %v9761_v37, %v1585_v42  ;;  %v9776_v56 = vsel %vm1603_vm3, %v1598_v15, %v9761_v37 }
 0x1b9   : > { %v1639_v47 = vcombine.high %v1638_v44, %v1638_v44  ;;  %v1755_v53 = vcombine.high %v1754_v46, %v1754_v46  ;;  %v1762_v57 = vrot.slane %v1754_v46, %v9752_v51  ;;  %v1618_v52 = vadd.f32 %v1614_v41, %v1610_v48 }
 0x1ba   : > { %v1626_v58 = vadd.f32 %v1622_v49, %v1614_v41  ;;  %v1646_v60 = vrot.slane %v1638_v44, %v9752_v51  ;;  %v1609_v61 = vmul.f32 0.25, %v1592_v50  ;;  %v1778_v62 = vrot.slane %v1625_v55, %v9752_v51 }
 0x1bb   : > { %v1686_v63 = vrot.slane %v1618_v52, %v9752_v51  ;;  %v1653_v0 = vrot.slane %v1639_v47, %v9752_v51  ;;  %v1769_v3 = vrot.slane %v1755_v53, %v9752_v51  ;;  %v1770_v4 = vcombine.high %v1762_v57, %v1762_v57 }
 0x1bc   : > { %v9785_v5 = vrot.slane %v1626_v58, %v9752_v51  ;;  %v1654_v6 = vcombine.high %v1646_v60, %v1646_v60  ;;  %v1847_v7 = vrot.slane %v1762_v57, %v9754_v25  ;;  %v1617_v12 = vadd.f32 %v1613_v9, %v1609_v61 }
 0x1bd   : > { %v1687_v13 = vcombine.high %v1686_v63, %v1686_v63  ;;  %v1655_v14 = vcombine.high %v1653_v0, %v1653_v0  ;;  %v1771_v10 = vcombine.high %v1769_v3, %v1769_v3  ;;  %v1851_v16 = vrot.slane %v1769_v3, %v9754_v25 }
 0x1be   : > { %v1803_v17 = vcombine.high %v9785_v5, %v9785_v5  ;;  %v9793_v18 = vrot.slane %v9785_v5, %v9752_v51  ;;  %v1855_v19 = vrot.slane %v1770_v4, %v9754_v25  ;;  %v1924_v59 = vsel %vm1590_vm2, %v1646_v60, %v1847_v7 }
 0x1bf   : > { %v1859_v20 = vrot.slane %v1771_v10, %v9754_v25  ;;  %v1925_v45 = vsel %vm1590_vm2, %v1653_v0, %v1851_v16  ;;  %v1940_v21 = vmul.f32 0.25, %v1924_v59  ;;  %v1952_v1 = vmul.f32 0.75, %v1924_v59 }
 0x1c0   : > { %v1926_v22 = vsel %vm1590_vm2, %v1654_v6, %v1855_v19  ;;  %v1941_v24 = vmul.f32 0.25, %v1925_v45  ;;  %v1953_v26 = vmul.f32 0.75, %v1925_v45  ;;  %v1662_v27 = vrot.slane %v1617_v12, %v9752_v51 }
 0x1c1   : > { %v1927_v28 = vsel %vm1590_vm2, %v1655_v14, %v1859_v20  ;;  %v1942_v32 = vmul.f32 0.25, %v1926_v22  ;;  %v1954_v33 = vmul.f32 0.75, %v1926_v22  ;;  %v1968_v23 = vadd.f32 %v1952_v1, %v1940_v21 }
 0x1c2   : > { %v1943_v34 = vmul.f32 0.25, %v1927_v28  ;;  %v1955_v9 = vmul.f32 0.75, %v1927_v28  ;;  %v1969_v35 = vadd.f32 %v1953_v26, %v1941_v24  ;;  %v1663_v38 = vcombine.high %v1662_v27, %v1662_v27 }
 0x1c3   : > { %v1970_v39 = vadd.f32 %v1954_v33, %v1942_v32  ;;  %v1670_v31 = vrot.slane %v1662_v27, %v9752_v51  ;;  %v1779_v29 = vcombine.high %v1778_v62, %v1778_v62  ;;  %v1786_v40 = vrot.slane %v1778_v62, %v9752_v51 }
 0x1c4   : > { %v1971_v41 = vadd.f32 %v1955_v9, %v1943_v34  ;;  %v2036_v42 = vcombine.low %v1968_v23, %v1969_v35  ;;  %v1677_v43 = vrot.slane %v1663_v38, %v9752_v51  ;;  %v9806_v15 = vrot.slane %v1686_v63, %v9752_v51 }
 0x1c5   : > { %v1678_v36 = vcombine.high %v1670_v31, %v1670_v31  ;;  %v1793_v44 = vrot.slane %v1779_v29, %v9752_v51  ;;  %v1794_v46 = vcombine.high %v1786_v40, %v1786_v40  ;;  %v1863_v48 = vrot.slane %v1786_v40, %v9754_v25 }
 0x1c6   : > { %v2037_v49 = vcombine.low %v1970_v39, %v1971_v41  ;;  %v2044_v50 = vrot.slane %v2036_v42, %v9758_v30  ;;  %v1679_v55 = vcombine.high %v1677_v43, %v1677_v43  ;;  %v1701_v47 = vrot.slane %v1687_v13, %v9752_v51 }
 0x1c7   : > { %v1795_v53 = vcombine.high %v1793_v44, %v1793_v44  ;;  %v1867_v57 = vrot.slane %v1793_v44, %v9754_v25  ;;  %v1871_v52 = vrot.slane %v1794_v46, %v9754_v25  ;;  %v1928_v58 = vsel %vm1590_vm2, %v1670_v31, %v1863_v48 }
 0x1c8   : > { %v2051_v60 = vrot.slane %v2037_v49, %v9758_v30  ;;  %v9816_v61 = vmul.f32 0.25, %v1928_v58  ;;  %v1956_v62 = vmul.f32 0.75, %v1928_v58  ;;  %v1702_v63 = vcombine.high %v9806_v15, %v9806_v15 }
 0x1c9   : > { %v1875_v0 = vrot.slane %v1795_v53, %v9754_v25  ;;  %v1929_v3 = vsel %vm1590_vm2, %v1677_v43, %v1867_v57  ;;  %v1930_v4 = vsel %vm1590_vm2, %v1678_v36, %v1871_v52  ;;  %v1703_v6 = vcombine.high %v1701_v47, %v1701_v47 }
 0x1ca   : > { %v2052_v7 = vcombine.low %v2044_v50, %v2051_v60  ;;  %v9823_v12 = vmul.f32 0.25, %v1929_v3  ;;  %v9825_v13 = vmul.f32 0.25, %v1930_v4  ;;  %v1988_v14 = vadd.f32 %v1952_v1, %v9816_v61 }
 0x1cb   : > { %v1931_v10 = vsel %vm1590_vm2, %v1679_v55, %v1875_v0  ;;  %v1957_v16 = vmul.f32 0.75, %v1929_v3  ;;  %v1958_v19 = vmul.f32 0.75, %v1930_v4  ;;  %v1972_v59 = vadd.f32 %v1956_v62, %v1940_v21 }
 0x1cc   : > { %v9829_v20 = vmul.f32 0.25, %v1931_v10  ;;  %v1989_v45 = vadd.f32 %v1953_v26, %v9823_v12  ;;  %v1990_v22 = vadd.f32 %v1954_v33, %v9825_v13  ;;  %v1959_v27 = vmul.f32 0.75, %v1931_v10 }
 0x1cd   : > { %v1973_v28 = vadd.f32 %v1957_v16, %v1941_v24  ;;  %v1974_v23 = vadd.f32 %v1958_v19, %v1942_v32  ;;  %v1817_v35 = vrot.slane %v1803_v17, %v9752_v51  ;;  %v1818_v1 = vcombine.high %v9793_v18, %v9793_v18 }
 0x1ce   : > { %v1991_v38 = vadd.f32 %v1955_v9, %v9829_v20  ;;  %v2053_v21 = vcombine.low %v1988_v14, %v1989_v45  ;;  %v1975_v39 = vadd.f32 %v1959_v27, %v1943_v34  ;;  %v1879_v26 = vrot.slane %v9793_v18, %v9754_v25 }
 0x1cf   : > { %v1424_v31 = vpop.trf.xlu1  ;;  %v2070_v33 = vcombine.low %v1972_v59, %v1973_v28  ;;  %v1819_v29 = vcombine.high %v1817_v35, %v1817_v35  ;;  %v1883_v24 = vrot.slane %v1817_v35, %v9754_v25  ;;  %v1887_v32 = vrot.slane %v1818_v1, %v9754_v25 }
 0x1d0   : > { %v2180_v40 = vadd.f32 %v2052_v7, %v1424_v31  ;;  %v2054_v5 = vcombine.low %v1990_v22, %v1991_v38  ;;  %v2061_v17 = vrot.slane %v2053_v21, %v9758_v30  ;;  %v2071_v41 = vcombine.low %v1974_v23, %v1975_v39 }
 0x1d1   : > { %v2078_v42 = vrot.slane %v2070_v33, %v9758_v30  ;;  %v1891_v9 = vrot.slane %v1819_v29, %v9754_v25  ;;  %v1932_v34 = vsel %vm1590_vm2, %v9806_v15, %v1879_v26  ;;  %v1933_v18 = vsel %vm1590_vm2, %v1701_v47, %v1883_v24 }
 0x1d2   : > { %v2201_v43 = vrot.slane %v2180_v40, 7  ;;  %v2225_v36 = vrot.slane %v2180_v40, 1  ;;  %v2267_v44 = vpack.c.bf16 %v2180_v40, %v2180_v40  ;;  %v2068_v46 = vrot.slane %v2054_v5, %v9758_v30 }
 0x1d3   : > { %v1425_v48 = vpop.trf.xlu1  ;;  %v2085_v49 = vrot.slane %v2071_v41, %v9758_v30  ;;  %v1934_v50 = vsel %vm1590_vm2, %v1702_v63, %v1887_v32  ;;  %v1935_v55 = vsel %vm1590_vm2, %v1703_v6, %v1891_v9  ;;  %v9854_v53 = vmul.f32 0.25, %v1932_v34 }
 0x1d4   : > { %v2217_v57 = vsel %vm1590_vm2, 0.0, %v2201_v43  ;;  %v2242_v15 = vsel %vm2241_vm4, %v2225_v36, 0.0  ;;  %2275 = vst [vmem:[#allocation2 + $0x10] sm:$0xf] %v2267_v44  ;;  %v2069_v47 = vcombine.low %v2061_v17, %v2068_v46  ;;  %v9858_v52 = vmul.f32 0.25, %v1933_v18 }
 0x1d5   : > { %v2250_v58 = vpack.c.bf16 %v2217_v57, %v2217_v57  ;;  %v2283_v60 = vpack.c.bf16 %v2242_v15, %v2242_v15  ;;  %v2086_v0 = vcombine.low %v2078_v42, %v2085_v49  ;;  %v9860_v3 = vmul.f32 0.25, %v1934_v50 }
 0x1d6   : > { %v2181_v4 = vadd.f32 %v2069_v47, %v1425_v48  ;;  %v9862_v7 = vmul.f32 0.25, %v1935_v55  ;;  %v1992_v63 = vadd.f32 %v1956_v62, %v9854_v53  ;;  %v1993_v6 = vadd.f32 %v1957_v16, %v9858_v52 }
 0x1d7   : > { %2259 = vst [vmem:[#allocation2 + $0xc] sm:$0xf] %v2250_v58  ;;  %2291 = vst [vmem:[#allocation2 + $0x14] sm:$0xf] %v2283_v60  ;;  %v1426_v14 = vpop.trf.xlu1  ;;  %v1994_v10 = vadd.f32 %v1958_v19, %v9860_v3  ;;  %v9867_v59 = vmul.f32 0.75, %v1932_v34  ;;  %v9869_v45 = vmul.f32 0.75, %v1933_v18 }
 0x1d8   : > { %v9871_v22 = vmul.f32 0.75, %v1934_v50  ;;  %v2202_v28 = vrot.slane %v2181_v4, 7  ;;  %v2226_v23 = vrot.slane %v2181_v4, 1  ;;  %v2268_v35 = vpack.c.bf16 %v2181_v4, %v2181_v4 }
 0x1d9   : > { %v2182_v1 = vadd.f32 %v2086_v0, %v1426_v14  ;;  %v1995_v38 = vadd.f32 %v1959_v27, %v9862_v7  ;;  %v2087_v62 = vcombine.low %v1992_v63, %v1993_v6  ;;  %v9874_v21 = vmul.f32 0.75, %v1935_v55 }
 0x1da   : > { %v1976_v16 = vadd.f32 %v9867_v59, %v9816_v61  ;;  %v2218_v19 = vsel %vm1590_vm2, 0.0, %v2202_v28  ;;  %v2243_v39 = vsel %vm2241_vm4, %v2226_v23, 0.0  ;;  %2276 = vst [vmem:[#allocation2 + $0x1c] sm:$0xf] %v2268_v35  ;;  %v1977_v61 = vadd.f32 %v9869_v45, %v9823_v12 }
 0x1db   : > { %v2203_v26 = vrot.slane %v2182_v1, 7  ;;  %v2227_v31 = vrot.slane %v2182_v1, 1  ;;  %v2251_v33 = vpack.c.bf16 %v2218_v19, %v2218_v19  ;;  %v2284_v29 = vpack.c.bf16 %v2243_v39, %v2243_v39  ;;  %v1427_v9 = vpop.trf.xlu1 }
 0x1dc   : > { %v2269_v24 = vpack.c.bf16 %v2182_v1, %v2182_v1  ;;  %v2088_v32 = vcombine.low %v1994_v10, %v1995_v38  ;;  %v2095_v5 = vrot.slane %v2087_v62, %v9758_v30  ;;  %v1978_v34 = vadd.f32 %v9871_v22, %v9825_v13 }
 0x1dd   : > { %v2219_v40 = vsel %vm1590_vm2, 0.0, %v2203_v26  ;;  %v2244_v27 = vsel %vm2241_vm4, %v2227_v31, 0.0  ;;  %2260 = vst [vmem:[#allocation2 + $0x18] sm:$0xf] %v2251_v33  ;;  %2292 = vst [vmem:[#allocation2 + $0x20] sm:$0xf] %v2284_v29  ;;  %v1979_v18 = vadd.f32 %v9874_v21, %v9829_v20  ;;  %v2104_v43 = vcombine.low %v1976_v16, %v1977_v61 }
 0x1de   : > { %v2252_v17 = vpack.c.bf16 %v2219_v40, %v2219_v40  ;;  %2277 = vst [vmem:[#allocation2 + $0x28] sm:$0xf] %v2269_v24  ;;  %v2285_v41 = vpack.c.bf16 %v2244_v27, %v2244_v27  ;;  %v2102_v42 = vrot.slane %v2088_v32, %v9758_v30  ;;  %v1611_v36 = vmul.f32 0.25, %v9772_v54 }
 0x1df   : > { %v1615_v44 = vmul.f32 0.75, %v9761_v37  ;;  %v1623_v46 = vmul.f32 0.25, %v9776_v56  ;;  %v2105_v48 = vcombine.low %v1978_v34, %v1979_v18  ;;  %v2112_v57 = vrot.slane %v2104_v43, %v9758_v30  ;;  %v1428_v58 = vpop.trf.xlu1 }
 0x1e0   : > { %2261 = vst [vmem:[#allocation2 + $0x24] sm:$0xf] %v2252_v17  ;;  %2293 = vst [vmem:[#allocation2 + $0x2c] sm:$0xf] %v2285_v41  ;;  %v2103_v12 = vcombine.low %v2095_v5, %v2102_v42  ;;  %v9909_v5 = vld [vmem:[#allocation2 + $0xc] sm:$0xff] }
 0x1e1   : > { %v1619_v49 = vadd.f32 %v1615_v44, %v1611_v36  ;;  %v1627_v55 = vadd.f32 %v1623_v46, %v1615_v44  ;;  %v2119_v13 = vrot.slane %v2105_v48, %v9758_v30 }
 0x1e2   : > { %v2183_v50 = vadd.f32 %v2103_v12, %v1427_v9 }
 0x1e3   : > { %v1710_v20 = vrot.slane %v1619_v49, %v9752_v51  ;;  %v1826_v37 = vrot.slane %v1627_v55, %v9752_v51  ;;  %v2120_v60 = vcombine.low %v2112_v57, %v2119_v13  ;;  %v9913_v42 = vpop.trf.xlu1  ;;  %v9113_v49 = vld [vmem:[%s12783_s9] sm:$0xff]  }
 0x1e4   : > { %v2204_v15 = vrot.slane %v2183_v50, 7  ;;  %v2228_v47 = vrot.slane %v2183_v50, 1  ;;  %v2270_v54 = vpack.c.bf16 %v2183_v50, %v2183_v50  ;;  %v9111_v4 = vld [vmem:[#allocation2 + $0x14] ss:$12 sps:$4 sm:$0xff]   ;;  %v9904_v39 = vld [vmem:[#allocation2 + $0x18] sm:$0xff] }
 0x1e5   : > { %v1711_v0 = vcombine.high %v1710_v20, %v1710_v20  ;;  %v1718_v56 = vrot.slane %v1710_v20, %v9752_v51  ;;  %v1827_v14 = vcombine.high %v1826_v37, %v1826_v37  ;;  %v1834_v10 = vrot.slane %v1826_v37, %v9752_v51  ;;  %8825 = vmatprep.mubr.bf16.mxu1 %v9111_v4  ;;  %v9115_v20 = vld [vmem:[%s12783_s9 + $0x48] sm:$0xff]  }
 0x1e6   : > { %v2220_v63 = vsel %vm1590_vm2, 0.0, %v2204_v15  ;;  %v2245_v6 = vsel %vm2241_vm4, %v2228_v47, 0.0  ;;  %2278 = vst [vmem:[#allocation2 + $0x34] sm:$0xf] %v2270_v54  ;;  %v2184_v35 = vadd.f32 %v2120_v60, %v1428_v58  ;;  %v8180_v9 = vcombine.low %v9909_v5, %v9904_v39 }
 0x1e7   : > { %v2253_v28 = vpack.c.bf16 %v2220_v63, %v2220_v63  ;;  %v2286_v23 = vpack.c.bf16 %v2245_v6, %v2245_v6  ;;  %v1725_v1 = vrot.slane %v1711_v0, %v9752_v51  ;;  %v1726_v38 = vcombine.high %v1718_v56, %v1718_v56 }
 0x1e8   : > { %v1841_v62 = vrot.slane %v1827_v14, %v9752_v51  ;;  %v1842_v16 = vcombine.high %v1834_v10, %v1834_v10  ;;  %v1895_v19 = vrot.slane %v1834_v10, %v9754_v25  ;;  %v2205_v26 = vrot.slane %v2184_v35, 7  ;;  %v1430_v10 = vpop.trf.xlu1 }
 0x1e9   : > { %2262 = vst [vmem:[#allocation2 + $0x30] sm:$0xf] %v2253_v28  ;;  %2294 = vst [vmem:[#allocation2 + $0x38] sm:$0xf] %v2286_v23  ;;  %v2229_v31 = vrot.slane %v2184_v35, 1  ;;  %v2271_v33 = vpack.c.bf16 %v2184_v35, %v2184_v35  ;;  %v1727_v29 = vcombine.high %v1725_v1, %v1725_v1  ;;  %v8181_v48 = vcombine.high %v9909_v5, %v9904_v39  ;;  %v9942_v35 = vld [vmem:[#allocation2 + $0x24] sm:$0xff] }
 0x1ea   : > { %v1843_v24 = vcombine.high %v1841_v62, %v1841_v62  ;;  %v1899_v32 = vrot.slane %v1841_v62, %v9754_v25  ;;  %v1903_v40 = vrot.slane %v1842_v16, %v9754_v25  ;;  %v1936_v27 = vsel %vm1590_vm2, %v1718_v56, %v1895_v19 }
 0x1eb   : > { %v2221_v61 = vsel %vm1590_vm2, 0.0, %v2205_v26  ;;  %v2246_v17 = vsel %vm2241_vm4, %v2229_v31, 0.0  ;;  %2279 = vst [vmem:[#allocation2 + $0x40] sm:$0xf] %v2271_v33  ;;  %v1984_v41 = vmul.f32 0.25, %v1936_v27  ;;  %v1964_v57 = vmul.f32 0.75, %v1936_v27  ;;  %2668 = vmatprep.mubr.bf16.mxu0 %v8181_v48 }
 0x1ec   : > { %v2254_v34 = vpack.c.bf16 %v2221_v61, %v2221_v61  ;;  %v2287_v18 = vpack.c.bf16 %v2246_v17, %v2246_v17  ;;  %v1907_v43 = vrot.slane %v1843_v24, %v9754_v25  ;;  %v1937_v36 = vsel %vm1590_vm2, %v1725_v1, %v1899_v32  ;;  %2669 = vmatmul.mubr.bf16.vlgmr.msra.gmra.mrb[16].mxu0 %v8180_v9  ;;  %v9122_v33 = vld [vmem:[%s12783_s9 + $0x10] sm:$0xff]   ;;  %v9124_v27 = vld [vmem:[%s12783_s9 + $0x58] sm:$0xff]  }
 0x1ed   : > { %v1938_v44 = vsel %vm1590_vm2, %v1726_v38, %v1903_v40  ;;  %v1985_v12 = vmul.f32 0.25, %v1937_v36  ;;  %v1996_v46 = vadd.f32 %v1984_v41, %v9867_v59  ;;  %v1965_v13 = vmul.f32 0.75, %v1937_v36  ;;  %8632 = vmatpush3.bf16.msra.mxu0 %v9113_v49  ;;  %v9126_v32 = vld [vmem:[%s12783_s9 + $0x90] sm:$0xff]   ;;  %v9132_v36 = vld [vmem:[%s12783_s9 + $0x98] sm:$0xff]  }
 0x1ee   : > { %2263 = vst [vmem:[#allocation2 + $0x3c] sm:$0xf] %v2254_v34  ;;  %2295 = vst [vmem:[#allocation2 + $0x44] sm:$0xf] %v2287_v18  ;;  %v1939_v50 = vsel %vm1590_vm2, %v1727_v29, %v1907_v43  ;;  %v1986_v55 = vmul.f32 0.25, %v1938_v44  ;;  %v1966_v47 = vmul.f32 0.75, %v1938_v44  ;;  %v1980_v37 = vadd.f32 %v1964_v57, %v9854_v53  ;;  %8633 = vmatprep.subr.bf16.mxu0 %v9115_v20 }
 0x1ef   : > { %v1987_v15 = vmul.f32 0.25, %v1939_v50  ;;  %v1997_v59 = vadd.f32 %v1985_v12, %v9869_v45  ;;  %v1967_v54 = vmul.f32 0.75, %v1939_v50  ;;  %v1981_v60 = vadd.f32 %v1965_v13, %v9858_v52  ;;  %v9125_v43 = vld [vmem:[%s12783_s9 + $0x18] sm:$0xff]  }
 0x1f0   : > { %v1998_v58 = vadd.f32 %v1986_v55, %v9871_v22  ;;  %v2000_v0 = vadd.f32 %v1984_v41, %v1964_v57  ;;  %v9934_v56 = vld [vmem:[#allocation2 + $0x30] sm:$0xff]  ;;  %v9119_v4 = vld [vmem:[#allocation2 + $0x2c] ss:$12 sps:$4 sm:$0xff]   ;;  %v1982_v45 = vadd.f32 %v1966_v47, %v9860_v3  ;;  %v2001_v52 = vadd.f32 %v1985_v12, %v1965_v13  ;;  %v1431_v41 = vpop.trf.xlu1  ;;  %v9130_v12 = vld [vmem:[%s12783_s9 + $0x60] sm:$0xff]  }
 0x1f1   : > { %v1999_v63 = vadd.f32 %v1987_v15, %v9874_v21  ;;  %v2121_v6 = vcombine.low %v1996_v46, %v1997_v59  ;;  %v1983_v14 = vadd.f32 %v1967_v54, %v9862_v7  ;;  %v9116_v22 = vld [vmem:[%s12783_s9 + $0x8] sm:$0xff]   ;;  %v2138_v53 = vcombine.low %v1980_v37, %v1981_v60  ;;  %v9121_v21 = vld [vmem:[%s12783_s9 + $0x50] sm:$0xff]   ;;  %8826 = vmatmul.mubr.bf16.vlgmr.msra.gmra.mrb[52].mxu1 %v9119_v4 }
 0x1f2   : > { %v2002_v28 = vadd.f32 %v1986_v55, %v1966_v47  ;;  %v2003_v23 = vadd.f32 %v1987_v15, %v1967_v54  ;;  %v9123_v3 = vld [vmem:[%s12783_s9 + $0x88] sm:$0xff]   ;;  %v8184_v62 = vcombine.high %v9942_v35, %v9934_v56  ;;  %v2155_v19 = vcombine.low %v2000_v0, %v2001_v52  ;;  %8834 = vmatpush3.bf16.msra.mxu1 %v9741_v2  ;;  %v9131_v54 = vld [vmem:[%s12783_s9 + $0x20] sm:$0xff]  }
 0x1f3   : > { %v2122_v7 = vcombine.low %v1998_v58, %v1999_v63  ;;  %v2129_v1 = vrot.slane %v2121_v6, %v9758_v30  ;;  %v2139_v38 = vcombine.low %v1982_v45, %v1983_v14  ;;  %v2146_v16 = vrot.slane %v2138_v53, %v9758_v30  ;;  %8634 = vmatpush3.bf16.msra.mxu0 %v9116_v22  ;;  %v9135_v58 = vld [vmem:[%s12783_s9 + $0xa0] sm:$0xff]   ;;  %v9133_v63 = vld [vmem:[%s12783_s9 + $0x68] sm:$0xff]  }
 0x1f4   : > { %v2156_v26 = vcombine.low %v2002_v28, %v2003_v23  ;;  %v8183_v31 = vcombine.low %v9942_v35, %v9934_v56  ;;  %2676 = vmatprep.mubr.bf16.mxu0 %v8184_v62  ;;  %v2163_v40 = vrot.slane %v2155_v19, %v9758_v30  ;;  %8635 = vmatprep.subr.bf16.mxu0 %v9121_v21  ;;  %v9134_v53 = vld [vmem:[%s12783_s9 + $0x28] sm:$0xff]   ;;  %v9139_v28 = vld [vmem:[%s12783_s9 + $0x70] sm:$0xff]  }
 0x1f5   : > { %v2136_v29 = vrot.slane %v2122_v7, %v9758_v30  ;;  %v2153_v24 = vrot.slane %v2139_v38, %v9758_v30  ;;  %8835 = vmatprep.subr.bf16.mxu1 %v9123_v3  ;;  %v9142_v52 = vld [vmem:[%s12783_s9 + $0xa8] sm:$0xff]   ;;  %v9141_v23 = vld [vmem:[%s12783_s9 + $0x30] sm:$0xff]   ;;  %v10007_v21 = vld [vmem:[#allocation2 + $0x3c] sm:$0xff] }
 0x1f6   : > { %v2170_v2 = vrot.slane %v2156_v26, %v9758_v30  ;;  %2677 = vmatmul.mubr.bf16.gmra.mrb[20].mxu0 %v8183_v31  ;;  %8836 = vmatpush3.bf16.msra.mxu1 %v9123_v3  ;;  %v9143_v3 = vld [vmem:[%s12783_s9 + $0x78] sm:$0xff]   ;;  %v9145_v62 = vld [vmem:[%s12783_s9 + $0xb0] sm:$0xff]   ;;  %v9146_v31 = vld [vmem:[%s12783_s9 + $0x1c0] sm:$0xff]  }
 0x1f7   : > { %v2137_v61 = vcombine.low %v2129_v1, %v2136_v29  ;;  %v2154_v17 = vcombine.low %v2146_v16, %v2153_v24  ;;  %8636 = vmatpush3.bf16.msra.mxu0 %v9122_v33  ;;  %8837 = vmatprep.subr.bf16.mxu1 %v9126_v32  ;;  %v9144_v38 = vld [vmem:[%s12783_s9 + $0x38] sm:$0xff]  }
 0x1f8   : > { %v2171_v9 = vcombine.low %v2163_v40, %v2170_v2  ;;  %8637 = vmatprep.subr.bf16.mxu0 %v9124_v27  ;;  %v9149_v40 = vld [vmem:[%s12783_s9 + $0xb8] sm:$0xff]   ;;  %v9153_v27 = vld [vmem:[%s12783_s9 + $0x200] sm:$0xff]  }
 0x1f9   : > { %v2185_v34 = vadd.f32 %v2137_v61, %v9913_v42  ;;  %v2186_v18 = vadd.f32 %v2154_v17, %v1430_v10  ;;  %v10041_v61 = vld [vmem:[#allocation2] sm:$0xff] }
 0x1fa   : > { %v2187_v44 = vadd.f32 %v2171_v9, %v1431_v41  ;;  %8838 = vmatpush3.bf16.msra.mxu1 %v9126_v32  ;;  %v9140_v32 = vld [vmem:[#allocation2 + $0x8] ss:$12 sps:$4 sm:$0xff]   ;;  %v8217_v17 = vcombine.high %v10041_v61, %v9909_v5  ;;  %v9152_v41 = vld [vmem:[#allocation2 + $0x20] ss:$12 sps:$4 sm:$0xff]  }
 0x1fb   : > { %v2206_v46 = vrot.slane %v2185_v34, 7  ;;  %v2230_v48 = vrot.slane %v2185_v34, 1  ;;  %v2272_v42 = vpack.c.bf16 %v2185_v34, %v2185_v34  ;;  %v2207_v49 = vrot.slane %v2186_v18, 7  ;;  %8638 = vmatpush3.bf16.msra.mxu0 %v9125_v43  ;;  %8839 = vmatprep.subr.bf16.mxu1 %v9132_v36  ;;  %v9159_v9 = vld [vmem:[%s12783_s9 + $0x208] sm:$0xff]   ;;  %v9154_v34 = vld [vmem:[#allocation2 + $0x38] ss:$12 sps:$4 sm:$0xff]  }
 0x1fc   : > { %v2231_v50 = vrot.slane %v2186_v18, 1  ;;  %v2273_v55 = vpack.c.bf16 %v2186_v18, %v2186_v18  ;;  %v2208_v57 = vrot.slane %v2187_v44, 7  ;;  %v2232_v13 = vrot.slane %v2187_v44, 1  ;;  %8639 = vmatprep.subr.bf16.mxu0 %v9130_v12 }
 0x1fd   : > { %v2222_v20 = vsel %vm1590_vm2, 0.0, %v2206_v46  ;;  %v2247_v15 = vsel %vm2241_vm4, %v2230_v48, 0.0  ;;  %2280 = vst [vmem:[#allocation2 + $0x4c] sm:$0xf] %v2272_v42  ;;  %v2223_v59 = vsel %vm1590_vm2, 0.0, %v2207_v49  ;;  %v2274_v47 = vpack.c.bf16 %v2187_v44, %v2187_v44  ;;  %v9163_v46 = vld [vmem:[%s12783_s9 + $0x210] sm:$0xff]  }
 0x1fe   : > { %v2255_v37 = vpack.c.bf16 %v2222_v20, %v2222_v20  ;;  %v2288_v60 = vpack.c.bf16 %v2247_v15, %v2247_v15  ;;  %v2248_v0 = vsel %vm2241_vm4, %v2231_v50, 0.0  ;;  %v2256_v4 = vpack.c.bf16 %v2223_v59, %v2223_v59  ;;  %2281 = vst [vmem:[#allocation2 + $0x58] sm:$0xf] %v2273_v55  ;;  %8840 = vmatpush3.bf16.msra.mxu1 %v9132_v36  ;;  %v9148_v48 = vld [vmem:[%s12783_s9 + $0x180] sm:$0xff]   ;;  %v9169_v55 = vld [vmem:[%s12783_s9 + $0x218] sm:$0xff]   ;;  %v9158_v15 = vld [vmem:[%s12783_s9 + $0x190] sm:$0xff]  }
 0x1ff   : > { %v2289_v6 = vpack.c.bf16 %v2248_v0, %v2248_v0  ;;  %v2224_v45 = vsel %vm1590_vm2, 0.0, %v2208_v57  ;;  %v2249_v14 = vsel %vm2241_vm4, %v2232_v13, 0.0  ;;  %2282 = vst [vmem:[#allocation2 + $0x64] sm:$0xf] %v2274_v47  ;;  %8640 = vmatpush3.bf16.msra.mxu0 %v9131_v54  ;;  %8841 = vmatprep.subr.bf16.mxu1 %v9135_v58  ;;  %v8216_v42 = vcombine.low %v10041_v61, %v9909_v5  ;;  %v9151_v5 = vld [vmem:[%s12783_s9 + $0x188] sm:$0xff]   ;;  %v9156_v13 = vld [vmem:[%s12783_s9 + $0x1d0] sm:$0xff]  }
 0x200   : > { %2264 = vst [vmem:[#allocation2 + $0x48] sm:$0xf] %v2255_v37  ;;  %2296 = vst [vmem:[#allocation2 + $0x50] sm:$0xf] %v2288_v60  ;;  %v2257_v10 = vpack.c.bf16 %v2224_v45, %v2224_v45  ;;  %v2290_v22 = vpack.c.bf16 %v2249_v14, %v2249_v14  ;;  %8641 = vmatprep.subr.bf16.mxu0 %v9133_v63  ;;  %v8220_v49 = vcombine.high %v9904_v39, %v9942_v35  ;;  %v9164_v57 = vld [vmem:[#allocation2 + $0x20] ss:$12 sps:$4 sm:$0xff]  }
 0x201   : > { %2265 = vst [vmem:[#allocation2 + $0x54] sm:$0xf] %v2256_v4  ;;  %2297 = vst [vmem:[#allocation2 + $0x5c] sm:$0xf] %v2289_v6  ;;  %v9172_v20 = vld [vmem:[%s12783_s9 + $0x220] sm:$0xff]   ;;  %v8219_v59 = vcombine.low %v9904_v39, %v9942_v35  ;;  %v9160_v47 = vld [vmem:[%s12783_s9 + $0x1d8] sm:$0xff]   ;;  %v8223_v54 = vcombine.high %v9934_v56, %v10007_v21  ;;  %v8222_v0 = vcombine.low %v9934_v56, %v10007_v21 }
 0x202   : > { %2266 = vst [vmem:[#allocation2 + $0x60] sm:$0xf] %v2257_v10  ;;  %2298 = vst [vmem:[#allocation2 + $0x68] sm:$0xf] %v2290_v22  ;;  %8842 = vmatpush3.bf16.msra.mxu1 %v9135_v58  ;;  %v9176_v58 = vld [vmem:[%s12783_s9 + $0x228] sm:$0xff]   ;;  %v9161_v39 = vld [vmem:[%s12783_s9 + $0x198] sm:$0xff]  }
 0x203   : > { %8642 = vmatpush3.bf16.msra.mxu0 %v9134_v53  ;;  %8843 = vmatprep.subr.bf16.mxu1 %v9142_v52  ;;  %v9166_v35 = vld [vmem:[%s12783_s9 + $0x1e0] sm:$0xff]   ;;  %v9179_v37 = vld [vmem:[%s12783_s9 + $0x230] sm:$0xff]   ;;  %v9170_v4 = vld [vmem:[%s12783_s9 + $0x1e8] sm:$0xff]  }
 0x204   : > { %8643 = vmatprep.subr.bf16.mxu0 %v9139_v28  ;;  %v9168_v60 = vld [vmem:[%s12783_s9 + $0x1a0] sm:$0xff]   ;;  %v9180_v6 = vld [vmem:[%s12783_s9 + $0x238] sm:$0xff]   ;;  %v9171_v56 = vld [vmem:[%s12783_s9 + $0x1a8] sm:$0xff]  }
 0x205   : > { %v9174_v45 = vld [vmem:[%s12783_s9 + $0x1f0] sm:$0xff]   ;;  %v9177_v22 = vld [vmem:[%s12783_s9 + $0x1f8] sm:$0xff]  }
 0x206   : > { %8844 = vmatpush3.bf16.msra.mxu1 %v9142_v52  ;;  %v9175_v14 = vld [vmem:[%s12783_s9 + $0x1b0] sm:$0xff]   ;;  %v9181_v53 = vld [vmem:[#allocation2 + $0x38] ss:$12 sps:$4 sm:$0xff]  }
 0x207   : > { %v10012_v7 = vld [vmem:[#allocation2 + $0x48] sm:$0xff]  ;;  %v9128_v1 = vld [vmem:[#allocation2 + $0x44] ss:$12 sps:$4 sm:$0xff]   ;;  %8644 = vmatpush3.bf16.msra.mxu0 %v9141_v23  ;;  %8845 = vmatprep.subr.bf16.mxu1 %v9145_v62  ;;  %v9178_v52 = vld [vmem:[%s12783_s9 + $0x1b8] sm:$0xff]  }
 0x208   : > { %v8187_v16 = vcombine.high %v10007_v21, %v10012_v7  ;;  %v8186_v19 = vcombine.low %v10007_v21, %v10012_v7  ;;  %v10024_v26 = vld [vmem:[#allocation2 + $0x54] sm:$0xff]  ;;  %8829 = vmatprep.mubr.bf16.mxu1 %v9128_v1  ;;  %8645 = vmatprep.subr.bf16.mxu0 %v9143_v3  ;;  %v9162_v50 = vld [vmem:[#allocation2 + $0x50] ss:$12 sps:$4 sm:$0xff]  }
 0x209   : > { %v10029_v33 = vld [vmem:[#allocation2 + $0x60] sm:$0xff]  ;;  %v9137_v29 = vld [vmem:[#allocation2 + $0x5c] ss:$12 sps:$4 sm:$0xff]   ;;  %v8226_v63 = vcombine.high %v10012_v7, %v10024_v26  ;;  %v8225_v10 = vcombine.low %v10012_v7, %v10024_v26 }
 0x20a   : > { %2684 = vmatprep.mubr.bf16.mxu0 %v8187_v16  ;;  %v8190_v24 = vcombine.high %v10024_v26, %v10029_v33  ;;  %8830 = vmatmul.mubr.bf16.gmra.mrb[56].mxu1 %v9137_v29  ;;  %v8189_v2 = vcombine.low %v10024_v26, %v10029_v33  ;;  %v9182_v28 = vld [vmem:[#allocation2 + $0x50] ss:$12 sps:$4 sm:$0xff]   ;;  %v9183_v23 = vld [vmem:[#allocation2 + $0x68] ss:$12 sps:$4 sm:$0xff]   ;;  %v8310_v21 = vcombine.high %v10029_v33, %v10041_v61 }
 0x20b   : > { %2685 = vmatmul.mubr.bf16.gmra.mrb[24].mxu0 %v8186_v19  ;;  %8849 = vmatprep.mubr.bf16.mxu1 %v9140_v32  ;;  %v8309_v3 = vcombine.low %v10029_v33, %v10041_v61 }
 0x20c   : > { %2692 = vmatprep.mubr.bf16.mxu0 %v8190_v24  ;;  %8646 = vmatpush3.bf16.msra.mxu0 %v9144_v38 }
 0x20d   : > { %8846 = vmatpush3.bf16.msra.mxu1 %v9145_v62  ;;  %8683 = vmatprep.subr.bf16.mxu0 %v9146_v31 }
 0x20e   : > { %8847 = vmatprep.subr.bf16.mxu1 %v9149_v40 }
 0x211   : > { %8848 = vmatpush3.bf16.msra.mxu1 %v9149_v40 }
 0x212   : > { %8857 = vmatprep.subr.bf16.mxu1 %v9153_v27 }
 0x213   : > { %2693 = vmatmul.mubr.bf16.gmra.mrb[28].mxu0 %v8189_v2  ;;  %v1463_v18 = vpop.permute.xlu0 %1462 }
 0x214   : > { %3006 = vmatprep.mubr.bf16.mxu0 %v8217_v17  ;;  %8850 = vmatmul.mubr.bf16.vlgmr.msra.gmra.mrb[52].mxu1 %v9152_v41  ;;  %v1504_v43 = vadd.f32 %v9748_v8, %v1463_v18  ;;  %v1506_v36 = vadd.f32 %v9750_v11, %v1463_v18  ;;  %v9150_v8 = vld [vmem:[%s12783_s9 + $0x1c8] sm:$0xff]  }
 0x215   : > { %8853 = vmatprep.mubr.bf16.mxu1 %v9154_v34  ;;  %8858 = vmatpush3.bf16.msra.mxu1 %v9153_v27 }
 0x216   : > { %8859 = vmatprep.subr.bf16.mxu1 %v9159_v9  ;;  %v1510_v44 = vmax.f32 %v1504_v43, 0.0  ;;  %v1511_v12 = vmax.f32 %v1506_v36, 0.0 }
 0x218   : > { %v8964_v11 = vpack.i.bf16 %v1511_v12, %v1510_v44 }
 0x219   : > { %8860 = vmatpush3.bf16.msra.mxu1 %v9159_v9 }
 0x21a   : > { %8861 = vmatprep.subr.bf16.mxu1 %v9163_v46  ;;  %8965 = vxpose.xlu1.b32.start.end [1/1] (short) %v8964_v11, 128 }
 0x21b   : > { %3007 = vmatmul.mubr.bf16.vlgmr.msra.gmra.mrb[32].mxu0 %v8216_v42 }
 0x21c   : > { %3014 = vmatprep.mubr.bf16.mxu0 %v8220_v49  ;;  %8684 = vmatpush3.bf16.msra.mxu0 %v9148_v48 }
 0x21d   : > { %8685 = vmatprep.subr.bf16.mxu0 %v9150_v8  ;;  %8854 = vmatmul.mubr.bf16.gmra.mrb[56].mxu1 %v9162_v50 }
 0x21e   : > { %8862 = vmatpush3.bf16.msra.mxu1 %v9163_v46  ;;  %8873 = vmatprep.mubr.bf16.mxu1 %v9164_v57 }
 0x21f   : > { %8863 = vmatprep.subr.bf16.mxu1 %v9169_v55 }
 0x220   : > { %8686 = vmatpush3.bf16.msra.mxu0 %v9151_v5 }
 0x221   : > { %8687 = vmatprep.subr.bf16.mxu0 %v9156_v13 }
 0x222   : > { %8864 = vmatpush3.bf16.msra.mxu1 %v9169_v55 }
 0x223   : > { %3015 = vmatmul.mubr.bf16.gmra.mrb[36].mxu0 %v8219_v59  ;;  %8865 = vmatprep.subr.bf16.mxu1 %v9172_v20 }
 0x224   : > { %3022 = vmatprep.mubr.bf16.mxu0 %v8223_v54  ;;  %8688 = vmatpush3.bf16.msra.mxu0 %v9158_v15 }
 0x225   : > { %8689 = vmatprep.subr.bf16.mxu0 %v9160_v47 }
 0x226   : > { %8866 = vmatpush3.bf16.msra.mxu1 %v9172_v20 }
 0x227   : > { %8867 = vmatprep.subr.bf16.mxu1 %v9176_v58 }
 0x228   : > { %8690 = vmatpush3.bf16.msra.mxu0 %v9161_v39 }
 0x229   : > { %8691 = vmatprep.subr.bf16.mxu0 %v9166_v35 }
 0x22a   : > { %8868 = vmatpush3.bf16.msra.mxu1 %v9176_v58 }
 0x22b   : > { %3023 = vmatmul.mubr.bf16.gmra.mrb[40].mxu0 %v8222_v0  ;;  %8869 = vmatprep.subr.bf16.mxu1 %v9179_v37 }
 0x22c   : > { %3030 = vmatprep.mubr.bf16.mxu0 %v8226_v63  ;;  %8692 = vmatpush3.bf16.msra.mxu0 %v9168_v60 }
 0x22d   : > { %8693 = vmatprep.subr.bf16.mxu0 %v9170_v4 }
 0x22e   : > { %8870 = vmatpush3.bf16.msra.mxu1 %v9179_v37 }
 0x22f   : > { %8871 = vmatprep.subr.bf16.mxu1 %v9180_v6 }
 0x230   : > { %8694 = vmatpush3.bf16.msra.mxu0 %v9171_v56 }
 0x231   : > { %8695 = vmatprep.subr.bf16.mxu0 %v9174_v45 }
 0x232   : > { %8872 = vmatpush3.bf16.msra.mxu1 %v9180_v6 }
 0x233   : > { %3031 = vmatmul.mubr.bf16.gmra.mrb[44].mxu0 %v8225_v10  ;;  %7263 = vmatprep.subr.bf16.mxu1 %v10041_v61 }
 0x234   : > { %8696 = vmatpush3.bf16.msra.mxu0 %v9175_v14  ;;  %3410 = vmatprep.mubr.bf16.mxu0 %v8220_v49 }
 0x235   : > { %8697 = vmatprep.subr.bf16.mxu0 %v9177_v22  ;;  %8874 = vmatmul.mubr.bf16.vlgmr.msra.gmra.mrb[52].mxu1 %v9181_v53 }
 0x236   : > { %8877 = vmatprep.mubr.bf16.mxu1 %v9182_v28 }
 0x238   : > { %8698 = vmatpush3.bf16.msra.mxu0 %v9178_v52 }
 0x239   : > { %6970 = vmatprep.subr.bf16.mxu0 %v10041_v61 }
 0x23b   : > { %3411 = vmatmul.mubr.bf16.vlgmr.msra.gmra.mrb[48].mxu0 %v8219_v59 }
 0x23c   : > { %3418 = vmatprep.mubr.bf16.mxu0 %v8223_v54 }
 0x23d   : > { %8878 = vmatmul.mubr.bf16.gmra.mrb[56].mxu1 %v9183_v23 }
 0x243   : > { %3419 = vmatmul.mubr.bf16.gmra.mrb[52].mxu0 %v8222_v0 }
 0x244   : > { %3426 = vmatprep.mubr.bf16.mxu0 %v8226_v63 }
 0x24b   : > { %3427 = vmatmul.mubr.bf16.gmra.mrb[56].mxu0 %v8225_v10 }
 0x24c   : > { %3434 = vmatprep.mubr.bf16.mxu0 %v8310_v21 }
 0x253   : > { %3435 = vmatmul.mubr.bf16.gmra.mrb[60].mxu0 %v8309_v3 }
 0x29a   : > { %v10133_v7 = vpop.trf.xlu1 }
 0x29b   : > { %v8967_v1 = vunpack.i.l.bf16 %v10133_v7 }
 0x29d   : > { %v6235_v62 = vrot.slane %v8967_v1, 7  ;;  %v6331_v24 = vrot.slane %v8967_v1, 1 }
 0x29e   : > { %v10136_v38 = vpop.trf.xlu1 }
 0x29f   : > { %v8972_v16 = vunpack.i.l.bf16 %v10136_v38  ;;  %v6315_v29 = vsel %vm1590_vm2, 0.0, %v6235_v62 }
 0x2a1   : > { %v6236_v19 = vrot.slane %v8972_v16, 7  ;;  %v6524_v26 = vpack.c.bf16 %v8972_v16, %v8967_v1  ;;  %v6332_v32 = vrot.slane %v8972_v16, 1 }
 0x2a2   : > { %v10139_v31 = vpop.trf.xlu1 }
 0x2a3   : > { %v8977_v33 = vunpack.i.l.bf16 %v10139_v31  ;;  %6556 = vrot.lane.b32.xlu0 %v6524_v26, %s9242_s30  ;;  %v6237_v40 = vsel %vm1590_vm2, %v6235_v62, %v6236_v19  ;;  %v6333_v17 = vsel %vm2241_vm4, %v6331_v24, %v6332_v32  ;;  %v6411_v41 = vsel %vm2241_vm4, %v6332_v32, 0.0 }
 0x2a4   : > { %v6427_v2 = vpack.c.bf16 %v6237_v40, %v6315_v29  ;;  %v6621_v18 = vpack.c.bf16 %v6411_v41, %v6333_v17 }
 0x2a5   : > { %v6238_v34 = vrot.slane %v8977_v33, 7  ;;  %v6334_v12 = vrot.slane %v8977_v33, 1 }
 0x2a6   : > { %v10145_v27 = vpop.trf.xlu1  ;;  %6459 = vrot.lane.b32.xlu1 %v6427_v2, %s9243_s23 }
 0x2a7   : > { %v8982_v9 = vunpack.i.l.bf16 %v10145_v27  ;;  %6653 = vrot.lane.b32.xlu0 %v6621_v18, %s9244_s16  ;;  %v6316_v48 = vsel %vm1590_vm2, 0.0, %v6238_v34 }
 0x2a9   : > { %v6239_v43 = vrot.slane %v8982_v9, 7  ;;  %v6525_v44 = vpack.c.bf16 %v8982_v9, %v8977_v33  ;;  %v6335_v46 = vrot.slane %v8982_v9, 1 }
 0x2aa   : > { %v10151_v36 = vpop.trf.xlu1 }
 0x2ab   : > { %v6240_v42 = vsel %vm1590_vm2, %v6238_v34, %v6239_v43  ;;  %v8987_v8 = vunpack.i.l.bf16 %v10151_v36  ;;  %6558 = vrot.lane.b32.xlu0 %v6525_v44, %s9242_s30  ;;  %v6336_v50 = vsel %vm2241_vm4, %v6334_v12, %v6335_v46  ;;  %v6412_v5 = vsel %vm2241_vm4, %v6335_v46, 0.0 }
 0x2ac   : > { %v6428_v49 = vpack.c.bf16 %v6240_v42, %v6316_v48  ;;  %v6622_v13 = vpack.c.bf16 %v6412_v5, %v6336_v50 }
 0x2ad   : > { %v6241_v20 = vrot.slane %v8987_v8, 7  ;;  %v6337_v60 = vrot.slane %v8987_v8, 1 }
 0x2ae   : > { %v10157_v11 = vpop.trf.xlu1 }
 0x2af   : > { %v8992_v55 = vunpack.i.l.bf16 %v10157_v11  ;;  %6461 = vrot.lane.b32.xlu0 %v6428_v49, %s9243_s23  ;;  %v6317_v58 = vsel %vm1590_vm2, 0.0, %v6241_v20 }
 0x2b1   : > { %v6242_v15 = vrot.slane %v8992_v55, 7  ;;  %v6526_v47 = vpack.c.bf16 %v8992_v55, %v8987_v8  ;;  %v6338_v63 = vrot.slane %v8992_v55, 1 }
 0x2b2   : > { %v10163_v57 = vpop.trf.xlu1 }
 0x2b3   : > { %6655 = vrot.lane.b32.xlu0 %v6622_v13, %s9244_s16  ;;  %v6243_v54 = vsel %vm1590_vm2, %v6241_v20, %v6242_v15  ;;  %v6339_v22 = vsel %vm2241_vm4, %v6337_v60, %v6338_v63  ;;  %v6413_v53 = vsel %vm2241_vm4, %v6338_v63, 0.0  ;;  %v10200_v26 = vunpack.i.l.bf16 %v10163_v57 }
 0x2b4   : > { %v6429_v35 = vpack.c.bf16 %v6243_v54, %v6317_v58  ;;  %v6623_v23 = vpack.c.bf16 %v6413_v53, %v6339_v22 }
 0x2b5   : > { %v6244_v48 = vrot.slane %v10200_v26, 7 }
 0x2b6   : > { %v10166_v59 = vpop.trf.xlu1 }
 0x2b7   : > { %6560 = vrot.lane.b32.xlu0 %v6526_v47, %s9242_s30  ;;  %v10210_v2 = vunpack.i.l.bf16 %v10166_v59  ;;  %v6318_v15 = vsel %vm1590_vm2, 0.0, %v6244_v48 }
 0x2b9   : > { %v6245_v55 = vrot.slane %v10210_v2, 7 }
 0x2ba   : > { %v10171_v39 = vpop.trf.xlu1 }
 0x2bb   : > { %v10175_v37 = vunpack.i.l.bf16 %v10171_v39  ;;  %6463 = vrot.lane.b32.xlu0 %v6429_v35, %s9243_s23  ;;  %v6246_v35 = vsel %vm1590_vm2, %v6244_v48, %v6245_v55 }
 0x2bd   : > { %12888 = vst [vmem:[#allocation4_spill] sm:$0xff] %v10175_v37  ;;  %v6343_v10 = vrot.slane %v10175_v37, 1 }
 0x2be   : > { %v10177_v4 = vpop.trf.xlu1 }
 0x2bf   : > { %v8595_v0 = vpop.f32.mrb[16].mxu0  ;;  %v10181_v56 = vunpack.i.l.bf16 %v10177_v4  ;;  %6657 = vrot.lane.b32.xlu0 %v6623_v23, %s9244_s16  ;;  %v10254_v23 = vunpack.i.h.bf16 %v10133_v7 }
 0x2c0   : > { %v8596_v6 = vpop.f32.mrb[17].mxu0 }
 0x2c1   : > { %12889 = vst [vmem:[#allocation5_spill] sm:$0xff] %v10181_v56  ;;  %v10183_v45 = vadd.f32 %v8596_v6, %v8595_v0  ;;  %v8598_v14 = vpop.f32.mrb[18].mxu0  ;;  %v6344_v28 = vrot.slane %v10181_v56, 1  ;;  %12895 = vst [vmem:[#allocation11_spill] sm:$0xff] %v10254_v23 }
 0x2c2   : > { %v8599_v52 = vpop.f32.mrb[19].mxu0  ;;  %v10191_v3 = vpop.trf.xlu1 }
 0x2c3   : > { %v10189_v21 = vadd.f32 %v8599_v52, %v8598_v14  ;;  %v10194_v1 = vunpack.i.l.bf16 %v10191_v3  ;;  %v6345_v62 = vsel %vm2241_vm4, %v6343_v10, %v6344_v28  ;;  %v6415_v16 = vsel %vm2241_vm4, %v6344_v28, 0.0 }
 0x2c4   : > { %v6625_v19 = vpack.c.bf16 %v6415_v16, %v6345_v62  ;;  %v6430_v14 = vpack.c.bf16 %v6246_v35, %v6318_v15 }
 0x2c5   : > { %12890 = vst [vmem:[#allocation6_spill] sm:$0xff] %v10194_v1  ;;  %v6250_v32 = vrot.slane %v10194_v1, 7  ;;  %v6346_v9 = vrot.slane %v10194_v1, 1 }
 0x2c6   : > { %v10202_v24 = vpop.trf.xlu1  ;;  %6661 = vrot.lane.b32.xlu1 %v6625_v19, %s9244_s16  ;;  %6465 = vrot.lane.b32.xlu0 %v6430_v14, %s9243_s23 }
 0x2c7   : > { %v10206_v40 = vunpack.i.l.bf16 %v10202_v24  ;;  %v6320_v46 = vsel %vm1590_vm2, 0.0, %v6250_v32 }
 0x2c9   : > { %v8601_v29 = vpop.f32.mrb[20].mxu0  ;;  %12891 = vst [vmem:[#allocation7_spill] sm:$0xff] %v10206_v40  ;;  %v6251_v18 = vrot.slane %v10206_v40, 7  ;;  %v6347_v43 = vrot.slane %v10206_v40, 1 }
 0x2ca   : > { %v8602_v33 = vpop.f32.mrb[21].mxu0  ;;  %v10219_v12 = vpop.trf.xlu1 }
 0x2cb   : > { %v10212_v17 = vadd.f32 %v8602_v33, %v8601_v29  ;;  %v8604_v41 = vpop.f32.mrb[22].mxu0  ;;  %v10224_v42 = vunpack.i.l.bf16 %v10219_v12  ;;  %v6252_v8 = vsel %vm1590_vm2, %v6250_v32, %v6251_v18  ;;  %v6348_v49 = vsel %vm2241_vm4, %v6346_v9, %v6347_v43 }
 0x2cc   : > { %v8605_v34 = vpop.f32.mrb[23].mxu0  ;;  %v6416_v50 = vsel %vm2241_vm4, %v6347_v43, 0.0  ;;  %v6432_v5 = vpack.c.bf16 %v6252_v8, %v6320_v46  ;;  %v10264_v32 = vunpack.i.h.bf16 %v10136_v38  ;;  %v6259_v38 = vrot.slane %v10254_v23, 7 }
 0x2cd   : > { %v10217_v44 = vadd.f32 %v8605_v34, %v8604_v41  ;;  %12892 = vst [vmem:[#allocation8_spill] sm:$0xff] %v10224_v42  ;;  %v6253_v20 = vrot.slane %v10224_v42, 7  ;;  %v6626_v54 = vpack.c.bf16 %v6416_v50, %v6348_v49  ;;  %v6349_v58 = vrot.slane %v10224_v42, 1 }
 0x2ce   : > { %v10230_v13 = vpop.trf.xlu1  ;;  %6469 = vrot.lane.b32.xlu1 %v6432_v5, %s9243_s23  ;;  %12897 = vst [vmem:[#allocation13_spill] sm:$0xff] %v10264_v32  ;;  %v6260_v5 = vrot.slane %v10264_v32, 7  ;;  %v6323_v35 = vsel %vm1590_vm2, 0.0, %v6259_v38 }
 0x2cf   : > { %v10235_v47 = vunpack.i.l.bf16 %v10230_v13  ;;  %v6321_v6 = vsel %vm1590_vm2, 0.0, %v6253_v20 }
 0x2d0   : > { %v6261_v14 = vsel %vm1590_vm2, %v6259_v38, %v6260_v5 }
 0x2d1   : > { %12893 = vst [vmem:[#allocation9_spill] sm:$0xff] %v10235_v47  ;;  %v6254_v60 = vrot.slane %v10235_v47, 7  ;;  %v6350_v0 = vrot.slane %v10235_v47, 1 }
 0x2d2   : > { %v10242_v63 = vpop.trf.xlu1  ;;  %6663 = vrot.lane.b32.xlu1 %v6626_v54, %s9244_s16  ;;  %v6355_v54 = vrot.slane %v10254_v23, 1 }
 0x2d3   : > { %v10246_v10 = vunpack.i.l.bf16 %v10242_v63  ;;  %v6255_v22 = vsel %vm1590_vm2, %v6253_v20, %v6254_v60  ;;  %v6351_v53 = vsel %vm2241_vm4, %v6349_v58, %v6350_v0  ;;  %v6417_v52 = vsel %vm2241_vm4, %v6350_v0, 0.0 }
 0x2d4   : > { %v6433_v28 = vpack.c.bf16 %v6255_v22, %v6321_v6  ;;  %v6627_v29 = vpack.c.bf16 %v6417_v52, %v6351_v53  ;;  %v6356_v60 = vrot.slane %v10264_v32, 1  ;;  %v10287_v0 = vunpack.i.h.bf16 %v10139_v31 }
 0x2d5   : > { %12894 = vst [vmem:[#allocation10_spill] sm:$0xff] %v10246_v10  ;;  %v6256_v16 = vrot.slane %v10246_v10, 7  ;;  %v6352_v33 = vrot.slane %v10246_v10, 1  ;;  %v10290_v6 = vunpack.i.h.bf16 %v10145_v27 }
 0x2d6   : > { %v10256_v62 = vpop.trf.xlu1  ;;  %6471 = vrot.lane.b32.xlu1 %v6433_v28, %s9243_s23  ;;  %12898 = vst [vmem:[#allocation14_spill] sm:$0xff] %v10287_v0  ;;  %v6357_v31 = vsel %vm2241_vm4, %v6355_v54, %v6356_v60  ;;  %v6419_v27 = vsel %vm2241_vm4, %v6356_v60, 0.0 }
 0x2d7   : > { %v10260_v19 = vunpack.i.l.bf16 %v10256_v62  ;;  %v6322_v7 = vsel %vm1590_vm2, 0.0, %v6256_v16  ;;  %12899 = vst [vmem:[#allocation15_spill] sm:$0xff] %v10290_v6 }
 0x2d9   : > { %12896 = vst [vmem:[#allocation12_spill] sm:$0xff] %v10260_v19  ;;  %v6257_v9 = vrot.slane %v10260_v19, 7  ;;  %v6353_v34 = vrot.slane %v10260_v19, 1 }
 0x2da   : > { %6665 = vrot.lane.b32.xlu1 %v6627_v29, %s9244_s16  ;;  %v6262_v29 = vrot.slane %v10287_v0, 7 }
 0x2db   : > { %v6258_v48 = vsel %vm1590_vm2, %v6256_v16, %v6257_v9  ;;  %v6354_v50 = vsel %vm2241_vm4, %v6352_v33, %v6353_v34  ;;  %v6418_v55 = vsel %vm2241_vm4, %v6353_v34, 0.0  ;;  %v6435_v16 = vpack.c.bf16 %v6261_v14, %v6323_v35 }
 0x2dc   : > { %v6434_v49 = vpack.c.bf16 %v6258_v48, %v6322_v7  ;;  %v6628_v58 = vpack.c.bf16 %v6418_v55, %v6354_v50  ;;  %v6263_v33 = vrot.slane %v10290_v6, 7  ;;  %v6358_v7 = vrot.slane %v10287_v0, 1 }
 0x2dd   : > { %v6359_v34 = vrot.slane %v10290_v6, 1  ;;  %v10309_v48 = vunpack.i.h.bf16 %v10157_v11  ;;  %v6340_v50 = vrot.slane %v10200_v26, 1  ;;  %v6341_v55 = vrot.slane %v10210_v2, 1 }
 0x2de   : > { %v8607_v41 = vpop.f32.mrb[24].mxu0  ;;  %6473 = vrot.lane.b32.xlu1 %v6434_v49, %s9243_s23  ;;  %v6264_v38 = vsel %vm1590_vm2, %v6262_v29, %v6263_v33 }
 0x2df   : > { %v8608_v18 = vpop.f32.mrb[25].mxu0  ;;  %12901 = vst [vmem:[#allocation17_spill] sm:$0xff] %v10309_v48  ;;  %v6360_v54 = vsel %vm2241_vm4, %v6358_v7, %v6359_v34  ;;  %v10318_v11 = vsel %vm2241_vm4, %v6340_v50, %v6341_v55  ;;  %v10321_v60 = vsel %vm2241_vm4, %v6341_v55, 0.0 }
 0x2e0   : > { %v10270_v43 = vadd.f32 %v8608_v18, %v8607_v41  ;;  %v8610_v46 = vpop.f32.mrb[26].mxu0  ;;  %v6629_v18 = vpack.c.bf16 %v6419_v27, %v6357_v31  ;;  %v10333_v31 = vunpack.i.h.bf16 %v10163_v57 }
 0x2e1   : > { %v8611_v8 = vpop.f32.mrb[27].mxu0 }
 0x2e2   : > { %v10278_v20 = vadd.f32 %v8611_v8, %v8610_v46  ;;  %6667 = vrot.lane.b32.xlu1 %v6628_v58, %s9244_s16  ;;  %v10306_v46 = vunpack.i.h.bf16 %v10151_v36  ;;  %v6324_v8 = vsel %vm1590_vm2, 0.0, %v6262_v29  ;;  %12902 = vst [vmem:[#allocation18_spill] sm:$0xff] %v10333_v31  ;;  %v6268_v57 = vrot.slane %v10333_v31, 7 }
 0x2e3   : > { %v6436_v36 = vpack.c.bf16 %v6264_v38, %v6324_v8 }
 0x2e4   : > { %12900 = vst [vmem:[#allocation16_spill] sm:$0xff] %v10306_v46  ;;  %v6265_v14 = vrot.slane %v10306_v46, 7 }
 0x2e6   : > { %v8613_v22 = vpop.f32.mrb[28].mxu0  ;;  %6475 = vrot.lane.b32.xlu1 %v6435_v16, %s9243_s23  ;;  %v6325_v38 = vsel %vm1590_vm2, 0.0, %v6265_v14 }
 0x2e7   : > { %v8614_v53 = vpop.f32.mrb[29].mxu0 }
 0x2e8   : > { %v10293_v52 = vadd.f32 %v8614_v53, %v8613_v22  ;;  %v8616_v28 = vpop.f32.mrb[30].mxu0  ;;  %v6266_v22 = vrot.slane %v10309_v48, 7 }
 0x2e9   : > { %v8617_v41 = vpop.f32.mrb[31].mxu0 }
 0x2ea   : > { %v10300_v9 = vadd.f32 %v8617_v41, %v8616_v28  ;;  %6669 = vrot.lane.b32.xlu1 %v6629_v18, %s9244_s16  ;;  %v6420_v28 = vsel %vm2241_vm4, %v6359_v34, 0.0  ;;  %v6361_v41 = vrot.slane %v10306_v46, 1  ;;  %v6362_v34 = vrot.slane %v10309_v48, 1 }
 0x2eb   : > { %v6630_v7 = vpack.c.bf16 %v6420_v28, %v6360_v54  ;;  %v10341_v18 = vunpack.i.h.bf16 %v10166_v59  ;;  %v6326_v28 = vsel %vm1590_vm2, 0.0, %v6268_v57 }
 0x2ec   : > { %v6421_v59 = vsel %vm2241_vm4, %v6362_v34, 0.0 }
 0x2ed   : > { %12903 = vst [vmem:[#allocation19_spill] sm:$0xff] %v10341_v18 }
 0x2ee   : > { %v8647_v49 = vpop.f32.mrb[32].mxu0  ;;  %6477 = vrot.lane.b32.xlu1 %v6436_v36, %s9243_s23 }
 0x2ef   : > { %v8648_v5 = vpop.f32.mrb[33].mxu0 }
 0x2f0   : > { %v8649_v58 = vadd.f32 %v8648_v5, %v8647_v49  ;;  %v8650_v35 = vpop.f32.mrb[34].mxu0  ;;  %v6269_v5 = vrot.slane %v10341_v18, 7 }
 0x2f1   : > { %v8651_v53 = vpop.f32.mrb[35].mxu0 }
 0x2f2   : > { %v10329_v29 = vadd.f32 %v8649_v58, %v10183_v45  ;;  %v8652_v33 = vadd.f32 %v8651_v53, %v8650_v35  ;;  %v6267_v45 = vsel %vm1590_vm2, %v6265_v14, %v6266_v22  ;;  %6671 = vrot.lane.b32.xlu1 %v6630_v7, %s9244_s16  ;;  %v6363_v58 = vsel %vm2241_vm4, %v6361_v41, %v6362_v34 }
 0x2f3   : > { %v6364_v14 = vrot.slane %v10333_v31, 1  ;;  %v6631_v53 = vpack.c.bf16 %v6421_v59, %v6363_v58  ;;  %v10361_v41 = vunpack.i.h.bf16 %v10171_v39  ;;  %v10364_v7 = vunpack.i.h.bf16 %v10177_v4 }
 0x2f4   : > { %v10336_v27 = vadd.f32 %v8652_v33, %v10189_v21  ;;  %v6437_v21 = vpack.c.bf16 %v6267_v45, %v6325_v38  ;;  %v6365_v33 = vrot.slane %v10341_v18, 1  ;;  %v10378_v58 = vunpack.i.h.bf16 %v10191_v3 }
 0x2f5   : > { %12904 = vst [vmem:[#allocation20_spill] sm:$0xff] %v10361_v41  ;;  %12905 = vst [vmem:[#allocation21_spill] sm:$0xff] %v10364_v7  ;;  %v10381_v59 = vunpack.i.h.bf16 %v10202_v24 }
 0x2f6   : > { %v8653_v8 = vpop.f32.mrb[36].mxu0  ;;  %6479 = vrot.lane.b32.xlu1 %v6437_v21, %s9243_s23  ;;  %v6366_v39 = vsel %vm2241_vm4, %v6364_v14, %v6365_v33  ;;  %v6422_v21 = vsel %vm2241_vm4, %v6365_v33, 0.0  ;;  %12906 = vst [vmem:[#allocation22_spill] sm:$0xff] %v10378_v58  ;;  %v6274_v33 = vrot.slane %v10378_v58, 7 }
 0x2f7   : > { %v8654_v49 = vpop.f32.mrb[37].mxu0  ;;  %12907 = vst [vmem:[#allocation23_spill] sm:$0xff] %v10381_v59  ;;  %v6632_v14 = vpack.c.bf16 %v6422_v21, %v6366_v39  ;;  %v6370_v21 = vrot.slane %v10378_v58, 1 }
 0x2f8   : > { %v8655_v50 = vadd.f32 %v8654_v49, %v8653_v8  ;;  %v8656_v55 = vpop.f32.mrb[38].mxu0  ;;  %v6271_v49 = vrot.slane %v10361_v41, 7 }
 0x2f9   : > { %v8657_v54 = vpop.f32.mrb[39].mxu0 }
 0x2fa   : > { %v10351_v35 = vadd.f32 %v8655_v50, %v10212_v17  ;;  %v8658_v36 = vadd.f32 %v8657_v54, %v8656_v55  ;;  %v6270_v17 = vsel %vm1590_vm2, %v6268_v57, %v6269_v5  ;;  %6673 = vrot.lane.b32.xlu1 %v6631_v53, %s9244_s16  ;;  %v6272_v50 = vrot.slane %v10364_v7, 7 }
 0x2fb   : > { %v6438_v8 = vpack.c.bf16 %v6270_v17, %v6326_v28  ;;  %v6367_v5 = vrot.slane %v10361_v41, 1  ;;  %v6368_v54 = vrot.slane %v10364_v7, 1  ;;  %v6327_v53 = vsel %vm1590_vm2, 0.0, %v6271_v49  ;;  %v9184_v7 = vld [vmem:[%s12785_s11] sm:$0xff]  }
 0x2fc   : > { %v10355_v22 = vadd.f32 %v8658_v36, %v10217_v44  ;;  %7264 = vmatpush1.bf16.msra.mxu1 %v9184_v7 }
 0x2fd   : > { %v6369_v3 = vsel %vm2241_vm4, %v6367_v5, %v6368_v54  ;;  %v10406_v5 = vunpack.i.h.bf16 %v10230_v13  ;;  %7265 = vmatprep.subr.bf16.mxu1 %v10041_v61 }
 0x2fe   : > { %v8659_v34 = vpop.f32.mrb[40].mxu0  ;;  %6481 = vrot.lane.b32.xlu1 %v6438_v8, %s9243_s23 }
 0x2ff   : > { %v8660_v45 = vpop.f32.mrb[41].mxu0  ;;  %12909 = vst [vmem:[#allocation25_spill] sm:$0xff] %v10406_v5 }
 0x300   : > { %v8661_v38 = vadd.f32 %v8660_v45, %v8659_v34  ;;  %v8662_v44 = vpop.f32.mrb[42].mxu0  ;;  %v6275_v34 = vrot.slane %v10381_v59, 7 }
 0x301   : > { %v8663_v55 = vpop.f32.mrb[43].mxu0 }
 0x302   : > { %v10373_v4 = vadd.f32 %v8661_v38, %v10270_v43  ;;  %v8664_v57 = vadd.f32 %v8663_v55, %v8662_v44  ;;  %v6273_v43 = vsel %vm1590_vm2, %v6271_v49, %v6272_v50  ;;  %6675 = vrot.lane.b32.xlu1 %v6632_v14, %s9244_s16  ;;  %v6423_v44 = vsel %vm2241_vm4, %v6368_v54, 0.0 }
 0x303   : > { %v6371_v54 = vrot.slane %v10381_v59, 1 }
 0x304   : > { %v10384_v36 = vadd.f32 %v8664_v57, %v10278_v20  ;;  %v6439_v20 = vpack.c.bf16 %v6273_v43, %v6327_v53  ;;  %v10403_v57 = vunpack.i.h.bf16 %v10219_v12  ;;  %v6633_v43 = vpack.c.bf16 %v6423_v44, %v6369_v3 }
 0x305   : > { %v10419_v12 = vunpack.i.h.bf16 %v10256_v62  ;;  %v6424_v62 = vsel %vm2241_vm4, %v6371_v54, 0.0 }
 0x306   : > { %v8665_v28 = vpop.f32.mrb[44].mxu0  ;;  %12908 = vst [vmem:[#allocation24_spill] sm:$0xff] %v10403_v57  ;;  %6483 = vrot.lane.b32.xlu1 %v6439_v20, %s9243_s23  ;;  %v6277_v3 = vrot.slane %v10403_v57, 7  ;;  %v6374_v20 = vrot.slane %v10406_v5, 1 }
 0x307   : > { %v8666_v17 = vpop.f32.mrb[45].mxu0  ;;  %12911 = vst [vmem:[#allocation27_spill] sm:$0xff] %v10419_v12  ;;  %v6281_v15 = vrot.slane %v10419_v12, 7 }
 0x308   : > { %v8667_v24 = vadd.f32 %v8666_v17, %v8665_v28  ;;  %v8668_v45 = vpop.f32.mrb[46].mxu0  ;;  %v10392_v38 = vpop.f32.mrb[52].mxu1  ;;  %v6328_v28 = vsel %vm1590_vm2, 0.0, %v6274_v33  ;;  %v10416_v17 = vunpack.i.h.bf16 %v10242_v63  ;;  %v6372_v63 = vsel %vm2241_vm4, %v6370_v21, %v6371_v54  ;;  %v10444_v54 = vld [vmem:[%s12784_s10] ss:$0 sm:$0xff] }
 0x309   : > { %v8669_v8 = vpop.f32.mrb[47].mxu0  ;;  %v3477_v50 = vpop.f32.mrb[53].mxu1  ;;  %v6247_v21 = vrot.slane %v10175_v37, 7  ;;  %v10456_v58 = vsel %vm2241_vm4, %v6374_v20, 0.0 }
 0x30a   : > { %v10397_v49 = vadd.f32 %v8667_v24, %v10293_v52  ;;  %v8670_v55 = vadd.f32 %v8669_v8, %v8668_v45  ;;  %v10399_v39 = vpop.f32.mrb[54].mxu1  ;;  %v6276_v52 = vsel %vm1590_vm2, %v6274_v33, %v6275_v34  ;;  %12910 = vst [vmem:[#allocation26_spill] sm:$0xff] %v10416_v17  ;;  %v6373_v24 = vrot.slane %v10403_v57, 1  ;;  %6677 = vrot.lane.b32.xlu1 %v6633_v43, %s9244_s16 }
 0x30b   : > { %v3480_v14 = vpop.f32.mrb[55].mxu1  ;;  %v6440_v44 = vpack.c.bf16 %v6276_v52, %v6328_v28  ;;  %v6376_v16 = vrot.slane %v10416_v17, 1  ;;  %v6377_v52 = vrot.slane %v10419_v12, 1  ;;  %v6248_v43 = vrot.slane %v10181_v56, 7 }
 0x30c   : > { %v10410_v53 = vadd.f32 %v8670_v55, %v10300_v9  ;;  %v6278_v9 = vrot.slane %v10406_v5, 7  ;;  %v6280_v55 = vrot.slane %v10416_v17, 7  ;;  %v6634_v12 = vpack.c.bf16 %v6424_v62, %v6372_v63 }
 0x30d   : > { %v10478_v62 = vsel %vm1590_vm2, 0.0, %v6247_v21 }
 0x30e   : > { %v8699_v13 = vpop.f32.mrb[48].mxu0  ;;  %v6279_v59 = vsel %vm1590_vm2, %v6277_v3, %v6278_v9  ;;  %6485 = vrot.lane.b32.xlu1 %v6440_v44, %s9243_s23  ;;  %v10462_v63 = vsel %vm1590_vm2, %v6280_v55, %v6281_v15 }
 0x30f   : > { %v8700_v45 = vpop.f32.mrb[49].mxu0 }
 0x310   : > { %v8701_v34 = vadd.f32 %v8700_v45, %v8699_v13  ;;  %v8702_v8 = vpop.f32.mrb[50].mxu0  ;;  %v10425_v33 = vpop.f32.mrb[56].mxu1 }
 0x311   : > { %v8703_v28 = vpop.f32.mrb[51].mxu0  ;;  %v10434_v5 = vpop.f32.mrb[57].mxu1 }
 0x312   : > { %v8704_v13 = vadd.f32 %v8703_v28, %v8702_v8  ;;  %v8901_v45 = vadd.f32 %v10329_v29, %v8701_v34  ;;  %v10437_v57 = vpop.f32.mrb[58].mxu1  ;;  %v6329_v8 = vsel %vm1590_vm2, 0.0, %v6277_v3  ;;  %v10453_v34 = vsel %vm2241_vm4, %v6373_v24, %v6374_v20  ;;  %6679 = vrot.lane.b32.xlu1 %v6634_v12, %s9244_s16 }
 0x313   : > { %v10446_v17 = vpop.f32.mrb[59].mxu1  ;;  %v10465_v3 = vsel %vm1590_vm2, 0.0, %v6280_v55  ;;  %v10475_v20 = vsel %vm1590_vm2, %v6247_v21, %v6248_v43  ;;  %v6635_v21 = vpack.c.bf16 %v10456_v58, %v10453_v34 }
 0x314   : > { %v8902_v28 = vadd.f32 %v8901_v45, %v3477_v50  ;;  %v8907_v29 = vadd.f32 %v10336_v27, %v8704_v13  ;;  %v10468_v27 = vsel %vm2241_vm4, %v6376_v16, %v6377_v52  ;;  %v10471_v50 = vsel %vm2241_vm4, %v6377_v52, 0.0 }
 0x315   : > { %v6441_v45 = vpack.c.bf16 %v6279_v59, %v6329_v8  ;;  %v6442_v7 = vpack.c.bf16 %v10462_v63, %v10465_v3 }
 0x316   : > { %v3523_v24 = vadd.f32 %v8902_v28, %v10444_v54  ;;  %v8705_v9 = vpop.f32.mrb[52].mxu0  ;;  %v8908_v44 = vadd.f32 %v8907_v29, %v3480_v14  ;;  %v9185_v14 = vld [vmem:[%s12785_s11 + $0x8] sm:$0xff]  }
 0x317   : > { %v8706_v15 = vpop.f32.mrb[53].mxu0  ;;  %7266 = vmatpush1.bf16.msra.mxu1 %v9185_v14  ;;  %6487 = vrot.lane.b32.xlu1 %v6441_v45, %s9243_s23 }
 0x318   : > { %v3531_v55 = vmax.f32 %v3523_v24, 0.0  ;;  %v8707_v16 = vadd.f32 %v8706_v15, %v8705_v9  ;;  %v3524_v13 = vadd.f32 %v8908_v44, %v10444_v54  ;;  %v8708_v52 = vpop.f32.mrb[54].mxu0  ;;  %7267 = vmatprep.subr.bf16.mxu1 %v10041_v61 }
 0x319   : > { %v8709_v43 = vpop.f32.mrb[55].mxu0 }
 0x31a   : > { %v3553_v24 = vrot.slane %v3531_v55, 7  ;;  %v3577_v12 = vrot.slane %v3531_v55, 1  ;;  %v8898_v59 = vadd.f32 %v10351_v35, %v8707_v16  ;;  %v3532_v9 = vmax.f32 %v3524_v13, 0.0  ;;  %v9186_v16 = vld [vmem:[%s12785_s11 + $0x10] sm:$0xff]  }
 0x31b   : > { %v8710_v44 = vadd.f32 %v8709_v43, %v8708_v52  ;;  %v3609_v15 = vmul.f32 0.75, %v3531_v55  ;;  %7268 = vmatpush1.bf16.msra.mxu1 %v9186_v16  ;;  %6681 = vrot.lane.b32.xlu1 %v6635_v21, %s9244_s16 }
 0x31c   : > { %v3569_v63 = vsel %vm1590_vm2, %v3531_v55, %v3553_v24  ;;  %v3593_v3 = vsel %vm2241_vm4, %v3577_v12, %v3531_v55  ;;  %v8899_v35 = vadd.f32 %v8898_v59, %v10392_v38  ;;  %v3554_v14 = vrot.slane %v3532_v9, 7  ;;  %7269 = vmatprep.subr.bf16.mxu1 %v10041_v61 }
 0x31d   : > { %v3601_v13 = vmul.f32 0.25, %v3569_v63  ;;  %v3625_v52 = vmul.f32 0.25, %v3593_v3  ;;  %v3578_v43 = vrot.slane %v3532_v9, 1  ;;  %v3610_v34 = vmul.f32 0.75, %v3532_v9 }
 0x31e   : > { %v3525_v8 = vadd.f32 %v8899_v35, %v10444_v54  ;;  %v8904_v24 = vadd.f32 %v10355_v22, %v8710_v44  ;;  %v8711_v58 = vpop.f32.mrb[56].mxu0  ;;  %v3570_v12 = vsel %vm1590_vm2, %v3532_v9, %v3554_v14 }
 0x31f   : > { %v3617_v38 = vadd.f32 %v3609_v15, %v3601_v13  ;;  %v3633_v45 = vadd.f32 %v3625_v52, %v3609_v15  ;;  %v3594_v59 = vsel %vm2241_vm4, %v3578_v43, %v3532_v9  ;;  %v8712_v63 = vpop.f32.mrb[57].mxu0  ;;  %v3602_v29 = vmul.f32 0.25, %v3570_v12  ;;  %6489 = vrot.lane.b32.xlu1 %v6442_v7, %s9243_s23 }
 0x320   : > { %v3533_v3 = vmax.f32 %v3525_v8, 0.0  ;;  %v3626_v35 = vmul.f32 0.25, %v3594_v59  ;;  %v8905_v28 = vadd.f32 %v8904_v24, %v10399_v39  ;;  %v10517_v22 = vpop.f32.mrb[58].mxu0  ;;  %v8713_v48 = vadd.f32 %v8712_v63, %v8711_v58  ;;  %v10603_v58 = vld [vmem:[#allocation2] sm:$0xff] }
 0x321   : > { %v3649_v44 = vcombine.high %v3617_v38, %v3617_v38  ;;  %v10521_v16 = vrot.slane %v3617_v38, %v9752_v51  ;;  %v4113_v15 = vcombine.high %v3633_v45, %v3633_v45  ;;  %v4120_v13 = vrot.slane %v3633_v45, %v9752_v51  ;;  %v10524_v9 = vpop.f32.mrb[59].mxu0 }
 0x322   : > { %v3555_v52 = vrot.slane %v3533_v3, 7  ;;  %v3579_v61 = vrot.slane %v3533_v3, 1  ;;  %v3611_v8 = vmul.f32 0.75, %v3533_v3  ;;  %v3618_v14 = vadd.f32 %v3610_v34, %v3602_v29 }
 0x323   : > { %v10527_v43 = vrot.slane %v3649_v44, %v9752_v51  ;;  %v10533_v21 = vrot.slane %v10521_v16, %v9752_v51  ;;  %v10536_v24 = vrot.slane %v4113_v15, %v9752_v51  ;;  %v4128_v38 = vcombine.high %v4120_v13, %v4120_v13 }
 0x324   : > { %v10539_v45 = vrot.slane %v4120_v13, %v9752_v51  ;;  %v3571_v12 = vsel %vm1590_vm2, %v3533_v3, %v3555_v52  ;;  %v3595_v29 = vsel %vm2241_vm4, %v3579_v61, %v3533_v3  ;;  %v3634_v61 = vadd.f32 %v3626_v35, %v3610_v34 }
 0x325   : > { %v10550_v15 = vrot.slane %v10536_v24, %v9752_v51  ;;  %v3603_v55 = vmul.f32 0.25, %v3571_v12  ;;  %v10553_v13 = vrot.slane %v4128_v38, %v9752_v51  ;;  %v3627_v3 = vmul.f32 0.25, %v3595_v29 }
 0x326   : > { %v8717_v7 = vpop.f32.mrb[60].mxu0  ;;  %v3698_v59 = vcombine.high %v3618_v14, %v3618_v14  ;;  %v10560_v41 = vrot.slane %v3618_v14, %v9752_v51  ;;  %v3526_v44 = vadd.f32 %v8905_v28, %v10444_v54  ;;  %v4162_v12 = vcombine.high %v3634_v61, %v3634_v61 }
 0x327   : > { %v10557_v39 = vadd.f32 %v3611_v8, %v3603_v55  ;;  %v8718_v18 = vpop.f32.mrb[61].mxu0  ;;  %v3635_v31 = vadd.f32 %v3627_v3, %v3611_v8  ;;  %v4169_v38 = vrot.slane %v3634_v61, %v9752_v51  ;;  %v12912_v34 = vpack.c.bf16 %v10471_v50, %v10468_v27  ;;  %v9187_v55 = vld [vmem:[%s12785_s11 + $0x18] sm:$0xff]   ;;  %v7898_v27 = vld [vmem:[%s12788_s14] sm:$0x7] }
 0x328   : > { %v8720_v46 = vpop.f32.mrb[62].mxu0  ;;  %v10578_v8 = vrot.slane %v3698_v59, %v9752_v51  ;;  %v10590_v29 = vrot.slane %v10560_v41, %v9752_v51  ;;  %v10593_v3 = vrot.slane %v4162_v12, %v9752_v51  ;;  %7270 = vmatpush1.bf16.msra.mxu1 %v9187_v55  ;;  %v9188_v59 = vld [vmem:[%s12785_s11 + $0x20] sm:$0xff]   ;;  %v8913_v23 = vadd.f32 %v10373_v4, %v8713_v48  ;;  %v9189_v48 = vld [vmem:[%s12785_s11 + $0x28] sm:$0xff]  }
 0x329   : > { %6683 = vrot.lane.b32.xlu1 %v12912_v34, %s9244_s16  ;;  %v10575_v28 = vrot.slane %v10557_v39, %v9752_v51  ;;  %v8721_v63 = vpop.f32.mrb[63].mxu0  ;;  %v4211_v50 = vcombine.high %v3635_v31, %v3635_v31  ;;  %v10586_v14 = vrot.slane %v3635_v31, %v9752_v51  ;;  %v4177_v34 = vcombine.high %v4169_v38, %v4169_v38 }
 0x32a   : > { %v10601_v35 = vrot.slane %v4169_v38, %v9752_v51  ;;  %v3534_v31 = vmax.f32 %v3526_v44, 0.0  ;;  %7271 = vmatprep.subr.bf16.mxu1 %v10603_v58  ;;  %v10615_v61 = vrot.slane %v10593_v3, %v9752_v51  ;;  %v8716_v55 = vadd.f32 %v10524_v9, %v10517_v22 }
 0x32b   : > { %v10607_v12 = vrot.slane %v4211_v50, %v9752_v51  ;;  %v10618_v44 = vrot.slane %v4177_v34, %v9752_v51  ;;  %v8719_v52 = vadd.f32 %v8718_v18, %v8717_v7  ;;  %v8722_v19 = vadd.f32 %v8721_v63, %v8720_v46 }
 0x32c   : > { %v3556_v0 = vrot.slane %v3534_v31, 7  ;;  %v3580_v50 = vrot.slane %v3534_v31, 1  ;;  %v3612_v6 = vmul.f32 0.75, %v3534_v31  ;;  %7272 = vmatpush1.bf16.msra.mxu1 %v9188_v59  ;;  %v10629_v34 = vrot.slane %v10527_v43, %v9752_v51 }
 0x32d   : > { %7901 = vperm.xlu1 %8963, %v7898_v27   ;;  %7273 = vmatprep.subr.bf16.mxu1 %v10603_v58  ;;  %v8914_v18 = vadd.f32 %v8913_v23, %v10434_v5  ;;  %v8919_v22 = vadd.f32 %v10384_v36, %v8716_v55  ;;  %v8916_v46 = vadd.f32 %v10410_v53, %v8722_v19  ;;  %v9190_v19 = vld [vmem:[%s12785_s11 + $0x30] sm:$0xff]  }
 0x32e   : > { %v3572_v32 = vsel %vm1590_vm2, %v3534_v31, %v3556_v0  ;;  %v3596_v27 = vsel %vm2241_vm4, %v3580_v50, %v3534_v31  ;;  %v8910_v0 = vadd.f32 %v10397_v49, %v8719_v52  ;;  %v12913_v9 = vcombine.high %v10521_v16, %v10521_v16 }
 0x32f   : > { %v3604_v4 = vmul.f32 0.25, %v3572_v32  ;;  %v3628_v38 = vmul.f32 0.25, %v3596_v27  ;;  %v12914_v63 = vcombine.high %v10527_v43, %v10527_v43  ;;  %v3527_v36 = vadd.f32 %v8914_v18, %v10444_v54 }
 0x330   : > { %v10643_v7 = vrot.slane %v12913_v9, %v9752_v51  ;;  %v8920_v49 = vadd.f32 %v8919_v22, %v10446_v17  ;;  %7274 = vmatpush1.bf16.msra.mxu1 %v9189_v48  ;;  %v8911_v5 = vadd.f32 %v8910_v0, %v10425_v33  ;;  %v8917_v53 = vadd.f32 %v8916_v46, %v10437_v57 }
 0x331   : > { %v10649_v32 = vrot.slane %v12914_v63, %v9752_v51  ;;  %v3620_v59 = vadd.f32 %v3612_v6, %v3604_v4  ;;  %v3636_v23 = vadd.f32 %v3628_v38, %v3612_v6  ;;  %7275 = vmatprep.subr.bf16.mxu1 %v10603_v58  ;;  %v3535_v55 = vmax.f32 %v3527_v36, 0.0 }
 0x332   : > { %v3528_v38 = vadd.f32 %v8920_v49, %v10444_v54  ;;  %v3529_v33 = vadd.f32 %v8911_v5, %v10444_v54  ;;  %v3530_v57 = vadd.f32 %v8917_v53, %v10444_v54  ;;  %v12950_v47 = vcombine.high %v10578_v8, %v10578_v8 }
 0x333   : > { %v3796_v6 = vcombine.high %v3620_v59, %v3620_v59  ;;  %v3803_v17 = vrot.slane %v3620_v59, %v9752_v51  ;;  %v4260_v52 = vcombine.high %v3636_v23, %v3636_v23  ;;  %v4267_v31 = vrot.slane %v3636_v23, %v9752_v51 }
 0x334   : > { %7276 = vmatpush1.bf16.msra.mxu1 %v9190_v19  ;;  %v3557_v0 = vrot.slane %v3535_v55, 7  ;;  %v3581_v46 = vrot.slane %v3535_v55, 1  ;;  %v3537_v63 = vmax.f32 %v3529_v33, 0.0  ;;  %v10705_v43 = vmax.f32 %v3530_v57, 0.0  ;;  %v9191_v33 = vld [vmem:[%s12785_s11 + $0x38] sm:$0xff]  }
 0x335   : > { %v10669_v50 = vrot.slane %v3796_v6, %v9752_v51  ;;  %v3811_v27 = vcombine.high %v3803_v17, %v3803_v17  ;;  %v10672_v48 = vrot.slane %v3803_v17, %v9752_v51  ;;  %v10675_v4 = vrot.slane %v4260_v52, %v9752_v51  ;;  %7277 = vmatprep.subr.bf16.mxu1 %v10603_v58 }
 0x336   : > { %v4275_v18 = vcombine.high %v4267_v31, %v4267_v31  ;;  %v10678_v22 = vrot.slane %v4267_v31, %v9752_v51  ;;  %v3573_v5 = vsel %vm1590_vm2, %v3535_v55, %v3557_v0  ;;  %v3597_v53 = vsel %vm2241_vm4, %v3581_v46, %v3535_v55 }
 0x337   : > { %12915 = vst [vmem:[#allocation28_spill] sm:$0xff] %v10672_v48  ;;  %v10684_v9 = vrot.slane %v3811_v27, %v9752_v51  ;;  %v10692_v23 = vrot.slane %v10675_v4, %v9752_v51  ;;  %v3613_v6 = vmul.f32 0.75, %v3535_v55  ;;  %v3536_v17 = vmax.f32 %v3528_v38, 0.0 }
 0x338   : > { %12916 = vst [vmem:[#allocation29_spill] sm:$0xff] %v10678_v22  ;;  %v10695_v36 = vrot.slane %v4275_v18, %v9752_v51  ;;  %v3605_v31 = vmul.f32 0.25, %v3573_v5  ;;  %v3629_v27 = vmul.f32 0.25, %v3597_v53  ;;  %v3559_v19 = vrot.slane %v3537_v63, 7  ;;  %7278 = vmatpush1.bf16.msra.mxu1 %v9191_v33 }
 0x339   : > { %v3558_v18 = vrot.slane %v3536_v17, 7  ;;  %v3582_v59 = vrot.slane %v3536_v17, 1  ;;  %v3614_v54 = vmul.f32 0.75, %v3536_v17  ;;  %v3583_v10 = vrot.slane %v3537_v63, 1  ;;  %7279 = vmatprep.subr.bf16.mxu1 %v10603_v58 }
 0x33a   : > { %v3621_v49 = vadd.f32 %v3613_v6, %v3605_v31  ;;  %v3637_v16 = vadd.f32 %v3629_v27, %v3613_v6  ;;  %v3615_v38 = vmul.f32 0.75, %v3537_v63  ;;  %v3560_v46 = vrot.slane %v10705_v43, 7 }
 0x33b   : > { %v3574_v0 = vsel %vm1590_vm2, %v3536_v17, %v3558_v18  ;;  %v3598_v55 = vsel %vm2241_vm4, %v3582_v59, %v3536_v17  ;;  %v3575_v52 = vsel %vm1590_vm2, %v3537_v63, %v3559_v19  ;;  %v3599_v18 = vsel %vm2241_vm4, %v3583_v10, %v3537_v63  ;;  %v9192_v59 = vld [vmem:[%s12785_s11 + $0x40] sm:$0xff]  }
 0x33c   : > { %v3845_v5 = vcombine.high %v3621_v49, %v3621_v49  ;;  %v3852_v53 = vrot.slane %v3621_v49, %v9752_v51  ;;  %v4309_v57 = vcombine.high %v3637_v16, %v3637_v16  ;;  %v4316_v31 = vrot.slane %v3637_v16, %v9752_v51  ;;  %7280 = vmatpush1.bf16.msra.mxu1 %v9192_v59 }
 0x33d   : > { %v3606_v6 = vmul.f32 0.25, %v3574_v0  ;;  %v3630_v27 = vmul.f32 0.25, %v3598_v55  ;;  %7281 = vmatprep.subr.bf16.mxu1 %v10603_v58  ;;  %v3607_v59 = vmul.f32 0.25, %v3575_v52  ;;  %v3631_v55 = vmul.f32 0.25, %v3599_v18 }
 0x33e   : > { %v10721_v17 = vrot.slane %v3845_v5, %v9752_v51  ;;  %v3860_v1 = vcombine.high %v3852_v53, %v3852_v53  ;;  %v10724_v49 = vrot.slane %v3852_v53, %v9752_v51  ;;  %v10727_v16 = vrot.slane %v4309_v57, %v9752_v51 }
 0x33f   : > { %v4324_v19 = vcombine.high %v4316_v31, %v4316_v31  ;;  %v10731_v10 = vrot.slane %v4316_v31, %v9752_v51  ;;  %v3622_v63 = vadd.f32 %v3614_v54, %v3606_v6  ;;  %v3638_v0 = vadd.f32 %v3630_v27, %v3614_v54  ;;  %v9194_v54 = vld [vmem:[%s12785_s11 + $0x6c] sm:$0xff]  }
 0x340   : > { %12917 = vst [vmem:[#allocation30_spill] sm:$0xff] %v10721_v17  ;;  %12918 = vst [vmem:[#allocation31_spill] sm:$0xff] %v10724_v49  ;;  %v10736_v33 = vrot.slane %v3860_v1, %v9752_v51  ;;  %v10744_v57 = vrot.slane %v10727_v16, %v9752_v51  ;;  %6971 = vmatpush1.bf16.msra.mxu0 %v9194_v54  ;;  %v3623_v52 = vadd.f32 %v3615_v38, %v3607_v59 }
 0x341   : > { %12919 = vst [vmem:[#allocation32_spill] sm:$0xff] %v10727_v16  ;;  %12920 = vst [vmem:[#allocation33_spill] sm:$0xff] %v10731_v10  ;;  %v10747_v31 = vrot.slane %v4324_v19, %v9752_v51  ;;  %v3894_v6 = vcombine.high %v3622_v63, %v3622_v63  ;;  %v3901_v27 = vrot.slane %v3622_v63, %v9752_v51  ;;  %v9193_v19 = vld [vmem:[%s12785_s11 + $0x48] sm:$0xff]   ;;  %6972 = vmatprep.subr.bf16.mxu0 %v10603_v58 }
 0x342   : > { %12921 = vst [vmem:[#allocation34_spill] sm:$0xff] %v10736_v33  ;;  %12922 = vst [vmem:[#allocation35_spill] sm:$0xff] %v10744_v57  ;;  %v4358_v5 = vcombine.high %v3638_v0, %v3638_v0  ;;  %v4365_v53 = vrot.slane %v3638_v0, %v9752_v51  ;;  %v3576_v63 = vsel %vm1590_vm2, %v10705_v43, %v3560_v46  ;;  %7282 = vmatpush1.bf16.msra.mxu1 %v9193_v19  ;;  %v9195_v46 = vld [vmem:[%s12785_s11 + $0x50] sm:$0xff]  }
 0x343   : > { %12923 = vst [vmem:[#allocation36_spill] sm:$0xff] %v10747_v31  ;;  %v10767_v0 = vrot.slane %v3894_v6, %v9752_v51  ;;  %v3909_v49 = vcombine.high %v3901_v27, %v3901_v27  ;;  %v10770_v10 = vrot.slane %v3901_v27, %v9752_v51  ;;  %v3639_v18 = vadd.f32 %v3631_v55, %v3615_v38 }
 0x344   : > { %v10773_v57 = vrot.slane %v4358_v5, %v9752_v51  ;;  %v4373_v16 = vcombine.high %v4365_v53, %v4365_v53  ;;  %v10776_v33 = vrot.slane %v4365_v53, %v9752_v51  ;;  %7283 = vmatprep.subr.bf16.mxu1 %v10603_v58  ;;  %v3943_v19 = vcombine.high %v3623_v52, %v3623_v52 }
 0x345   : > { %12924 = vst [vmem:[#allocation37_spill] sm:$0xff] %v10767_v0  ;;  %12925 = vst [vmem:[#allocation38_spill] sm:$0xff] %v10770_v10  ;;  %v10784_v27 = vrot.slane %v3909_v49, %v9752_v51  ;;  %v3950_v59 = vrot.slane %v3623_v52, %v9752_v51  ;;  %v4407_v5 = vcombine.high %v3639_v18, %v3639_v18  ;;  %v3608_v1 = vmul.f32 0.25, %v3576_v63 }
 0x346   : > { %12926 = vst [vmem:[#allocation39_spill] sm:$0xff] %v10773_v57  ;;  %12927 = vst [vmem:[#allocation40_spill] sm:$0xff] %v10776_v33  ;;  %v10793_v38 = vrot.slane %v10773_v57, %v9752_v51  ;;  %v10796_v55 = vrot.slane %v4373_v16, %v9752_v51  ;;  %v4414_v53 = vrot.slane %v3639_v18, %v9752_v51  ;;  %v3584_v16 = vrot.slane %v10705_v43, 1 }
 0x347   : > { %12928 = vst [vmem:[#allocation41_spill] sm:$0xff] %v10784_v27  ;;  %v3616_v10 = vmul.f32 0.75, %v10705_v43  ;;  %7284 = vmatpush1.bf16.msra.mxu1 %v9195_v46  ;;  %v10810_v54 = vrot.slane %v3943_v19, %v9752_v51  ;;  %v3958_v49 = vcombine.high %v3950_v59, %v3950_v59  ;;  %v10813_v33 = vrot.slane %v3950_v59, %v9752_v51 }
 0x348   : > { %12929 = vst [vmem:[#allocation42_spill] sm:$0xff] %v10793_v38  ;;  %12930 = vst [vmem:[#allocation43_spill] sm:$0xff] %v10796_v55  ;;  %v10816_v52 = vrot.slane %v4407_v5, %v9752_v51  ;;  %7285 = vmatprep.subr.bf16.mxu1 %v10603_v58  ;;  %v4422_v18 = vcombine.high %v4414_v53, %v4414_v53  ;;  %v10820_v6 = vrot.slane %v4414_v53, %v9752_v51 }
 0x349   : > { %12931 = vst [vmem:[#allocation44_spill] sm:$0xff] %v10810_v54  ;;  %12932 = vst [vmem:[#allocation45_spill] sm:$0xff] %v10813_v33  ;;  %v3600_v63 = vsel %vm2241_vm4, %v3584_v16, %v10705_v43  ;;  %v3624_v46 = vadd.f32 %v3616_v10, %v3608_v1  ;;  %v10827_v55 = vrot.slane %v3958_v49, %v9752_v51 }
 0x34a   : > { %12933 = vst [vmem:[#allocation46_spill] sm:$0xff] %v10816_v52  ;;  %12934 = vst [vmem:[#allocation47_spill] sm:$0xff] %v10820_v6  ;;  %v10835_v53 = vrot.slane %v10816_v52, %v9752_v51  ;;  %v10838_v38 = vrot.slane %v4422_v18, %v9752_v51  ;;  %v3632_v49 = vmul.f32 0.25, %v3600_v63  ;;  %v3696_v59 = vcombine.high %v10643_v7, %v10643_v7 }
 0x34b   : > { %12935 = vst [vmem:[#allocation48_spill] sm:$0xff] %v10827_v55  ;;  %v3992_v16 = vcombine.high %v3624_v46, %v3624_v46  ;;  %v3999_v5 = vrot.slane %v3624_v46, %v9752_v51  ;;  %v3697_v18 = vcombine.high %v10649_v32, %v10649_v32  ;;  %v12938_v43 = vcombine.high %v10536_v24, %v10536_v24 }
 0x34c   : > { %12936 = vst [vmem:[#allocation49_spill] sm:$0xff] %v10835_v53  ;;  %12937 = vst [vmem:[#allocation50_spill] sm:$0xff] %v10838_v38  ;;  %v4159_v63 = vcombine.high %v10550_v15, %v10550_v15  ;;  %v3640_v1 = vadd.f32 %v3632_v49, %v3616_v10  ;;  %v4160_v19 = vcombine.high %v10553_v13, %v10553_v13  ;;  %v9196_v10 = vld [vmem:[%s12785_s11 + $0x74] sm:$0xff]  }
 0x34d   : > { %v4157_v33 = vrot.slane %v12938_v43, %v9752_v51  ;;  %v10858_v46 = vrot.slane %v3992_v16, %v9752_v51  ;;  %v4007_v6 = vcombine.high %v3999_v5, %v3999_v5  ;;  %v10861_v53 = vrot.slane %v3999_v5, %v9752_v51  ;;  %v9197_v43 = vld [vmem:[%s12785_s11 + $0x58] sm:$0xff]   ;;  %6973 = vmatpush1.bf16.msra.mxu0 %v9196_v10 }
 0x34e   : > { %v4508_v52 = vrot.slane %v10539_v45, %v9754_v25  ;;  %v4512_v24 = vrot.slane %v10553_v13, %v9754_v25  ;;  %v4456_v55 = vcombine.high %v3640_v1, %v3640_v1  ;;  %v4463_v13 = vrot.slane %v3640_v1, %v9752_v51  ;;  %7286 = vmatpush1.bf16.msra.mxu1 %v9197_v43 }
 0x34f   : > { %12939 = vst [vmem:[#allocation51_spill] sm:$0xff] %v10858_v46  ;;  %12940 = vst [vmem:[#allocation52_spill] sm:$0xff] %v10861_v53  ;;  %v4161_v38 = vcombine.high %v4157_v33, %v4157_v33  ;;  %v10878_v49 = vrot.slane %v4007_v6, %v9752_v51  ;;  %v12942_v54 = vcombine.high %v10539_v45, %v10539_v45  ;;  %v9198_v6 = vld [vmem:[%s12785_s11 + $0x7c] sm:$0xff]   ;;  %6974 = vmatprep.subr.bf16.mxu0 %v10603_v58 }
 0x350   : > { %v4520_v27 = vrot.slane %v4160_v19, %v9754_v25  ;;  %v4524_v0 = vrot.slane %v10550_v15, %v9754_v25  ;;  %v10894_v16 = vrot.slane %v4456_v55, %v9752_v51  ;;  %v4528_v1 = vrot.slane %v4157_v33, %v9754_v25  ;;  %7287 = vmatprep.subr.bf16.mxu1 %v10603_v58 }
 0x351   : > { %12941 = vst [vmem:[#allocation53_spill] sm:$0xff] %v10878_v49  ;;  %v4516_v57 = vrot.slane %v12942_v54, %v9754_v25  ;;  %v4532_v5 = vrot.slane %v4159_v63, %v9754_v25  ;;  %v4536_v45 = vrot.slane %v4161_v38, %v9754_v25  ;;  %v9199_v54 = vld [vmem:[%s12785_s11 + $0x60] sm:$0xff]   ;;  %v4471_v15 = vcombine.high %v4463_v13, %v4463_v13 }
 0x352   : > { %12943 = vst [vmem:[#allocation54_spill] sm:$0xff] %v10894_v16  ;;  %v10903_v19 = vrot.slane %v4463_v13, %v9752_v51  ;;  %v4825_v10 = vsel %vm1590_vm2, %v10533_v21, %v4508_v52  ;;  %v4826_v55 = vsel %vm1590_vm2, %v10643_v7, %v4512_v24  ;;  %v10914_v38 = vrot.slane %v10894_v16, %v9752_v51  ;;  %v9202_v52 = vld [vmem:[%s12785_s11 + $0x8c] sm:$0xff]  }
 0x353   : > { %v12946_v63 = vcombine.high %v10533_v21, %v10533_v21  ;;  %v4828_v13 = vsel %vm1590_vm2, %v3696_v59, %v4520_v27  ;;  %v10923_v7 = vrot.slane %v4471_v15, %v9752_v51  ;;  %v4829_v33 = vsel %vm1590_vm2, %v10629_v34, %v4524_v0  ;;  %6975 = vmatpush1.bf16.msra.mxu0 %v9198_v6  ;;  %v9200_v0 = vld [vmem:[%s12785_s11 + $0x84] sm:$0xff]  }
 0x354   : > { %12944 = vst [vmem:[#allocation55_spill] sm:$0xff] %v10903_v19  ;;  %12945 = vst [vmem:[#allocation56_spill] sm:$0xff] %v10914_v38  ;;  %v4830_v21 = vsel %vm1590_vm2, %v10649_v32, %v4528_v1  ;;  %v4832_v59 = vsel %vm1590_vm2, %v3697_v18, %v4536_v45  ;;  %v10938_v15 = vmul.f32 0.25, %v4825_v10  ;;  %7288 = vmatpush1.bf16.msra.mxu1 %v9199_v54  ;;  %6976 = vmatprep.subr.bf16.mxu0 %v10603_v58 }
 0x355   : > { %v4827_v43 = vsel %vm1590_vm2, %v12946_v63, %v4516_v57  ;;  %12947 = vst [vmem:[#allocation57_spill] sm:$0xff] %v10923_v7  ;;  %v12948_v57 = vcombine.high %v10629_v34, %v10629_v34  ;;  %v10946_v32 = vmul.f32 0.25, %v4826_v55  ;;  %v10950_v34 = vmul.f32 0.25, %v4828_v13  ;;  %7289 = vmatprep.subr.bf16.mxu1 %v10603_v58 }
 0x356   : > { %v10948_v1 = vmul.f32 0.25, %v4827_v43  ;;  %v10953_v18 = vmul.f32 0.25, %v4829_v33  ;;  %v10959_v54 = vmul.f32 0.25, %v4832_v59  ;;  %v10961_v63 = vmul.f32 0.75, %v4825_v10 }
 0x357   : > { %v4831_v27 = vsel %vm1590_vm2, %v12948_v57, %v4532_v5  ;;  %v10955_v5 = vmul.f32 0.25, %v4830_v21  ;;  %v10963_v57 = vmul.f32 0.75, %v4826_v55  ;;  %v10965_v24 = vmul.f32 0.75, %v4827_v43  ;;  %6977 = vmatpush1.bf16.msra.mxu0 %v9200_v0 }
 0x358   : > { %v10957_v45 = vmul.f32 0.25, %v4831_v27  ;;  %v10967_v6 = vmul.f32 0.75, %v4828_v13  ;;  %v10972_v53 = vmul.f32 0.75, %v4829_v33  ;;  %v10974_v19 = vmul.f32 0.75, %v4830_v21  ;;  %6978 = vmatprep.subr.bf16.mxu0 %v10603_v58 }
 0x359   : > { %v10976_v7 = vmul.f32 0.75, %v4831_v27  ;;  %v10978_v38 = vmul.f32 0.75, %v4832_v59  ;;  %v5009_v10 = vadd.f32 %v10961_v63, %v10938_v15  ;;  %v5010_v55 = vadd.f32 %v10963_v57, %v10946_v32 }
 0x35a   : > { %v5011_v43 = vadd.f32 %v10965_v24, %v10948_v1  ;;  %v5012_v33 = vadd.f32 %v10967_v6, %v10950_v34  ;;  %v5013_v13 = vadd.f32 %v10972_v53, %v10953_v18  ;;  %v5014_v21 = vadd.f32 %v10974_v19, %v10955_v5 }
 0x35b   : > { %v5015_v27 = vadd.f32 %v10976_v7, %v10957_v45  ;;  %v5016_v59 = vadd.f32 %v10978_v38, %v10959_v54  ;;  %v5273_v0 = vcombine.low %v5009_v10, %v5010_v55  ;;  %v3728_v49 = vrot.slane %v10578_v8, %v9752_v51  ;;  %6979 = vmatpush1.bf16.msra.mxu0 %v9202_v52 }
 0x35c   : > { %v5274_v16 = vcombine.low %v5011_v43, %v5012_v33  ;;  %v12949_v46 = vcombine.high %v10560_v41, %v10560_v41  ;;  %v5290_v17 = vcombine.low %v5013_v13, %v5014_v21  ;;  %v3742_v42 = vrot.slane %v12950_v47, %v9752_v51  ;;  %6980 = vmatprep.subr.bf16.mxu0 %v10603_v58 }
 0x35d   : > { %v5291_v40 = vcombine.low %v5015_v27, %v5016_v59  ;;  %v3743_v10 = vcombine.high %v10590_v29, %v10590_v29  ;;  %v5281_v55 = vrot.slane %v5273_v0, %v9758_v30  ;;  %v3744_v33 = vcombine.high %v3728_v49, %v3728_v49 }
 0x35e   : > { %v3735_v31 = vrot.slane %v12949_v46, %v9752_v51  ;;  %v5288_v43 = vrot.slane %v5274_v16, %v9758_v30  ;;  %v5298_v46 = vrot.slane %v5290_v17, %v9758_v30  ;;  %v3746_v13 = vcombine.high %v3742_v42, %v3742_v42 }
 0x35f   : > { %v5305_v52 = vrot.slane %v5291_v40, %v9758_v30  ;;  %v12951_v47 = vcombine.high %v10593_v3, %v10593_v3  ;;  %v4208_v27 = vcombine.high %v10615_v61, %v10615_v61  ;;  %v4209_v16 = vcombine.high %v10618_v44, %v10618_v44 }
 0x360   : > { %v3745_v41 = vcombine.high %v3735_v31, %v3735_v31  ;;  %v11018_v21 = vcombine.low %v5281_v55, %v5288_v43  ;;  %v4540_v59 = vrot.slane %v10601_v35, %v9754_v25  ;;  %v4544_v0 = vrot.slane %v10618_v44, %v9754_v25 }
 0x361   : > { %v4206_v8 = vrot.slane %v12951_v47, %v9752_v51  ;;  %v11026_v17 = vcombine.low %v5298_v46, %v5305_v52  ;;  %v12952_v3 = vcombine.high %v10601_v35, %v10601_v35  ;;  %v4552_v43 = vrot.slane %v4209_v16, %v9754_v25 }
 0x362   : > { %v4556_v47 = vrot.slane %v10615_v61, %v9754_v25  ;;  %v4564_v37 = vrot.slane %v4208_v27, %v9754_v25  ;;  %v4833_v44 = vsel %vm1590_vm2, %v10590_v29, %v4540_v59  ;;  %v4834_v35 = vsel %vm1590_vm2, %v3735_v31, %v4544_v0 }
 0x363   : > { %v4210_v40 = vcombine.high %v4206_v8, %v4206_v8  ;;  %v4548_v55 = vrot.slane %v12952_v3, %v9754_v25  ;;  %v4560_v48 = vrot.slane %v4206_v8, %v9754_v25  ;;  %v6074_v46 = vpack.c.bf16 %v11026_v17, %v11018_v21 }
 0x364   : > { %v4836_v16 = vsel %vm1590_vm2, %v3745_v41, %v4552_v43  ;;  %v4837_v61 = vsel %vm1590_vm2, %v3728_v49, %v4556_v47  ;;  %v4839_v27 = vsel %vm1590_vm2, %v3744_v33, %v4564_v37  ;;  %v11054_v22 = vmul.f32 0.25, %v4834_v35  ;;  %v9203_v33 = vld [vmem:[%s12785_s11 + $0x94] sm:$0xff]  }
 0x365   : > { %v4568_v52 = vrot.slane %v4210_v40, %v9754_v25  ;;  %v4835_v3 = vsel %vm1590_vm2, %v3743_v10, %v4548_v55  ;;  %v4838_v8 = vsel %vm1590_vm2, %v3742_v42, %v4560_v48  ;;  %6106 = vrot.lane.b32.xlu0 %v6074_v46, %s9243_s23  ;;  %v11052_v40 = vmul.f32 0.25, %v4833_v44  ;;  %6981 = vmatpush1.bf16.msra.mxu0 %v9203_v33 }
 0x366   : > { %v11056_v29 = vmul.f32 0.25, %v4835_v3  ;;  %v11058_v31 = vmul.f32 0.25, %v4836_v16  ;;  %v11060_v10 = vmul.f32 0.25, %v4837_v61  ;;  %v11062_v41 = vmul.f32 0.25, %v4838_v8  ;;  %6982 = vmatprep.subr.bf16.mxu0 %v10603_v58 }
 0x367   : > { %v4840_v56 = vsel %vm1590_vm2, %v3746_v13, %v4568_v52  ;;  %v11064_v49 = vmul.f32 0.25, %v4839_v27  ;;  %v5081_v37 = vadd.f32 %v10961_v63, %v11052_v40  ;;  %v5082_v48 = vadd.f32 %v10963_v57, %v11054_v22 }
 0x368   : > { %v11066_v42 = vmul.f32 0.25, %v4840_v56  ;;  %v5083_v13 = vadd.f32 %v10965_v24, %v11056_v29  ;;  %v5084_v59 = vadd.f32 %v10967_v6, %v11058_v31  ;;  %v5085_v0 = vadd.f32 %v10972_v53, %v11060_v10  ;;  %v9204_v53 = vld [vmem:[%s12785_s11 + $0x9c] sm:$0xff]  }
 0x369   : > { %v5086_v55 = vadd.f32 %v10974_v19, %v11062_v41  ;;  %v12953_v63 = vpack.c.bf16 %v10210_v2, %v10200_v26  ;;  %v5087_v57 = vadd.f32 %v10976_v7, %v11064_v49  ;;  %v5307_v43 = vcombine.low %v5081_v37, %v5082_v48  ;;  %6983 = vmatpush1.bf16.msra.mxu0 %v9204_v53 }
 0x36a   : > { %v5088_v24 = vadd.f32 %v10978_v38, %v11066_v42  ;;  %v11091_v47 = vmul.f32 0.75, %v4833_v44  ;;  %v5308_v19 = vcombine.low %v5083_v13, %v5084_v59  ;;  %v11096_v46 = vmul.f32 0.75, %v4834_v35  ;;  %6984 = vmatprep.subr.bf16.mxu0 %v10603_v58 }
 0x36b   : > { %6562 = vrot.lane.b32.xlu0 %v12953_v63, %s9242_s30  ;;  %v5324_v6 = vcombine.low %v5085_v0, %v5086_v55  ;;  %v11098_v26 = vmul.f32 0.75, %v4835_v3  ;;  %v5315_v2 = vrot.slane %v5307_v43, %v9758_v30  ;;  %v11102_v38 = vmul.f32 0.75, %v4836_v16  ;;  %v9206_v43 = vld [vmem:[%s12785_s11 + $0xac] sm:$0xff]  }
 0x36c   : > { %v5325_v7 = vcombine.low %v5087_v57, %v5088_v24  ;;  %v11104_v52 = vmul.f32 0.75, %v4837_v61  ;;  %v5322_v44 = vrot.slane %v5308_v19, %v9758_v30  ;;  %v11108_v48 = vmul.f32 0.75, %v4838_v8 }
 0x36d   : > { %v5332_v37 = vrot.slane %v5324_v6, %v9758_v30  ;;  %v11110_v33 = vmul.f32 0.75, %v4839_v27  ;;  %v11113_v3 = vmul.f32 0.75, %v4840_v56  ;;  %v5017_v13 = vadd.f32 %v11091_v47, %v10938_v15 }
 0x36e   : > { %v5339_v35 = vrot.slane %v5325_v7, %v9758_v30  ;;  %v5018_v16 = vadd.f32 %v11096_v46, %v10946_v32  ;;  %v11119_v61 = vcombine.low %v5315_v2, %v5322_v44  ;;  %v5019_v59 = vadd.f32 %v11098_v26, %v10948_v1  ;;  %v9205_v1 = vld [vmem:[%s12785_s11 + $0xa4] sm:$0xff]  }
 0x36f   : > { %v5020_v8 = vadd.f32 %v11102_v38, %v10950_v34  ;;  %v5021_v27 = vadd.f32 %v11104_v52, %v10953_v18  ;;  %v5022_v15 = vadd.f32 %v11108_v48, %v10955_v5  ;;  %v5023_v32 = vadd.f32 %v11110_v33, %v10957_v45  ;;  %6985 = vmatpush1.bf16.msra.mxu0 %v9205_v1 }
 0x370   : > { %v11128_v56 = vcombine.low %v5332_v37, %v5339_v35  ;;  %v5024_v0 = vadd.f32 %v11113_v3, %v10959_v54  ;;  %v5341_v34 = vcombine.low %v5017_v13, %v5018_v16  ;;  %v12954_v18 = vcombine.high %v10557_v39, %v10557_v39  ;;  %6986 = vmatprep.subr.bf16.mxu0 %v10603_v58 }
 0x371   : > { %v5342_v55 = vcombine.low %v5019_v59, %v5020_v8  ;;  %v3762_v5 = vcombine.high %v10575_v28, %v10575_v28  ;;  %v5358_v57 = vcombine.low %v5021_v27, %v5022_v15  ;;  %v3770_v54 = vrot.slane %v10575_v28, %v9752_v51 }
 0x372   : > { %v3761_v63 = vrot.slane %v12954_v18, %v9752_v51  ;;  %v6075_v45 = vpack.c.bf16 %v11128_v56, %v11119_v61  ;;  %v5359_v24 = vcombine.low %v5023_v32, %v5024_v0  ;;  %v5349_v53 = vrot.slane %v5341_v34, %v9758_v30 }
 0x373   : > { %v5356_v39 = vrot.slane %v5342_v55, %v9758_v30  ;;  %v5366_v2 = vrot.slane %v5358_v57, %v9758_v30  ;;  %v3784_v7 = vrot.slane %v3762_v5, %v9752_v51  ;;  %v3792_v44 = vcombine.high %v3770_v54, %v3770_v54  ;;  %6987 = vmatpush1.bf16.msra.mxu0 %v9206_v43 }
 0x374   : > { %v3763_v19 = vcombine.high %v3761_v63, %v3761_v63  ;;  %v3777_v6 = vrot.slane %v3761_v63, %v9752_v51  ;;  %6108 = vrot.lane.b32.xlu0 %v6075_v45, %s9243_s23  ;;  %v5373_v28 = vrot.slane %v5359_v24, %v9758_v30  ;;  %v4227_v16 = vcombine.high %v10607_v12, %v10607_v12 }
 0x375   : > { %v11160_v37 = vcombine.low %v5349_v53, %v5356_v39  ;;  %v3794_v8 = vcombine.high %v3784_v7, %v3784_v7  ;;  %v4234_v27 = vrot.slane %v10586_v14, %v9752_v51  ;;  %v4241_v15 = vrot.slane %v10607_v12, %v9752_v51  ;;  %6988 = vmatprep.subr.bf16.mxu0 %v10603_v58 }
 0x376   : > { %v3791_v35 = vrot.slane %v3763_v19, %v9752_v51  ;;  %v3793_v13 = vcombine.high %v3777_v6, %v3777_v6  ;;  %v11165_v59 = vcombine.low %v5366_v2, %v5373_v28  ;;  %v12955_v0 = vcombine.high %v10586_v14, %v10586_v14 }
 0x377   : > { %v4255_v34 = vrot.slane %v4227_v16, %v9752_v51  ;;  %v5913_v55 = vrot.slane %v11018_v21, 1  ;;  %v12956_v18 = vpack.c.bf16 %v10321_v60, %v10318_v11  ;;  %v4256_v63 = vcombine.high %v4234_v27, %v4234_v27 }
 0x378   : > { %v3795_v32 = vcombine.high %v3791_v35, %v3791_v35  ;;  %v4248_v1 = vrot.slane %v12955_v0, %v9752_v51  ;;  %v6076_v12 = vpack.c.bf16 %v11165_v59, %v11160_v37  ;;  %v4257_v5 = vcombine.high %v4241_v15, %v4241_v15 }
 0x379   : > { %6659 = vrot.lane.b32.xlu0 %v12956_v18, %s9244_s16  ;;  %v4572_v45 = vrot.slane %v4234_v27, %v9754_v25  ;;  %v4259_v57 = vcombine.high %v4255_v34, %v4255_v34  ;;  %v4588_v43 = vrot.slane %v4241_v15, %v9754_v25  ;;  %v4580_v53 = vrot.slane %v4256_v63, %v9754_v25 }
 0x37a   : > { %v4258_v14 = vcombine.high %v4248_v1, %v4248_v1  ;;  %v4576_v24 = vrot.slane %v4248_v1, %v9754_v25  ;;  %v4592_v39 = vrot.slane %v4255_v34, %v9754_v25  ;;  %v4596_v11 = vrot.slane %v4257_v5, %v9754_v25  ;;  %v9207_v5 = vld [vmem:[%s12785_s11 + $0xb4] sm:$0xff]  }
 0x37b   : > { %v4841_v60 = vsel %vm1590_vm2, %v3770_v54, %v4572_v45  ;;  %v4600_v2 = vrot.slane %v4259_v57, %v9754_v25  ;;  %v4845_v16 = vsel %vm1590_vm2, %v3777_v6, %v4588_v43  ;;  %v4843_v27 = vsel %vm1590_vm2, %v3792_v44, %v4580_v53  ;;  %6989 = vmatpush1.bf16.msra.mxu0 %v9207_v5 }
 0x37c   : > { %v4584_v19 = vrot.slane %v4258_v14, %v9754_v25  ;;  %v4842_v28 = vsel %vm1590_vm2, %v3784_v7, %v4576_v24  ;;  %v4846_v15 = vsel %vm1590_vm2, %v3791_v35, %v4592_v39  ;;  %v4847_v0 = vsel %vm1590_vm2, %v3793_v13, %v4596_v11  ;;  %6990 = vmatprep.subr.bf16.mxu0 %v10603_v58 }
 0x37d   : > { %6110 = vrot.lane.b32.xlu0 %v6076_v12, %s9243_s23  ;;  %v11199_v1 = vmul.f32 0.25, %v4841_v60  ;;  %v4848_v34 = vsel %vm1590_vm2, %v3795_v32, %v4600_v2  ;;  %v11203_v18 = vmul.f32 0.25, %v4842_v28  ;;  %v11205_v7 = vmul.f32 0.25, %v4843_v27 }
 0x37e   : > { %v4844_v54 = vsel %vm1590_vm2, %v3794_v8, %v4584_v19  ;;  %v11209_v12 = vmul.f32 0.25, %v4845_v16  ;;  %v11211_v44 = vmul.f32 0.25, %v4846_v15  ;;  %v11213_v35 = vmul.f32 0.25, %v4847_v0 }
 0x37f   : > { %v11207_v6 = vmul.f32 0.25, %v4844_v54  ;;  %v11215_v13 = vmul.f32 0.25, %v4848_v34  ;;  %v5089_v63 = vadd.f32 %v11091_v47, %v11199_v1  ;;  %v5090_v8 = vadd.f32 %v11096_v46, %v11203_v18 }
 0x380   : > { %v5091_v32 = vadd.f32 %v11098_v26, %v11205_v7  ;;  %v12957_v45 = vpack.c.bf16 %v10475_v20, %v10478_v62  ;;  %v5093_v47 = vadd.f32 %v11104_v52, %v11209_v12  ;;  %v5094_v46 = vadd.f32 %v11108_v48, %v11211_v44  ;;  %v9208_v62 = vld [vmem:[%s12785_s11 + $0xbc] sm:$0xff]  }
 0x381   : > { %v5092_v14 = vadd.f32 %v11102_v38, %v11207_v6  ;;  %v5095_v26 = vadd.f32 %v11110_v33, %v11213_v35  ;;  %v5096_v57 = vadd.f32 %v11113_v3, %v11215_v13  ;;  %v5375_v24 = vcombine.low %v5089_v63, %v5090_v8  ;;  %6991 = vmatpush1.bf16.msra.mxu0 %v9208_v62  ;;  %v9210_v62 = vld [vmem:[%s12785_s11 + $0xcc] sm:$0xff]  }
 0x382   : > { %6467 = vrot.lane.b32.xlu0 %v12957_v45, %s9243_s23  ;;  %v5914_v43 = vrot.slane %v11026_v17, 1  ;;  %v11241_v20 = vmul.f32 0.75, %v4841_v60  ;;  %v5392_v52 = vcombine.low %v5093_v47, %v5094_v46  ;;  %v11246_v53 = vmul.f32 0.75, %v4842_v28  ;;  %6992 = vmatprep.subr.bf16.mxu0 %v10603_v58 }
 0x383   : > { %v5376_v38 = vcombine.low %v5091_v32, %v5092_v14  ;;  %v11248_v48 = vmul.f32 0.75, %v4843_v27  ;;  %v5383_v33 = vrot.slane %v5375_v24, %v9758_v30  ;;  %v5393_v3 = vcombine.low %v5095_v26, %v5096_v57 }
 0x384   : > { %v5915_v39 = vsel %vm2241_vm4, %v5913_v55, %v5914_v43  ;;  %v5993_v11 = vsel %vm2241_vm4, %v5914_v43, 0.0  ;;  %v5400_v19 = vrot.slane %v5392_v52, %v9758_v30  ;;  %v11256_v63 = vmul.f32 0.75, %v4844_v54  ;;  %v6460_v55 = vpop.permute.xlu1 %6459 }
 0x385   : > { %v5390_v60 = vrot.slane %v5376_v38, %v9758_v30  ;;  %v6171_v2 = vpack.c.bf16 %v5993_v11, %v5915_v39  ;;  %v5407_v28 = vrot.slane %v5393_v3, %v9758_v30  ;;  %v11259_v27 = vmul.f32 0.75, %v4845_v16 }
 0x386   : > { %v11261_v8 = vmul.f32 0.75, %v4846_v15  ;;  %v11263_v32 = vmul.f32 0.75, %v4847_v0  ;;  %v11268_v45 = vmul.f32 0.75, %v4848_v34  ;;  %v5025_v54 = vadd.f32 %v11241_v20, %v11052_v40 }
 0x387   : > { %v11265_v5 = vcombine.low %v5383_v33, %v5390_v60  ;;  %6187 = vst.msk [vmem:[#allocation3 + $0x18] sm:$0xff] %vm844_vm0, %v6171_v2  ;;  %v5026_v14 = vadd.f32 %v11246_v53, %v11054_v22  ;;  %v11275_v16 = vcombine.low %v5400_v19, %v5407_v28  ;;  %v5027_v15 = vadd.f32 %v11248_v48, %v11056_v29  ;;  %v9209_v29 = vld [vmem:[%s12785_s11 + $0xc4] sm:$0xff]  }
 0x388   : > { %6508 = vst.msk [vmem:[#allocation3 + $0x18] sm:$0xff] %vm6507_vm5, %v6460_v55  ;;  %v5028_v0 = vadd.f32 %v11256_v63, %v11058_v31  ;;  %v5029_v34 = vadd.f32 %v11259_v27, %v11060_v10  ;;  %v5030_v40 = vadd.f32 %v11261_v8, %v11062_v41  ;;  %v5031_v22 = vadd.f32 %v11263_v32, %v11064_v49  ;;  %v12960_v55 = vld [vmem:[#allocation29_spill] sm:$0xff] }
 0x389   : > { %v5032_v47 = vadd.f32 %v11268_v45, %v11066_v42  ;;  %v5409_v46 = vcombine.low %v5025_v54, %v5026_v14  ;;  %v6077_v31 = vpack.c.bf16 %v11275_v16, %v11265_v5  ;;  %v3826_v10 = vrot.slane %v10669_v50, %v9752_v51  ;;  %6993 = vmatpush1.bf16.msra.mxu0 %v9209_v29 }
 0x38a   : > { %v5410_v26 = vcombine.low %v5027_v15, %v5028_v0  ;;  %v12958_v41 = vcombine.high %v10669_v50, %v10669_v50  ;;  %v5426_v42 = vcombine.low %v5029_v34, %v5030_v40  ;;  %v3843_v43 = vcombine.high %v10684_v9, %v10684_v9  ;;  %6994 = vmatprep.subr.bf16.mxu0 %v10603_v58 }
 0x38b   : > { %v5417_v57 = vrot.slane %v5409_v46, %v9758_v30  ;;  %v5427_v24 = vcombine.low %v5031_v22, %v5032_v47  ;;  %6112 = vrot.lane.b32.xlu0 %v6077_v31, %s9243_s23  ;;  %v3842_v52 = vcombine.high %v3826_v10, %v3826_v10  ;;  %v12959_v50 = vcombine.high %v10675_v4, %v10675_v4  ;;  %v12963_v47 = vld [vmem:[#allocation5_spill] sm:$0xff]  ;;  %v12964_v46 = vld [vmem:[#allocation4_spill] sm:$0xff] }
 0x38c   : > { %v3840_v49 = vrot.slane %v12958_v41, %v9752_v51  ;;  %v5424_v38 = vrot.slane %v5410_v26, %v9758_v30  ;;  %v5434_v39 = vrot.slane %v5426_v42, %v9758_v30  ;;  %v4306_v60 = vcombine.high %v10692_v23, %v10692_v23  ;;  %v12967_v26 = vld [vmem:[#allocation28_spill] sm:$0xff] }
 0x38d   : > { %v4304_v3 = vrot.slane %v12959_v50, %v9752_v51  ;;  %v5441_v11 = vrot.slane %v5427_v24, %v9758_v30  ;;  %v4608_v19 = vrot.slane %v10695_v36, %v9754_v25  ;;  %v12961_v4 = vcombine.high %v12960_v55, %v12960_v55  ;;  %6995 = vmatpush1.bf16.msra.mxu0 %v9210_v62  ;;  %v11354_v62 = vpop.permute.xlu1 %6661 }
 0x38e   : > { %v3844_v33 = vcombine.high %v3840_v49, %v3840_v49  ;;  %v11320_v2 = vcombine.low %v5417_v57, %v5424_v38  ;;  %v12962_v14 = vcombine.high %v10695_v36, %v10695_v36  ;;  %v4620_v34 = vrot.slane %v10692_v23, %v9754_v25  ;;  %12969 = vst [vmem:[#allocation29_spill] sm:$0xff] %v11354_v62 }
 0x38f   : > { %v4308_v28 = vcombine.high %v4304_v3, %v4304_v3  ;;  %v4612_v54 = vrot.slane %v12961_v4, %v9754_v25  ;;  %v11330_v0 = vcombine.low %v5434_v39, %v5441_v11  ;;  %v4624_v40 = vrot.slane %v4304_v3, %v9754_v25  ;;  %6996 = vmatprep.subr.bf16.mxu0 %v10603_v58 }
 0x390   : > { %v4616_v15 = vrot.slane %v12962_v14, %v9754_v25  ;;  %v4628_v22 = vrot.slane %v4306_v60, %v9754_v25  ;;  %v12965_v29 = vpack.c.bf16 %v12963_v47, %v12964_v46  ;;  %v12966_v36 = vrot.slane %v12960_v55, %v9754_v25 }
 0x391   : > { %v4632_v31 = vrot.slane %v4308_v28, %v9754_v25  ;;  %v4850_v23 = vsel %vm1590_vm2, %v10684_v9, %v4608_v19  ;;  %v12968_v57 = vcombine.high %v12967_v26, %v12967_v26  ;;  %v6078_v24 = vpack.c.bf16 %v11330_v0, %v11320_v2  ;;  %v6470_v46 = vpop.permute.xlu1 %6469 }
 0x392   : > { %6564 = vrot.lane.b32.xlu0 %v12965_v29, %s9242_s30  ;;  %v4849_v41 = vsel %vm1590_vm2, %v12967_v26, %v12966_v36  ;;  %v4852_v38 = vsel %vm1590_vm2, %v3843_v43, %v4616_v15  ;;  %v4853_v50 = vsel %vm1590_vm2, %v3826_v10, %v4620_v34  ;;  %v4854_v3 = vsel %vm1590_vm2, %v3840_v49, %v4624_v40  ;;  %v12971_v40 = vld [vmem:[#allocation9_spill] sm:$0xff] }
 0x393   : > { %v4851_v42 = vsel %vm1590_vm2, %v12968_v57, %v4612_v54  ;;  %v4855_v9 = vsel %vm1590_vm2, %v3842_v52, %v4628_v22  ;;  %v4856_v39 = vsel %vm1590_vm2, %v3844_v33, %v4632_v31  ;;  %v11362_v11 = vmul.f32 0.25, %v4849_v41 }
 0x394   : > { %v11364_v60 = vmul.f32 0.25, %v4850_v23  ;;  %v11366_v19 = vmul.f32 0.25, %v4851_v42  ;;  %v11368_v28 = vmul.f32 0.25, %v4852_v38  ;;  %v11370_v55 = vmul.f32 0.25, %v4853_v50 }
 0x395   : > { %v11372_v43 = vmul.f32 0.25, %v4854_v3  ;;  %v11375_v10 = vmul.f32 0.25, %v4855_v9  ;;  %v11377_v58 = vmul.f32 0.25, %v4856_v39  ;;  %v5097_v49 = vadd.f32 %v11241_v20, %v11362_v11 }
 0x396   : > { %6114 = vrot.lane.b32.xlu0 %v6078_v24, %s9243_s23  ;;  %v5098_v52 = vadd.f32 %v11246_v53, %v11364_v60  ;;  %v5099_v33 = vadd.f32 %v11248_v48, %v11366_v19  ;;  %v5100_v4 = vadd.f32 %v11256_v63, %v11368_v28  ;;  %v5101_v54 = vadd.f32 %v11259_v27, %v11370_v55  ;;  %v12970_v53 = vld [vmem:[#allocation8_spill] sm:$0xff]  ;;  %v12972_v27 = vld [vmem:[#allocation7_spill] sm:$0xff] }
 0x397   : > { %v5102_v14 = vadd.f32 %v11261_v8, %v11372_v43  ;;  %v5103_v15 = vadd.f32 %v11263_v32, %v11375_v10  ;;  %v5104_v20 = vadd.f32 %v11268_v45, %v11377_v58  ;;  %v6530_v22 = vpack.c.bf16 %v12971_v40, %v12970_v53  ;;  %v12973_v8 = vld [vmem:[#allocation6_spill] sm:$0xff] }
 0x398   : > { %v5443_v34 = vcombine.low %v5097_v49, %v5098_v52  ;;  %v5444_v48 = vcombine.low %v5099_v33, %v5100_v4  ;;  %v11397_v63 = vmul.f32 0.75, %v4849_v41  ;;  %v11399_v29 = vmul.f32 0.75, %v4850_v23  ;;  %v12978_v53 = vld [vmem:[#allocation10_spill] sm:$0xff] }
 0x399   : > { %v5460_v47 = vcombine.low %v5101_v54, %v5102_v14  ;;  %v12974_v31 = vpack.c.bf16 %v12972_v27, %v12973_v8  ;;  %v5461_v36 = vcombine.low %v5103_v15, %v5104_v20  ;;  %v11406_v45 = vmul.f32 0.75, %v4851_v42  ;;  %v12980_v27 = vld [vmem:[#allocation30_spill] sm:$0xff] }
 0x39a   : > { %v5451_v32 = vrot.slane %v5443_v34, %v9758_v30  ;;  %v11408_v26 = vmul.f32 0.75, %v4852_v38  ;;  %v5458_v57 = vrot.slane %v5444_v48, %v9758_v30  ;;  %v11412_v41 = vmul.f32 0.75, %v4853_v50 }
 0x39b   : > { %6566 = vrot.lane.b32.xlu0 %v12974_v31, %s9242_s30  ;;  %v5468_v24 = vrot.slane %v5460_v47, %v9758_v30  ;;  %v11414_v23 = vmul.f32 0.75, %v4854_v3  ;;  %v5475_v49 = vrot.slane %v5461_v36, %v9758_v30  ;;  %v11417_v52 = vmul.f32 0.75, %v4855_v9 }
 0x39c   : > { %v11419_v33 = vmul.f32 0.75, %v4856_v39  ;;  %v5033_v42 = vadd.f32 %v11397_v63, %v11199_v1  ;;  %v11423_v4 = vcombine.low %v5451_v32, %v5458_v57  ;;  %v5034_v38 = vadd.f32 %v11399_v29, %v11203_v18  ;;  %v11440_v18 = vpop.permute.xlu1 %6663 }
 0x39d   : > { %v5035_v50 = vadd.f32 %v11406_v45, %v11205_v7  ;;  %v5036_v3 = vadd.f32 %v11408_v26, %v11207_v6  ;;  %v11431_v54 = vcombine.low %v5468_v24, %v5475_v49  ;;  %v5037_v9 = vadd.f32 %v11412_v41, %v11209_v12  ;;  %12977 = vst [vmem:[#allocation28_spill] sm:$0xff] %v11440_v18 }
 0x39e   : > { %12975 = vst [vmem:[#allocation5_spill] sm:$0xff] %v11423_v4  ;;  %v5038_v39 = vadd.f32 %v11414_v23, %v11211_v44  ;;  %v5039_v1 = vadd.f32 %v11417_v52, %v11213_v35  ;;  %v5928_v14 = vrot.slane %v11423_v4, 1  ;;  %v5040_v7 = vadd.f32 %v11419_v33, %v11215_v13  ;;  %v12979_v44 = vld [vmem:[#allocation12_spill] sm:$0xff] }
 0x39f   : > { %12976 = vst [vmem:[#allocation4_spill] sm:$0xff] %v11431_v54  ;;  %v5477_v15 = vcombine.low %v5033_v42, %v5034_v38  ;;  %v5478_v6 = vcombine.low %v5035_v50, %v5036_v3  ;;  %v5929_v20 = vrot.slane %v11431_v54, 1  ;;  %v6079_v12 = vpack.c.bf16 %v11431_v54, %v11423_v4  ;;  %v12983_v50 = vld [vmem:[#allocation34_spill] sm:$0xff] }
 0x3a0   : > { %v5494_v34 = vcombine.low %v5037_v9, %v5038_v39  ;;  %v5495_v47 = vcombine.low %v5039_v1, %v5040_v7  ;;  %v3875_v8 = vrot.slane %v12980_v27, %v9752_v51  ;;  %v12981_v36 = vcombine.high %v12980_v27, %v12980_v27  ;;  %v12984_v39 = vld [vmem:[#allocation32_spill] sm:$0xff]  ;;  %v12986_v7 = vld [vmem:[#allocation35_spill] sm:$0xff] }
 0x3a1   : > { %v5485_v35 = vrot.slane %v5477_v15, %v9758_v30  ;;  %v5492_v48 = vrot.slane %v5478_v6, %v9758_v30  ;;  %v5930_v13 = vsel %vm2241_vm4, %v5928_v14, %v5929_v20  ;;  %v5998_v31 = vsel %vm2241_vm4, %v5929_v20, 0.0  ;;  %6116 = vrot.lane.b32.xlu0 %v6079_v12, %s9243_s23  ;;  %v6472_v12 = vpop.permute.xlu1 %6471 }
 0x3a2   : > { %v5502_v32 = vrot.slane %v5494_v34, %v9758_v30  ;;  %v3889_v57 = vrot.slane %v12981_v36, %v9752_v51  ;;  %v6176_v24 = vpack.c.bf16 %v5998_v31, %v5930_v13  ;;  %v5509_v42 = vrot.slane %v5495_v47, %v9758_v30  ;;  %v12988_v34 = vld [vmem:[#allocation36_spill] sm:$0xff] }
 0x3a3   : > { %v11461_v49 = vcombine.low %v5485_v35, %v5492_v48  ;;  %v3891_v38 = vcombine.high %v3875_v8, %v3875_v8  ;;  %v3892_v3 = vcombine.high %v12983_v50, %v12983_v50  ;;  %v12985_v1 = vcombine.high %v12984_v39, %v12984_v39  ;;  %v12989_v48 = vld [vmem:[#allocation33_spill] sm:$0xff] }
 0x3a4   : > { %v3893_v9 = vcombine.high %v3889_v57, %v3889_v57  ;;  %v4355_v15 = vcombine.high %v12986_v7, %v12986_v7  ;;  %6192 = vst.msk [vmem:[#allocation3 + $0x68] sm:$0xff] %vm844_vm0, %v6176_v24  ;;  %v11473_v6 = vcombine.low %v5502_v32, %v5509_v42  ;;  %v4640_v35 = vrot.slane %v12988_v34, %v9754_v25 }
 0x3a5   : > { %12982 = vst [vmem:[#allocation8_spill] sm:$0xff] %v11461_v49  ;;  %v4353_v14 = vrot.slane %v12985_v1, %v9752_v51  ;;  %v5931_v20 = vrot.slane %v11461_v49, 1  ;;  %v12990_v47 = vcombine.high %v12989_v48, %v12989_v48  ;;  %6513 = vst.msk [vmem:[#allocation3 + $0x68] sm:$0xff] %vm6507_vm5, %v6470_v46  ;;  %6568 = vrot.lane.b32.xlu0 %v6530_v22, %s9242_s30  ;;  %v12993_v1 = vld [vmem:[#allocation31_spill] sm:$0xff] }
 0x3a6   : > { %12987 = vst [vmem:[#allocation9_spill] sm:$0xff] %v11473_v6  ;;  %v12991_v31 = vcombine.high %v12988_v34, %v12988_v34  ;;  %v4652_v36 = vrot.slane %v12986_v7, %v9754_v25  ;;  %v5932_v42 = vrot.slane %v11473_v6, 1  ;;  %v6080_v39 = vpack.c.bf16 %v11473_v6, %v11461_v49 }
 0x3a7   : > { %v4644_v27 = vrot.slane %v12990_v47, %v9754_v25  ;;  %v4357_v13 = vcombine.high %v4353_v14, %v4353_v14  ;;  %v4656_v24 = vrot.slane %v4353_v14, %v9754_v25  ;;  %v4660_v46 = vrot.slane %v4355_v15, %v9754_v25 }
 0x3a8   : > { %v4648_v32 = vrot.slane %v12991_v31, %v9754_v25  ;;  %v12992_v22 = vrot.slane %v12989_v48, %v9754_v25  ;;  %v4858_v7 = vsel %vm1590_vm2, %v12983_v50, %v4640_v35  ;;  %v12994_v14 = vcombine.high %v12993_v1, %v12993_v1 }
 0x3a9   : > { %v4664_v34 = vrot.slane %v4357_v13, %v9754_v25  ;;  %v5933_v15 = vsel %vm2241_vm4, %v5931_v20, %v5932_v42  ;;  %v5999_v62 = vsel %vm2241_vm4, %v5932_v42, 0.0  ;;  %v4861_v48 = vsel %vm1590_vm2, %v3875_v8, %v4652_v36  ;;  %6118 = vrot.lane.b32.xlu0 %v6080_v39, %s9243_s23 }
 0x3aa   : > { %v4857_v47 = vsel %vm1590_vm2, %v12993_v1, %v12992_v22  ;;  %v4859_v31 = vsel %vm1590_vm2, %v12994_v14, %v4644_v27  ;;  %v4860_v40 = vsel %vm1590_vm2, %v3892_v3, %v4648_v32  ;;  %v4862_v22 = vsel %vm1590_vm2, %v3889_v57, %v4656_v24  ;;  %v11517_v27 = vpop.permute.xlu1 %6665  ;;  %v6557_v57 = vpop.permute.xlu0 %6556 }
 0x3ab   : > { %v6177_v6 = vpack.c.bf16 %v5999_v62, %v5933_v15  ;;  %v4863_v50 = vsel %vm1590_vm2, %v3891_v38, %v4660_v46  ;;  %v4864_v35 = vsel %vm1590_vm2, %v3893_v9, %v4664_v34  ;;  %v11515_v13 = vmul.f32 0.25, %v4857_v47  ;;  %12995 = vst [vmem:[#allocation7_spill] sm:$0xff] %v11517_v27  ;;  %6605 = vst.msk [vmem:[#allocation3 + $0x18] sm:$0xff] %vm6604_vm6, %v6557_v57 }
 0x3ac   : > { %v11519_v3 = vmul.f32 0.25, %v4858_v7  ;;  %v11521_v20 = vmul.f32 0.25, %v4859_v31  ;;  %v11523_v32 = vmul.f32 0.25, %v4860_v40  ;;  %v11525_v8 = vmul.f32 0.25, %v4861_v48 }
 0x3ad   : > { %6193 = vst.msk [vmem:[#allocation3 + $0x78] sm:$0xff] %vm844_vm0, %v6177_v6  ;;  %v11528_v62 = vmul.f32 0.25, %v4862_v22  ;;  %v11530_v38 = vmul.f32 0.25, %v4863_v50  ;;  %v11532_v9 = vmul.f32 0.25, %v4864_v35  ;;  %v5105_v36 = vadd.f32 %v11397_v63, %v11515_v13 }
 0x3ae   : > { %6514 = vst.msk [vmem:[#allocation3 + $0x78] sm:$0xff] %vm6507_vm5, %v6472_v12  ;;  %v5106_v24 = vadd.f32 %v11399_v29, %v11519_v3  ;;  %v5107_v42 = vadd.f32 %v11406_v45, %v11521_v20  ;;  %v5108_v6 = vadd.f32 %v11408_v26, %v11523_v32  ;;  %v5109_v39 = vadd.f32 %v11412_v41, %v11525_v8 }
 0x3af   : > { %v12996_v46 = vpack.c.bf16 %v12979_v44, %v12978_v53  ;;  %v5110_v63 = vadd.f32 %v11414_v23, %v11528_v62  ;;  %v5111_v29 = vadd.f32 %v11417_v52, %v11530_v38  ;;  %v5112_v45 = vadd.f32 %v11419_v33, %v11532_v9 }
 0x3b0   : > { %v11555_v12 = vmul.f32 0.75, %v4857_v47  ;;  %v5511_v26 = vcombine.low %v5105_v36, %v5106_v24  ;;  %v5512_v1 = vcombine.low %v5107_v42, %v5108_v6  ;;  %v11557_v34 = vmul.f32 0.75, %v4858_v7  ;;  %v11571_v36 = vpop.permute.xlu0 %6653 }
 0x3b1   : > { %6570 = vrot.lane.b32.xlu0 %v12996_v46, %s9242_s30  ;;  %v11559_v41 = vmul.f32 0.75, %v4859_v31  ;;  %v5528_v14 = vcombine.low %v5109_v39, %v5110_v63  ;;  %v5529_v53 = vcombine.low %v5111_v29, %v5112_v45  ;;  %v11561_v44 = vmul.f32 0.75, %v4860_v40  ;;  %v6474_v46 = vpop.permute.xlu1 %6473  ;;  %6702 = vst.msk [vmem:[#allocation3 + $0x18] sm:$0xff] %vm6701_vm7, %v11571_v36 }
 0x3b2   : > { %v11563_v15 = vmul.f32 0.75, %v4861_v48  ;;  %v5519_v23 = vrot.slane %v5511_v26, %v9758_v30  ;;  %v5526_v52 = vrot.slane %v5512_v1, %v9758_v30  ;;  %v11567_v33 = vmul.f32 0.75, %v4862_v22 }
 0x3b3   : > { %v11569_v47 = vmul.f32 0.75, %v4863_v50  ;;  %v5536_v7 = vrot.slane %v5528_v14, %v9758_v30  ;;  %v5543_v31 = vrot.slane %v5529_v53, %v9758_v30  ;;  %v11575_v24 = vmul.f32 0.75, %v4864_v35 }
 0x3b4   : > { %v5041_v40 = vadd.f32 %v11555_v12, %v11362_v11  ;;  %v11579_v48 = vcombine.low %v5519_v23, %v5526_v52  ;;  %v5042_v42 = vadd.f32 %v11557_v34, %v11364_v60  ;;  %v5043_v22 = vadd.f32 %v11559_v41, %v11366_v19  ;;  %v11608_v53 = vpop.permute.xlu0 %6558 }
 0x3b5   : > { %v5044_v50 = vadd.f32 %v11561_v44, %v11368_v28  ;;  %v11587_v6 = vcombine.low %v5536_v7, %v5543_v31  ;;  %v5045_v35 = vadd.f32 %v11563_v15, %v11370_v55  ;;  %v5046_v39 = vadd.f32 %v11567_v33, %v11372_v43  ;;  %v11601_v55 = vpop.permute.xlu1 %6667 }
 0x3b6   : > { %12997 = vst [vmem:[#allocation6_spill] sm:$0xff] %v11579_v48  ;;  %v5047_v11 = vadd.f32 %v11569_v47, %v11375_v10  ;;  %v5934_v63 = vrot.slane %v11579_v48, 1  ;;  %v5048_v60 = vadd.f32 %v11575_v24, %v11377_v58  ;;  %v5545_v19 = vcombine.low %v5041_v40, %v5042_v42  ;;  %12999 = vst [vmem:[#allocation12_spill] sm:$0xff] %v11601_v55  ;;  %v13000_v58 = vld [vmem:[#allocation37_spill] sm:$0xff] }
 0x3b7   : > { %12998 = vst [vmem:[#allocation10_spill] sm:$0xff] %v11587_v6  ;;  %v5546_v29 = vcombine.low %v5043_v22, %v5044_v50  ;;  %v5935_v28 = vrot.slane %v11587_v6, 1  ;;  %v6081_v45 = vpack.c.bf16 %v11587_v6, %v11579_v48  ;;  %v5562_v26 = vcombine.low %v5045_v35, %v5046_v39  ;;  %v13003_v35 = vld [vmem:[#allocation41_spill] sm:$0xff] }
 0x3b8   : > { %v5553_v43 = vrot.slane %v5545_v19, %v9758_v30  ;;  %v5563_v1 = vcombine.low %v5047_v11, %v5048_v60  ;;  %v3924_v14 = vrot.slane %v13000_v58, %v9752_v51  ;;  %v13001_v31 = vcombine.high %v13000_v58, %v13000_v58 }
 0x3b9   : > { %v5560_v10 = vrot.slane %v5546_v29, %v9758_v30  ;;  %v5936_v23 = vsel %vm2241_vm4, %v5934_v63, %v5935_v28  ;;  %v6000_v52 = vsel %vm2241_vm4, %v5935_v28, 0.0  ;;  %6120 = vrot.lane.b32.xlu0 %v6081_v45, %s9243_s23  ;;  %v5570_v7 = vrot.slane %v5562_v26, %v9758_v30  ;;  %v13004_v63 = vld [vmem:[#allocation39_spill] sm:$0xff]  ;;  %v13006_v29 = vld [vmem:[#allocation42_spill] sm:$0xff]  ;;  %v6476_v27 = vpop.permute.xlu1 %6475 }
 0x3ba   : > { %v3938_v40 = vrot.slane %v13001_v31, %v9752_v51  ;;  %v6178_v42 = vpack.c.bf16 %v6000_v52, %v5936_v23  ;;  %v5577_v22 = vrot.slane %v5563_v1, %v9758_v30  ;;  %v3940_v50 = vcombine.high %v3924_v14, %v3924_v14  ;;  %v13009_v1 = vld [vmem:[#allocation40_spill] sm:$0xff]  ;;  %v13011_v52 = vld [vmem:[#allocation13_spill] sm:$0xff]  ;;  %v13012_v31 = vld [vmem:[#allocation11_spill] sm:$0xff] }
 0x3bb   : > { %v11618_v57 = vcombine.low %v5553_v43, %v5560_v10  ;;  %v3941_v39 = vcombine.high %v13003_v35, %v13003_v35  ;;  %v13005_v60 = vcombine.high %v13004_v63, %v13004_v63  ;;  %v4404_v28 = vcombine.high %v13006_v29, %v13006_v29  ;;  %v13008_v43 = vld [vmem:[#allocation43_spill] sm:$0xff] }
 0x3bc   : > { %v3942_v11 = vcombine.high %v3938_v40, %v3938_v40  ;;  %6194 = vst.msk [vmem:[#allocation3 + $0x88] sm:$0xff] %vm844_vm0, %v6178_v42  ;;  %v11630_v45 = vcombine.low %v5570_v7, %v5577_v22  ;;  %v4672_v10 = vrot.slane %v13008_v43, %v9754_v25  ;;  %v13010_v58 = vcombine.high %v13009_v1, %v13009_v1 }
 0x3bd   : > { %13002 = vst [vmem:[#allocation30_spill] sm:$0xff] %v11618_v57  ;;  %v4402_v19 = vrot.slane %v13005_v60, %v9752_v51  ;;  %v5937_v26 = vrot.slane %v11618_v57, 1  ;;  %6515 = vst.msk [vmem:[#allocation3 + $0x88] sm:$0xff] %vm6507_vm5, %v6474_v46  ;;  %v13013_v63 = vpack.c.bf16 %v13011_v52, %v13012_v31  ;;  %v13014_v7 = vcombine.high %v13008_v43, %v13008_v43 }
 0x3be   : > { %13007 = vst [vmem:[#allocation34_spill] sm:$0xff] %v11630_v45  ;;  %v4676_v23 = vrot.slane %v13010_v58, %v9754_v25  ;;  %v4684_v60 = vrot.slane %v13006_v29, %v9754_v25  ;;  %v5938_v58 = vrot.slane %v11630_v45, 1  ;;  %v6082_v46 = vpack.c.bf16 %v11630_v45, %v11618_v57 }
 0x3bf   : > { %6572 = vrot.lane.b32.xlu0 %v13013_v63, %s9242_s30  ;;  %v4406_v42 = vcombine.high %v4402_v19, %v4402_v19  ;;  %v4680_v22 = vrot.slane %v13014_v7, %v9754_v25  ;;  %v4688_v55 = vrot.slane %v4402_v19, %v9754_v25  ;;  %v4692_v52 = vrot.slane %v4404_v28, %v9754_v25  ;;  %v13016_v63 = vld [vmem:[#allocation38_spill] sm:$0xff]  ;;  %v11660_v7 = vpop.permute.xlu0 %6461 }
 0x3c0   : > { %v13015_v31 = vrot.slane %v13009_v1, %v9754_v25  ;;  %v4866_v19 = vsel %vm1590_vm2, %v13003_v35, %v4672_v10  ;;  %v13017_v6 = vcombine.high %v13016_v63, %v13016_v63  ;;  %v5939_v57 = vsel %vm2241_vm4, %v5937_v26, %v5938_v58 }
 0x3c1   : > { %v4696_v29 = vrot.slane %v4406_v42, %v9754_v25  ;;  %v4868_v28 = vsel %vm1590_vm2, %v3941_v39, %v4680_v22  ;;  %v6001_v1 = vsel %vm2241_vm4, %v5938_v58, 0.0  ;;  %v4870_v48 = vsel %vm1590_vm2, %v3938_v40, %v4688_v55 }
 0x3c2   : > { %v4865_v43 = vsel %vm1590_vm2, %v13016_v63, %v13015_v31  ;;  %v4867_v45 = vsel %vm1590_vm2, %v13017_v6, %v4676_v23  ;;  %v4869_v31 = vsel %vm1590_vm2, %v3924_v14, %v4684_v60  ;;  %v6179_v49 = vpack.c.bf16 %v6001_v1, %v5939_v57 }
 0x3c3   : > { %6122 = vrot.lane.b32.xlu0 %v6082_v46, %s9243_s23  ;;  %v4871_v35 = vsel %vm1590_vm2, %v3940_v50, %v4692_v52  ;;  %v4872_v10 = vsel %vm1590_vm2, %v3942_v11, %v4696_v29  ;;  %v11677_v42 = vmul.f32 0.25, %v4865_v43  ;;  %v11679_v6 = vmul.f32 0.25, %v4866_v19  ;;  %v11697_v50 = vpop.permute.xlu1 %6669  ;;  %v11707_v58 = vpop.permute.xlu0 %6655  ;;  %v13020_v46 = vld [vmem:[#allocation14_spill] sm:$0xff]  ;;  %v13023_v29 = vld [vmem:[#allocation17_spill] sm:$0xff] }
 0x3c4   : > { %v11681_v39 = vmul.f32 0.25, %v4867_v45  ;;  %v11683_v26 = vmul.f32 0.25, %v4868_v28  ;;  %v11685_v23 = vmul.f32 0.25, %v4869_v31  ;;  %6195 = vst.msk [vmem:[#allocation3 + $0x98] sm:$0xff] %vm844_vm0, %v6179_v49  ;;  %v11688_v55 = vmul.f32 0.25, %v4870_v48  ;;  %13018 = vst [vmem:[#allocation32_spill] sm:$0xff] %v11697_v50 }
 0x3c5   : > { %v11690_v14 = vmul.f32 0.25, %v4871_v35  ;;  %v11692_v40 = vmul.f32 0.25, %v4872_v10  ;;  %v5113_v57 = vadd.f32 %v11555_v12, %v11677_v42  ;;  %6516 = vst.msk [vmem:[#allocation3 + $0x98] sm:$0xff] %vm6507_vm5, %v6476_v27  ;;  %v5114_v11 = vadd.f32 %v11557_v34, %v11679_v6  ;;  %v13019_v12 = vld [vmem:[#allocation15_spill] sm:$0xff] }
 0x3c6   : > { %v5115_v22 = vadd.f32 %v11559_v41, %v11681_v39  ;;  %v5116_v49 = vadd.f32 %v11561_v44, %v11683_v26  ;;  %v5117_v60 = vadd.f32 %v11563_v15, %v11685_v23  ;;  %v13021_v27 = vpack.c.bf16 %v13019_v12, %v13020_v46  ;;  %v13022_v15 = vld [vmem:[#allocation16_spill] sm:$0xff] }
 0x3c7   : > { %v5118_v52 = vadd.f32 %v11567_v33, %v11688_v55  ;;  %v5119_v34 = vadd.f32 %v11569_v47, %v11690_v14  ;;  %v5120_v41 = vadd.f32 %v11575_v24, %v11692_v40  ;;  %v5579_v44 = vcombine.low %v5113_v57, %v5114_v11 }
 0x3c8   : > { %6574 = vrot.lane.b32.xlu0 %v13021_v27, %s9242_s30  ;;  %v5580_v63 = vcombine.low %v5115_v22, %v5116_v49  ;;  %v6534_v1 = vpack.c.bf16 %v13023_v29, %v13022_v15  ;;  %v11723_v12 = vmul.f32 0.75, %v4865_v43  ;;  %v11725_v33 = vmul.f32 0.75, %v4866_v19  ;;  %v13034_v29 = vld [vmem:[#allocation46_spill] sm:$0xff] }
 0x3c9   : > { %v5596_v46 = vcombine.low %v5117_v60, %v5118_v52  ;;  %v5597_v27 = vcombine.low %v5119_v34, %v5120_v41  ;;  %v11727_v50 = vmul.f32 0.75, %v4867_v45  ;;  %v5587_v47 = vrot.slane %v5579_v44, %v9758_v30  ;;  %v6478_v45 = vpop.permute.xlu1 %6477 }
 0x3ca   : > { %v5594_v24 = vrot.slane %v5580_v63, %v9758_v30  ;;  %v11731_v57 = vmul.f32 0.75, %v4868_v28  ;;  %v11733_v11 = vmul.f32 0.75, %v4869_v31  ;;  %v11737_v43 = vmul.f32 0.75, %v4870_v48  ;;  %v11749_v31 = vpop.permute.xlu0 %6560 }
 0x3cb   : > { %v5604_v36 = vrot.slane %v5596_v46, %v9758_v30  ;;  %v5611_v22 = vrot.slane %v5597_v27, %v9758_v30  ;;  %v11739_v49 = vmul.f32 0.75, %v4871_v35  ;;  %v11743_v60 = vmul.f32 0.75, %v4872_v10 }
 0x3cc   : > { %v11741_v19 = vcombine.low %v5587_v47, %v5594_v24  ;;  %v5049_v52 = vadd.f32 %v11723_v12, %v11515_v13  ;;  %v5050_v28 = vadd.f32 %v11725_v33, %v11519_v3  ;;  %v5051_v48 = vadd.f32 %v11727_v50, %v11521_v20 }
 0x3cd   : > { %v11751_v34 = vcombine.low %v5604_v36, %v5611_v22  ;;  %v5052_v35 = vadd.f32 %v11731_v57, %v11523_v32  ;;  %v5053_v10 = vadd.f32 %v11733_v11, %v11525_v8  ;;  %v5054_v13 = vadd.f32 %v11737_v43, %v11528_v62  ;;  %v9201_v62 = vld [vmem:[%s12785_s11 + $0x68] ss:$0 sps:$4 sm:$0xff]  }
 0x3ce   : > { %13024 = vst [vmem:[#allocation35_spill] sm:$0xff] %v11741_v19  ;;  %v5940_v41 = vrot.slane %v11741_v19, 1  ;;  %v5055_v3 = vadd.f32 %v11739_v49, %v11530_v38  ;;  %v5056_v44 = vadd.f32 %v11743_v60, %v11532_v9  ;;  %v5613_v32 = vcombine.low %v5049_v52, %v5050_v28  ;;  %v11779_v52 = vld [vmem:[#allocation3 + $0x18] sm:$0xff] }
 0x3cf   : > { %13025 = vst [vmem:[#allocation36_spill] sm:$0xff] %v11751_v34  ;;  %v5941_v63 = vrot.slane %v11751_v34, 1  ;;  %v6083_v20 = vpack.c.bf16 %v11751_v34, %v11741_v19  ;;  %v5614_v46 = vcombine.low %v5051_v48, %v5052_v35  ;;  %v5630_v27 = vcombine.low %v5053_v10, %v5054_v13  ;;  %v11781_v48 = vpop.permute.xlu1 %6671  ;;  %8378 = vmatprep.mubr.msk.bf16.mxu0 %vm3540_vm9, %v11779_v52 }
 0x3d0   : > { %v5631_v8 = vcombine.low %v5055_v3, %v5056_v44  ;;  %v5916_v47 = vrot.slane %v11119_v61, 1  ;;  %v5917_v24 = vrot.slane %v11128_v56, 1  ;;  %v5621_v36 = vrot.slane %v5613_v32, %v9758_v30  ;;  %13026 = vst [vmem:[#allocation33_spill] sm:$0xff] %v11781_v48 }
 0x3d1   : > { %v5942_v38 = vsel %vm2241_vm4, %v5940_v41, %v5941_v63  ;;  %v6002_v9 = vsel %vm2241_vm4, %v5941_v63, 0.0  ;;  %6124 = vrot.lane.b32.xlu0 %v6083_v20, %s9243_s23  ;;  %v5628_v22 = vrot.slane %v5614_v46, %v9758_v30  ;;  %v5638_v35 = vrot.slane %v5630_v27, %v9758_v30  ;;  %v11786_v41 = vpop.permute.xlu0 %6463  ;;  %v11795_v46 = vld [vmem:[#allocation2] sm:$0xff]  ;;  %v13029_v27 = vld [vmem:[#allocation18_spill] sm:$0xff] }
 0x3d2   : > { %v6180_v28 = vpack.c.bf16 %v6002_v9, %v5942_v38  ;;  %v5645_v10 = vrot.slane %v5631_v8, %v9758_v30  ;;  %v5918_v13 = vsel %vm2241_vm4, %v5916_v47, %v5917_v24  ;;  %v5994_v44 = vsel %vm2241_vm4, %v5917_v24, 0.0  ;;  %3541 = vst.msk [vmem:[#allocation3 + $0x8] sm:$0xff] %vm3540_vm9, %v11795_v46  ;;  %3544 = vst.msk [vmem:[#allocation3 + $0x118] sm:$0xff] %vm3540_vm9, %v11795_v46  ;;  %v13030_v8 = vld [vmem:[#allocation19_spill] sm:$0xff] }
 0x3d3   : > { %v11788_v3 = vcombine.low %v5621_v36, %v5628_v22  ;;  %v6172_v20 = vpack.c.bf16 %v5994_v44, %v5918_v13  ;;  %v7261_v32 = vsel %vm6966_vm8, %v9201_v62, 0  ;;  %v6535_v47 = vpack.c.bf16 %v13030_v8, %v13029_v27  ;;  %v13031_v62 = vld [vmem:[#allocation44_spill] sm:$0xff]  ;;  %v13037_v27 = vld [vmem:[#allocation50_spill] sm:$0xff] }
 0x3d4   : > { %6196 = vst.msk [vmem:[#allocation3 + $0xa8] sm:$0xff] %vm844_vm0, %v6180_v28  ;;  %v11792_v63 = vcombine.low %v5638_v35, %v5645_v10  ;;  %7290 = vmatpush1.bf16.msra.mxu1 %v7261_v32  ;;  %v3973_v38 = vrot.slane %v13031_v62, %v9752_v51  ;;  %v13032_v9 = vcombine.high %v13031_v62, %v13031_v62  ;;  %v13033_v22 = vld [vmem:[#allocation48_spill] sm:$0xff]  ;;  %v13036_v10 = vld [vmem:[#allocation49_spill] sm:$0xff]  ;;  %v13038_v62 = vld [vmem:[#allocation47_spill] sm:$0xff] }
 0x3d5   : > { %13027 = vst [vmem:[#allocation31_spill] sm:$0xff] %v11788_v3  ;;  %6517 = vst.msk [vmem:[#allocation3 + $0xa8] sm:$0xff] %vm6507_vm5, %v6478_v45  ;;  %6576 = vrot.lane.b32.xlu0 %v6534_v1, %s9242_s30  ;;  %v5943_v24 = vrot.slane %v11788_v3, 1  ;;  %v3990_v28 = vcombine.high %v13033_v22, %v13033_v22  ;;  %v13035_v1 = vcombine.high %v13034_v29, %v13034_v29  ;;  %v11845_v34 = vpop.permute.xlu0 %6657 }
 0x3d6   : > { %13028 = vst [vmem:[#allocation37_spill] sm:$0xff] %v11792_v63  ;;  %v3987_v36 = vrot.slane %v13032_v9, %v9752_v51  ;;  %v5944_v45 = vrot.slane %v11792_v63, 1  ;;  %v6084_v15 = vpack.c.bf16 %v11792_v63, %v11788_v3  ;;  %6188 = vst.msk [vmem:[#allocation3 + $0x28] sm:$0xff] %vm844_vm0, %v6172_v20  ;;  %v4453_v13 = vcombine.high %v13036_v10, %v13036_v10 }
 0x3d7   : > { %v4451_v35 = vrot.slane %v13035_v1, %v9752_v51  ;;  %6509 = vst.msk [vmem:[#allocation3 + $0x28] sm:$0xff] %vm6507_vm5, %v11660_v7  ;;  %v3989_v44 = vcombine.high %v3973_v38, %v3973_v38  ;;  %v4704_v8 = vrot.slane %v13037_v27, %v9754_v25  ;;  %v13039_v20 = vcombine.high %v13038_v62, %v13038_v62  ;;  %v6480_v1 = vpop.permute.xlu1 %6479 }
 0x3d8   : > { %v3991_v32 = vcombine.high %v3987_v36, %v3987_v36  ;;  %v5945_v48 = vsel %vm2241_vm4, %v5943_v24, %v5944_v45  ;;  %v6003_v29 = vsel %vm2241_vm4, %v5944_v45, 0.0  ;;  %6606 = vst.msk [vmem:[#allocation3 + $0x28] sm:$0xff] %vm6604_vm6, %v11608_v53  ;;  %v13040_v7 = vcombine.high %v13037_v27, %v13037_v27 }
 0x3d9   : > { %v4708_v9 = vrot.slane %v13039_v20, %v9754_v25  ;;  %v4455_v63 = vcombine.high %v4451_v35, %v4451_v35  ;;  %v6181_v19 = vpack.c.bf16 %v6003_v29, %v5945_v48  ;;  %6126 = vrot.lane.b32.xlu0 %v6084_v15, %s9243_s23  ;;  %6703 = vst.msk [vmem:[#allocation3 + $0x28] sm:$0xff] %vm6701_vm7, %v11707_v58 }
 0x3da   : > { %v4712_v3 = vrot.slane %v13040_v7, %v9754_v25  ;;  %v4716_v24 = vrot.slane %v13036_v10, %v9754_v25  ;;  %v4720_v45 = vrot.slane %v4451_v35, %v9754_v25  ;;  %v4724_v53 = vrot.slane %v4453_v13, %v9754_v25  ;;  %v13042_v7 = vld [vmem:[#allocation45_spill] sm:$0xff] }
 0x3db   : > { %v4728_v20 = vrot.slane %v4455_v63, %v9754_v25  ;;  %v13041_v27 = vrot.slane %v13038_v62, %v9754_v25  ;;  %v4874_v15 = vsel %vm1590_vm2, %v13033_v22, %v4704_v8  ;;  %v13043_v58 = vcombine.high %v13042_v7, %v13042_v7  ;;  %6197 = vst.msk [vmem:[#allocation3 + $0xb8] sm:$0xff] %vm844_vm0, %v6181_v19  ;;  %v6719_v35 = vld [vmem:[#allocation3 + $0x8] sm:$0xff] }
 0x3dc   : > { %v4876_v13 = vsel %vm1590_vm2, %v3990_v28, %v4712_v3  ;;  %v4877_v63 = vsel %vm1590_vm2, %v3973_v38, %v4716_v24  ;;  %v4878_v62 = vsel %vm1590_vm2, %v3987_v36, %v4720_v45  ;;  %v4879_v29 = vsel %vm1590_vm2, %v3989_v44, %v4724_v53  ;;  %6518 = vst.msk [vmem:[#allocation3 + $0xb8] sm:$0xff] %vm6507_vm5, %v6480_v1  ;;  %v11892_v44 = vpop.permute.xlu1 %6673 }
 0x3dd   : > { %v4873_v48 = vsel %vm1590_vm2, %v13042_v7, %v13041_v27  ;;  %v4875_v10 = vsel %vm1590_vm2, %v13043_v58, %v4708_v9  ;;  %8408 = vmatprep.mubr.msk.bf16.mxu1 %vm3540_vm9, %v6719_v35  ;;  %v4880_v22 = vsel %vm1590_vm2, %v3991_v32, %v4728_v20  ;;  %v11876_v9 = vmul.f32 0.25, %v4874_v15  ;;  %v11880_v27 = vpop.permute.xlu0 %6465  ;;  %6578 = vrot.lane.b32.xlu0 %v6535_v47, %s9242_s30  ;;  %v13046_v58 = vld [vmem:[#allocation21_spill] sm:$0xff] }
 0x3de   : > { %v11874_v8 = vmul.f32 0.25, %v4873_v48  ;;  %v11878_v19 = vmul.f32 0.25, %v4875_v10  ;;  %7296 = vmatmul.mubr.bf16.vlgmr.msra.gmra.mrb[60].mxu1 %v11795_v46  ;;  %v11884_v3 = vmul.f32 0.25, %v4876_v13  ;;  %v11886_v38 = vmul.f32 0.25, %v4877_v63  ;;  %13044 = vst [vmem:[#allocation41_spill] sm:$0xff] %v11892_v44 }
 0x3df   : > { %v11888_v36 = vmul.f32 0.25, %v4878_v62  ;;  %v11890_v28 = vmul.f32 0.25, %v4879_v29  ;;  %v11894_v32 = vmul.f32 0.25, %v4880_v22  ;;  %v5122_v47 = vadd.f32 %v11725_v33, %v11876_v9  ;;  %8409 = vmatprep.mubr.msk.bf16.mxu1 %vm3540_vm9, %v11779_v52 }
 0x3e0   : > { %v5121_v1 = vadd.f32 %v11723_v12, %v11874_v8  ;;  %v5123_v24 = vadd.f32 %v11727_v50, %v11878_v19  ;;  %v5124_v45 = vadd.f32 %v11731_v57, %v11884_v3  ;;  %v5125_v53 = vadd.f32 %v11733_v11, %v11886_v38  ;;  %v13045_v50 = vld [vmem:[#allocation20_spill] sm:$0xff] }
 0x3e1   : > { %v5126_v20 = vadd.f32 %v11737_v43, %v11888_v36  ;;  %v5127_v12 = vadd.f32 %v11739_v49, %v11890_v28  ;;  %v5128_v33 = vadd.f32 %v11743_v60, %v11894_v32  ;;  %v5919_v52 = vrot.slane %v11160_v37, 1  ;;  %v11917_v44 = vpop.permute.xlu0 %6106 }
 0x3e2   : > { %v5647_v7 = vcombine.low %v5121_v1, %v5122_v47  ;;  %v5648_v57 = vcombine.low %v5123_v24, %v5124_v45  ;;  %v5920_v11 = vrot.slane %v11165_v59, 1  ;;  %v11920_v4 = vmul.f32 0.75, %v4873_v48 }
 0x3e3   : > { %v5664_v54 = vcombine.low %v5125_v53, %v5126_v20  ;;  %v5665_v49 = vcombine.low %v5127_v12, %v5128_v33  ;;  %v11923_v18 = vmul.f32 0.75, %v4874_v15  ;;  %v11925_v60 = vmul.f32 0.75, %v4875_v10  ;;  %v6482_v53 = vpop.permute.xlu1 %6481 }
 0x3e4   : > { %v5655_v43 = vrot.slane %v5647_v7, %v9758_v30  ;;  %v5662_v1 = vrot.slane %v5648_v57, %v9758_v30  ;;  %v5921_v35 = vsel %vm2241_vm4, %v5919_v52, %v5920_v11  ;;  %v5995_v24 = vsel %vm2241_vm4, %v5920_v11, 0.0 }
 0x3e5   : > { %v5672_v47 = vrot.slane %v5664_v54, %v9758_v30  ;;  %v5679_v45 = vrot.slane %v5665_v49, %v9758_v30  ;;  %v6173_v48 = vpack.c.bf16 %v5995_v24, %v5921_v35  ;;  %v11932_v20 = vmul.f32 0.75, %v4876_v13  ;;  %v11953_v35 = vpop.permute.xlu0 %6562 }
 0x3e6   : > { %v11934_v7 = vmul.f32 0.75, %v4877_v63  ;;  %v11936_v15 = vcombine.low %v5655_v43, %v5662_v1  ;;  %v11938_v10 = vmul.f32 0.75, %v4878_v62  ;;  %v11940_v12 = vmul.f32 0.75, %v4879_v29  ;;  %v13050_v43 = vld [vmem:[#allocation23_spill] sm:$0xff] }
 0x3e7   : > { %v11942_v33 = vmul.f32 0.75, %v4880_v22  ;;  %v11944_v54 = vcombine.low %v5672_v47, %v5679_v45  ;;  %6189 = vst.msk [vmem:[#allocation3 + $0x38] sm:$0xff] %vm844_vm0, %v6173_v48  ;;  %v5057_v52 = vadd.f32 %v11920_v4, %v11677_v42  ;;  %v5058_v13 = vadd.f32 %v11923_v18, %v11679_v6 }
 0x3e8   : > { %13047 = vst [vmem:[#allocation39_spill] sm:$0xff] %v11936_v15  ;;  %v5059_v63 = vadd.f32 %v11925_v60, %v11681_v39  ;;  %v5946_v62 = vrot.slane %v11936_v15, 1  ;;  %6510 = vst.msk [vmem:[#allocation3 + $0x38] sm:$0xff] %vm6507_vm5, %v11786_v41  ;;  %v5060_v29 = vadd.f32 %v11932_v20, %v11683_v26  ;;  %v5061_v22 = vadd.f32 %v11934_v7, %v11685_v23 }
 0x3e9   : > { %13048 = vst [vmem:[#allocation42_spill] sm:$0xff] %v11944_v54  ;;  %v5062_v42 = vadd.f32 %v11938_v10, %v11688_v55  ;;  %v5947_v6 = vrot.slane %v11944_v54, 1  ;;  %v6085_v39 = vpack.c.bf16 %v11944_v54, %v11936_v15  ;;  %6607 = vst.msk [vmem:[#allocation3 + $0x38] sm:$0xff] %vm6604_vm6, %v11749_v31  ;;  %v5063_v41 = vadd.f32 %v11940_v12, %v11690_v14  ;;  %v13049_v55 = vld [vmem:[#allocation22_spill] sm:$0xff]  ;;  %v11980_v31 = vpop.permute.xlu1 %6675 }
 0x3ea   : > { %v5064_v26 = vadd.f32 %v11942_v33, %v11692_v40  ;;  %v5681_v57 = vcombine.low %v5057_v52, %v5058_v13  ;;  %v5682_v11 = vcombine.low %v5059_v63, %v5060_v29  ;;  %6704 = vst.msk [vmem:[#allocation3 + $0x38] sm:$0xff] %vm6701_vm7, %v11845_v34  ;;  %v6537_v49 = vpack.c.bf16 %v13050_v43, %v13049_v55  ;;  %v13052_v40 = vld [vmem:[#allocation51_spill] sm:$0xff]  ;;  %v13060_v55 = vld [vmem:[#allocation57_spill] sm:$0xff] }
 0x3eb   : > { %v5698_v23 = vcombine.low %v5061_v22, %v5062_v42  ;;  %v5948_v1 = vsel %vm2241_vm4, %v5946_v62, %v5947_v6  ;;  %v6004_v47 = vsel %vm2241_vm4, %v5947_v6, 0.0  ;;  %6128 = vrot.lane.b32.xlu0 %v6085_v39, %s9243_s23  ;;  %13051 = vst [vmem:[#allocation43_spill] sm:$0xff] %v11980_v31  ;;  %v4022_v24 = vrot.slane %v13052_v40, %v9752_v51  ;;  %v13054_v22 = vld [vmem:[#allocation53_spill] sm:$0xff]  ;;  %v11994_v6 = vpop.permute.xlu0 %6108 }
 0x3ec   : > { %v5699_v14 = vcombine.low %v5063_v41, %v5064_v26  ;;  %v6182_v45 = vpack.c.bf16 %v6004_v47, %v5948_v1  ;;  %v5689_v48 = vrot.slane %v5681_v57, %v9758_v30  ;;  %v5696_v34 = vrot.slane %v5682_v11, %v9758_v30  ;;  %13055 = vst [vmem:[#allocation40_spill] sm:$0xff] %v11994_v6  ;;  %v13057_v41 = vld [vmem:[#allocation54_spill] sm:$0xff]  ;;  %v13059_v11 = vld [vmem:[#allocation56_spill] sm:$0xff] }
 0x3ed   : > { %v5706_v52 = vrot.slane %v5698_v23, %v9758_v30  ;;  %v13053_v63 = vcombine.high %v13052_v40, %v13052_v40  ;;  %v4038_v29 = vcombine.high %v4022_v24, %v4022_v24  ;;  %v4039_v42 = vcombine.high %v13054_v22, %v13054_v22  ;;  %v13063_v40 = vld [vmem:[#allocation55_spill] sm:$0xff] }
 0x3ee   : > { %v5713_v13 = vrot.slane %v5699_v14, %v9758_v30  ;;  %6198 = vst.msk [vmem:[#allocation3 + $0xc8] sm:$0xff] %vm844_vm0, %v6182_v45  ;;  %v11997_v39 = vcombine.low %v5689_v48, %v5696_v34  ;;  %v13058_v26 = vcombine.high %v13057_v41, %v13057_v41  ;;  %v4502_v23 = vcombine.high %v13059_v11, %v13059_v11 }
 0x3ef   : > { %v4036_v62 = vrot.slane %v13053_v63, %v9752_v51  ;;  %v4736_v43 = vrot.slane %v13060_v55, %v9754_v25  ;;  %6519 = vst.msk [vmem:[#allocation3 + $0xc8] sm:$0xff] %vm6507_vm5, %v6482_v53  ;;  %v13061_v1 = vpack.c.bf16 %v13046_v58, %v13045_v50  ;;  %v13065_v48 = vcombine.high %v13060_v55, %v13060_v55 }
 0x3f0   : > { %13056 = vst [vmem:[#allocation13_spill] sm:$0xff] %v11997_v39  ;;  %v4500_v57 = vrot.slane %v13058_v26, %v9752_v51  ;;  %v12012_v47 = vcombine.low %v5706_v52, %v5713_v13  ;;  %v13064_v51 = vcombine.high %v13063_v40, %v13063_v40  ;;  %v5949_v53 = vrot.slane %v11997_v39, 1  ;;  %v6484_v13 = vpop.permute.xlu1 %6483 }
 0x3f1   : > { %6580 = vrot.lane.b32.xlu0 %v13061_v1, %s9242_s30  ;;  %v4040_v14 = vcombine.high %v4036_v62, %v4036_v62  ;;  %v4744_v34 = vrot.slane %v13065_v48, %v9754_v25  ;;  %v4748_v50 = vrot.slane %v13059_v11, %v9754_v25  ;;  %v4756_v26 = vrot.slane %v4502_v23, %v9754_v25  ;;  %v13067_v1 = vld [vmem:[#allocation52_spill] sm:$0xff] }
 0x3f2   : > { %13062 = vst [vmem:[#allocation11_spill] sm:$0xff] %v12012_v47  ;;  %v4740_v45 = vrot.slane %v13064_v51, %v9754_v25  ;;  %v4504_v63 = vcombine.high %v4500_v57, %v4500_v57  ;;  %v4752_v58 = vrot.slane %v4500_v57, %v9754_v25  ;;  %v5950_v52 = vrot.slane %v12012_v47, 1 }
 0x3f3   : > { %v6086_v41 = vpack.c.bf16 %v12012_v47, %v11997_v39  ;;  %v13066_v55 = vrot.slane %v13063_v40, %v9754_v25  ;;  %v4882_v11 = vsel %vm1590_vm2, %v13054_v22, %v4736_v43  ;;  %v13068_v57 = vcombine.high %v13067_v1, %v13067_v1  ;;  %v12043_v39 = vpop.permute.xlu0 %6659 }
 0x3f4   : > { %v4760_v48 = vrot.slane %v4504_v63, %v9754_v25  ;;  %v4884_v47 = vsel %vm1590_vm2, %v4039_v42, %v4744_v34  ;;  %v5951_v23 = vsel %vm2241_vm4, %v5949_v53, %v5950_v52  ;;  %v6005_v40 = vsel %vm2241_vm4, %v5950_v52, 0.0 }
 0x3f5   : > { %v4881_v51 = vsel %vm1590_vm2, %v13067_v1, %v13066_v55  ;;  %v4883_v31 = vsel %vm1590_vm2, %v13068_v57, %v4740_v45  ;;  %6130 = vrot.lane.b32.xlu0 %v6086_v41, %s9243_s23  ;;  %v4885_v25 = vsel %vm1590_vm2, %v4022_v24, %v4748_v50  ;;  %v4886_v63 = vsel %vm1590_vm2, %v4036_v62, %v4752_v58 }
 0x3f6   : > { %v6183_v22 = vpack.c.bf16 %v6005_v40, %v5951_v23  ;;  %v4887_v43 = vsel %vm1590_vm2, %v4038_v29, %v4756_v26  ;;  %v4888_v55 = vsel %vm1590_vm2, %v4040_v14, %v4760_v48  ;;  %v12052_v45 = vmul.f32 0.25, %v4881_v51  ;;  %v12072_v14 = vpop.permute.xlu1 %6677  ;;  %v13071_v23 = vld [vmem:[#allocation24_spill] sm:$0xff]  ;;  %v13072_v40 = vld [vmem:[#allocation25_spill] sm:$0xff] }
 0x3f7   : > { %v12054_v42 = vmul.f32 0.25, %v4882_v11  ;;  %v12056_v34 = vmul.f32 0.25, %v4883_v31  ;;  %v12058_v53 = vmul.f32 0.25, %v4884_v47  ;;  %v12060_v52 = vmul.f32 0.25, %v4885_v25  ;;  %13069 = vst [vmem:[#allocation38_spill] sm:$0xff] %v12072_v14  ;;  %v12090_v48 = vpop.permute.xlu0 %6110 }
 0x3f8   : > { %6199 = vst.msk [vmem:[#allocation3 + $0xd8] sm:$0xff] %vm844_vm0, %v6183_v22  ;;  %v12063_v24 = vmul.f32 0.25, %v4886_v63  ;;  %v12065_v62 = vmul.f32 0.25, %v4887_v43  ;;  %v12067_v50 = vmul.f32 0.25, %v4888_v55  ;;  %v5129_v29 = vadd.f32 %v12052_v45, %v11920_v4  ;;  %13070 = vst [vmem:[#allocation15_spill] sm:$0xff] %v12090_v48 }
 0x3f9   : > { %6520 = vst.msk [vmem:[#allocation3 + $0xd8] sm:$0xff] %vm6507_vm5, %v6484_v13  ;;  %6582 = vrot.lane.b32.xlu0 %v6537_v49, %s9242_s30  ;;  %v5130_v58 = vadd.f32 %v12054_v42, %v11923_v18  ;;  %v5131_v41 = vadd.f32 %v12056_v34, %v11925_v60  ;;  %v5132_v26 = vadd.f32 %v12058_v53, %v11932_v20  ;;  %v5922_v18 = vrot.slane %v11265_v5, 1 }
 0x3fa   : > { %v5133_v1 = vadd.f32 %v12060_v52, %v11934_v7  ;;  %v5134_v4 = vadd.f32 %v12063_v24, %v11938_v10  ;;  %v5135_v13 = vadd.f32 %v12065_v62, %v11940_v12  ;;  %v5136_v49 = vadd.f32 %v12067_v50, %v11942_v33 }
 0x3fb   : > { %v5715_v60 = vcombine.low %v5129_v29, %v5130_v58  ;;  %v5716_v57 = vcombine.low %v5131_v41, %v5132_v26  ;;  %v5923_v20 = vrot.slane %v11275_v16, 1  ;;  %v6538_v7 = vpack.c.bf16 %v13072_v40, %v13071_v23 }
 0x3fc   : > { %v5732_v22 = vcombine.low %v5133_v1, %v5134_v4  ;;  %v5733_v14 = vcombine.low %v5135_v13, %v5136_v49  ;;  %v5001_v10 = vmul.f32 0.75, %v4881_v51  ;;  %v5002_v54 = vmul.f32 0.75, %v4882_v11  ;;  %v6486_v1 = vpop.permute.xlu1 %6485 }
 0x3fd   : > { %v5723_v12 = vrot.slane %v5715_v60, %v9758_v30  ;;  %v5730_v15 = vrot.slane %v5716_v57, %v9758_v30  ;;  %v5924_v33 = vsel %vm2241_vm4, %v5922_v18, %v5923_v20  ;;  %v5996_v6 = vsel %vm2241_vm4, %v5923_v20, 0.0  ;;  %v12107_v57 = vpop.permute.xlu0 %6467 }
 0x3fe   : > { %v5740_v29 = vrot.slane %v5732_v22, %v9758_v30  ;;  %v5747_v58 = vrot.slane %v5733_v14, %v9758_v30  ;;  %v6174_v41 = vpack.c.bf16 %v5996_v6, %v5924_v33  ;;  %v5003_v26 = vmul.f32 0.75, %v4883_v31 }
 0x3ff   : > { %v12101_v48 = vcombine.low %v5723_v12, %v5730_v15  ;;  %v5004_v4 = vmul.f32 0.75, %v4884_v47  ;;  %v5005_v51 = vmul.f32 0.75, %v4885_v25  ;;  %v5006_v11 = vmul.f32 0.75, %v4886_v63 }
 0x400   : > { %v12103_v13 = vcombine.low %v5740_v29, %v5747_v58  ;;  %6190 = vst.msk [vmem:[#allocation3 + $0x48] sm:$0xff] %vm844_vm0, %v6174_v41  ;;  %v5007_v49 = vmul.f32 0.75, %v4887_v43  ;;  %v5008_v18 = vmul.f32 0.75, %v4888_v55  ;;  %v5065_v60 = vadd.f32 %v5001_v10, %v11874_v8  ;;  %v13073_v29 = vld [vmem:[#allocation26_spill] sm:$0xff]  ;;  %v13074_v58 = vld [vmem:[#allocation27_spill] sm:$0xff] }
 0x401   : > { %v5952_v14 = vrot.slane %v12101_v48, 1  ;;  %6511 = vst.msk [vmem:[#allocation3 + $0x48] sm:$0xff] %vm6507_vm5, %v11880_v27  ;;  %v5066_v15 = vadd.f32 %v5002_v54, %v11876_v9  ;;  %v5067_v31 = vadd.f32 %v5003_v26, %v11878_v19  ;;  %v5068_v6 = vadd.f32 %v5004_v4, %v11884_v3  ;;  %v12137_v12 = vpop.permute.xlu0 %6112 }
 0x402   : > { %v5953_v47 = vrot.slane %v12103_v13, 1  ;;  %v6087_v25 = vpack.c.bf16 %v12103_v13, %v12101_v48  ;;  %v5069_v8 = vadd.f32 %v5005_v51, %v11886_v38  ;;  %v5070_v63 = vadd.f32 %v5006_v11, %v11888_v36  ;;  %6608 = vst.msk [vmem:[#allocation3 + $0x48] sm:$0xff] %vm6604_vm6, %v11953_v35  ;;  %v12130_v35 = vpop.permute.xlu1 %6679 }
 0x403   : > { %v5071_v27 = vadd.f32 %v5007_v49, %v11890_v28  ;;  %v5072_v9 = vadd.f32 %v5008_v18, %v11894_v32  ;;  %v5749_v43 = vcombine.low %v5065_v60, %v5066_v15  ;;  %v5750_v19 = vcombine.low %v5067_v31, %v5068_v6  ;;  %6705 = vst.msk [vmem:[#allocation3 + $0x48] sm:$0xff] %vm6701_vm7, %v12043_v39 }
 0x404   : > { %v5954_v3 = vsel %vm2241_vm4, %v5952_v14, %v5953_v47  ;;  %v6006_v55 = vsel %vm2241_vm4, %v5953_v47, 0.0  ;;  %6132 = vrot.lane.b32.xlu0 %v6087_v25, %s9243_s23  ;;  %v5766_v38 = vcombine.low %v5069_v8, %v5070_v63  ;;  %v5817_v36 = vrot.slane %v11018_v21, 7 }
 0x405   : > { %v6184_v20 = vpack.c.bf16 %v6006_v55, %v5954_v3  ;;  %v5757_v28 = vrot.slane %v5749_v43, %v9758_v30  ;;  %v5764_v32 = vrot.slane %v5750_v19, %v9758_v30  ;;  %v5767_v23 = vcombine.low %v5071_v27, %v5072_v9  ;;  %v12162_v27 = vpop.permute.xlu0 %6564 }
 0x406   : > { %v5774_v40 = vrot.slane %v5766_v38, %v9758_v30  ;;  %v5818_v39 = vrot.slane %v11026_v17, 7  ;;  %v5897_v22 = vsel %vm1590_vm2, 0.0, %v5817_v36  ;;  %v6539_v41 = vpack.c.bf16 %v13074_v58, %v13073_v29  ;;  %v9211_v17 = vld [vmem:[%s12785_s11 + $0xd4] ss:$0 sps:$4 sm:$0xff]   ;;  %v9212_v58 = vld [vmem:[%s12785_s11 + $0xd8] sm:$0xff]  }
 0x407   : > { %6200 = vst.msk [vmem:[#allocation3 + $0xe8] sm:$0xff] %vm844_vm0, %v6184_v20  ;;  %v12140_v21 = vcombine.low %v5757_v28, %v5764_v32  ;;  %v5781_v33 = vrot.slane %v5767_v23, %v9758_v30  ;;  %v5137_v60 = vadd.f32 %v12052_v45, %v5001_v10  ;;  %v5138_v15 = vadd.f32 %v12054_v42, %v5002_v54  ;;  %v6488_v42 = vpop.permute.xlu1 %6487 }
 0x408   : > { %6521 = vst.msk [vmem:[#allocation3 + $0xe8] sm:$0xff] %vm6507_vm5, %v6486_v1  ;;  %6584 = vrot.lane.b32.xlu0 %v6538_v7, %s9242_s30  ;;  %v5819_v14 = vsel %vm1590_vm2, %v5817_v36, %v5818_v39  ;;  %v5139_v31 = vadd.f32 %v12056_v34, %v5003_v26  ;;  %v5140_v6 = vadd.f32 %v12058_v53, %v5004_v4  ;;  %v5820_v26 = vrot.slane %v11119_v61, 7 }
 0x409   : > { %v12155_v47 = vcombine.low %v5774_v40, %v5781_v33  ;;  %v5955_v45 = vrot.slane %v12140_v21, 1  ;;  %v6009_v10 = vpack.c.bf16 %v5819_v14, %v5897_v22  ;;  %v5141_v25 = vadd.f32 %v12060_v52, %v5005_v51  ;;  %v12182_v61 = vpop.permute.xlu0 %6114 }
 0x40a   : > { %v5142_v8 = vadd.f32 %v12063_v24, %v5006_v11  ;;  %v5143_v1 = vadd.f32 %v12065_v62, %v5007_v49  ;;  %v5144_v7 = vadd.f32 %v12067_v50, %v5008_v18  ;;  %v5783_v63 = vcombine.low %v5137_v60, %v5138_v15 }
 0x40b   : > { %v5956_v54 = vrot.slane %v12155_v47, 1  ;;  %v6088_v34 = vpack.c.bf16 %v12155_v47, %v12140_v21  ;;  %6026 = vst.msk [vmem:[#allocation3 + $0x10] sm:$0xff] %vm844_vm0, %v6009_v10  ;;  %v5784_v53 = vcombine.low %v5139_v31, %v5140_v6  ;;  %v6968_v52 = vsel %vm6966_vm8, %v9211_v17, 0  ;;  %v12195_v28 = vpop.permute.xlu1 %6681 }
 0x40c   : > { %6155 = vst.msk [vmem:[#allocation3 + $0x10] sm:$0xff] %vm6154_vm10, %v11917_v44  ;;  %v5791_v24 = vrot.slane %v5783_v63, %v9758_v30  ;;  %v5800_v62 = vcombine.low %v5141_v25, %v5142_v8  ;;  %v5801_v50 = vcombine.low %v5143_v1, %v5144_v7  ;;  %6997 = vmatpush1.bf16.msra.mxu0 %v6968_v52  ;;  %v5821_v49 = vrot.slane %v11128_v56, 7  ;;  %v13078_v63 = vld [vmem:[#allocation5_spill] sm:$0xff]  ;;  %v13080_v52 = vld [vmem:[#allocation8_spill] sm:$0xff] }
 0x40d   : > { %v5957_v4 = vsel %vm2241_vm4, %v5955_v45, %v5956_v54  ;;  %v6007_v51 = vsel %vm2241_vm4, %v5956_v54, 0.0  ;;  %6134 = vrot.lane.b32.xlu0 %v6088_v34, %s9243_s23  ;;  %v5798_v11 = vrot.slane %v5784_v53, %v9758_v30  ;;  %7617 = vmatprep.subr.bf16.mxu0 %v11795_v46  ;;  %v5898_v43 = vsel %vm1590_vm2, 0.0, %v5820_v26  ;;  %v6567_v29 = vpop.permute.xlu0 %6566  ;;  %v12219_v45 = vld [vmem:[#allocation3 + $0x28] sm:$0xff]  ;;  %v13079_v34 = vld [vmem:[#allocation4_spill] sm:$0xff] }
 0x40e   : > { %v6185_v44 = vpack.c.bf16 %v6007_v51, %v5957_v4  ;;  %v5808_v18 = vrot.slane %v5800_v62, %v9758_v30  ;;  %v5815_v9 = vrot.slane %v5801_v50, %v9758_v30  ;;  %v5822_v3 = vsel %vm1590_vm2, %v5820_v26, %v5821_v49  ;;  %6610 = vst.msk [vmem:[#allocation3 + $0x68] sm:$0xff] %vm6604_vm6, %v6567_v29  ;;  %v9213_v62 = vld [vmem:[%s12785_s11 + $0xe0] sm:$0xff]   ;;  %v13082_v49 = vld [vmem:[#allocation6_spill] sm:$0xff] }
 0x40f   : > { %v12184_v19 = vcombine.low %v5791_v24, %v5798_v11  ;;  %v5823_v55 = vrot.slane %v11160_v37, 7  ;;  %v5824_v38 = vrot.slane %v11165_v59, 7  ;;  %v6010_v36 = vpack.c.bf16 %v5822_v3, %v5898_v43  ;;  %v6490_v50 = vpop.permute.xlu1 %6489  ;;  %v13081_v51 = vld [vmem:[#allocation9_spill] sm:$0xff]  ;;  %v13084_v3 = vld [vmem:[#allocation30_spill] sm:$0xff] }
 0x410   : > { %6201 = vst.msk [vmem:[#allocation3 + $0xf8] sm:$0xff] %vm844_vm0, %v6185_v44  ;;  %v12190_v56 = vcombine.low %v5808_v18, %v5815_v9  ;;  %v5925_v20 = vrot.slane %v11320_v2, 1  ;;  %v5926_v30 = vrot.slane %v11330_v0, 1  ;;  %v5826_v23 = vrot.slane %v11265_v5, 7  ;;  %v13083_v9 = vld [vmem:[#allocation10_spill] sm:$0xff] }
 0x411   : > { %6522 = vst.msk [vmem:[#allocation3 + $0xf8] sm:$0xff] %vm6507_vm5, %v6488_v42  ;;  %6586 = vrot.lane.b32.xlu0 %v6539_v41, %s9242_s30  ;;  %v5958_v32 = vrot.slane %v12184_v19, 1  ;;  %v5825_v37 = vsel %vm1590_vm2, %v5823_v55, %v5824_v38  ;;  %v5899_v59 = vsel %vm1590_vm2, 0.0, %v5823_v55  ;;  %v13075_v41 = vld [vmem:[#allocation40_spill] sm:$0xff]  ;;  %v5827_v17 = vrot.slane %v11275_v16, 7  ;;  %v13085_v38 = vld [vmem:[#allocation29_spill] sm:$0xff] }
 0x412   : > { %v5959_v40 = vrot.slane %v12190_v56, 1  ;;  %v6089_v39 = vpack.c.bf16 %v12190_v56, %v12184_v19  ;;  %6027 = vst.msk [vmem:[#allocation3 + $0x20] sm:$0xff] %vm844_vm0, %v6010_v36  ;;  %v6011_v22 = vpack.c.bf16 %v5825_v37, %v5899_v59  ;;  %v5927_v33 = vsel %vm2241_vm4, %v5925_v20, %v5926_v30  ;;  %v13076_v16 = vld [vmem:[#allocation28_spill] sm:$0xff] }
 0x413   : > { %6156 = vst.msk [vmem:[#allocation3 + $0x20] sm:$0xff] %vm6154_vm10, %v13075_v41  ;;  %v6777_v60 = vld [vmem:[#allocation3 + $0x10] sm:$0xff]  ;;  %v5997_v5 = vsel %vm2241_vm4, %v5926_v30, 0.0  ;;  %v5900_v14 = vsel %vm1590_vm2, 0.0, %v5826_v23  ;;  %v5829_v15 = vrot.slane %v11320_v2, 7  ;;  %v5830_v25 = vrot.slane %v11330_v0, 7  ;;  %v6117_v59 = vpop.permute.xlu0 %6116 }
 0x414   : > { %v5960_v31 = vsel %vm2241_vm4, %v5958_v32, %v5959_v40  ;;  %v6008_v6 = vsel %vm2241_vm4, %v5959_v40, 0.0  ;;  %7003 = vmatmul.mubr.bf16.vlgmr.msra.gmra.mrb[64].mxu0 %v6777_v60  ;;  %7304 = vmatmul.mubr.bf16.gmra.mrb[64].mxu1 %v6777_v60  ;;  %6028 = vst.msk [vmem:[#allocation3 + $0x30] sm:$0xff] %vm844_vm0, %v6011_v22  ;;  %v6175_v10 = vpack.c.bf16 %v5997_v5, %v5927_v33  ;;  %v13077_v2 = vld [vmem:[#allocation15_spill] sm:$0xff]  ;;  %v5832_v54 = vrot.slane %v13078_v63, 7  ;;  %v13086_v30 = vld [vmem:[#allocation34_spill] sm:$0xff]  ;;  %v13088_v41 = vld [vmem:[#allocation36_spill] sm:$0xff] }
 0x415   : > { %6707 = vst.msk [vmem:[#allocation3 + $0x68] sm:$0xff] %vm6701_vm7, %v13076_v16  ;;  %v6186_v8 = vpack.c.bf16 %v6008_v6, %v5960_v31  ;;  %6136 = vrot.lane.b32.xlu0 %v6089_v39, %s9243_s23  ;;  %8379 = vmatprep.mubr.msk.bf16.mxu0 %vm3540_vm9, %v12219_v45  ;;  %v5828_v1 = vsel %vm1590_vm2, %v5826_v23, %v5827_v17  ;;  %v5901_v7 = vsel %vm1590_vm2, 0.0, %v5829_v15  ;;  %v5833_v53 = vrot.slane %v13079_v34, 7  ;;  %v13087_v39 = vld [vmem:[#allocation35_spill] sm:$0xff]  ;;  %v9214_v33 = vld [vmem:[%s12785_s11 + $0xe8] sm:$0xff]   ;;  %v13090_v31 = vld [vmem:[#allocation37_spill] sm:$0xff] }
 0x416   : > { %6157 = vst.msk [vmem:[#allocation3 + $0x30] sm:$0xff] %vm6154_vm10, %v13077_v2  ;;  %8410 = vmatprep.mubr.msk.bf16.mxu1 %vm3540_vm9, %v12219_v45  ;;  %v6012_v0 = vpack.c.bf16 %v5828_v1, %v5900_v14  ;;  %v5831_v42 = vsel %vm1590_vm2, %v5829_v15, %v5830_v25  ;;  %v5835_v24 = vrot.slane %v13080_v52, 7  ;;  %7618 = vmatpush1.bf16.msra.mxu0 %v9212_v58  ;;  %v5902_v4 = vsel %vm1590_vm2, 0.0, %v5832_v54  ;;  %v13089_v60 = vld [vmem:[#allocation31_spill] sm:$0xff]  ;;  %v13092_v2 = vld [vmem:[#allocation42_spill] sm:$0xff] }
 0x417   : > { %6191 = vst.msk [vmem:[#allocation3 + $0x58] sm:$0xff] %vm844_vm0, %v6175_v10  ;;  %6202 = vst.msk [vmem:[#allocation3 + $0x108] sm:$0xff] %vm844_vm0, %v6186_v8  ;;  %v6013_v26 = vpack.c.bf16 %v5831_v42, %v5901_v7  ;;  %v5836_v11 = vrot.slane %v13081_v51, 7  ;;  %v5838_v44 = vrot.slane %v13082_v49, 7  ;;  %7619 = vmatprep.subr.bf16.mxu0 %v11795_v46  ;;  %v5834_v18 = vsel %vm1590_vm2, %v5832_v54, %v5833_v53  ;;  %v12282_v17 = vld [vmem:[#allocation3 + $0x38] sm:$0xff]  ;;  %v13093_v7 = vld [vmem:[#allocation13_spill] sm:$0xff]  ;;  %v6569_v54 = vpop.permute.xlu0 %6568 }
 0x418   : > { %6512 = vst.msk [vmem:[#allocation3 + $0x58] sm:$0xff] %vm6507_vm5, %v12107_v57  ;;  %6523 = vst.msk [vmem:[#allocation3 + $0x108] sm:$0xff] %vm6507_vm5, %v6490_v50  ;;  %v5903_v57 = vsel %vm1590_vm2, 0.0, %v5835_v24  ;;  %v5839_v43 = vrot.slane %v13083_v9, 7  ;;  %v5841_v55 = vrot.slane %v13084_v3, 7  ;;  %v6014_v36 = vpack.c.bf16 %v5834_v18, %v5902_v4  ;;  %v13091_v10 = vld [vmem:[#allocation39_spill] sm:$0xff] }
 0x419   : > { %6029 = vst.msk [vmem:[#allocation3 + $0x40] sm:$0xff] %vm844_vm0, %v6012_v0  ;;  %6030 = vst.msk [vmem:[#allocation3 + $0x50] sm:$0xff] %vm844_vm0, %v6013_v26  ;;  %v5837_v20 = vsel %vm1590_vm2, %v5835_v24, %v5836_v11  ;;  %v5842_v32 = vrot.slane %v13086_v30, 7  ;;  %v5844_v22 = vrot.slane %v13087_v39, 7  ;;  %v5847_v5 = vrot.slane %v13089_v60, 7  ;;  %v9215_v53 = vld [vmem:[%s12785_s11 + $0xf0] sm:$0xff]  }
 0x41a   : > { %6609 = vst.msk [vmem:[#allocation3 + $0x58] sm:$0xff] %vm6604_vm6, %v12162_v27  ;;  %v5904_v27 = vsel %vm1590_vm2, 0.0, %v5838_v44  ;;  %v12265_v37 = vld [vmem:[#allocation3 + $0x20] sm:$0xff]  ;;  %v6015_v23 = vpack.c.bf16 %v5837_v20, %v5903_v57  ;;  %v5905_v40 = vsel %vm1590_vm2, 0.0, %v5841_v55  ;;  %7620 = vmatpush1.bf16.msra.mxu0 %v9213_v62  ;;  %v5848_v6 = vrot.slane %v13090_v31, 7  ;;  %v13094_v52 = vld [vmem:[#allocation11_spill] sm:$0xff] }
 0x41b   : > { %6158 = vst.msk [vmem:[#allocation3 + $0x40] sm:$0xff] %vm6154_vm10, %v12137_v12  ;;  %6159 = vst.msk [vmem:[#allocation3 + $0x50] sm:$0xff] %vm6154_vm10, %v12182_v61  ;;  %v5840_v12 = vsel %vm1590_vm2, %v5838_v44, %v5839_v43  ;;  %v5843_v58 = vsel %vm1590_vm2, %v5841_v55, %v5842_v32  ;;  %v5845_v61 = vrot.slane %v13088_v41, 7  ;;  %7621 = vmatprep.subr.bf16.mxu0 %v11795_v46  ;;  %v5906_v15 = vsel %vm1590_vm2, 0.0, %v5844_v22  ;;  %v13095_v51 = vld [vmem:[#allocation7_spill] sm:$0xff]  ;;  %v6119_v3 = vpop.permute.xlu0 %6118  ;;  %v9216_v55 = vld [vmem:[%s12785_s11 + $0xf8] sm:$0xff]  }
 0x41c   : > { %6706 = vst.msk [vmem:[#allocation3 + $0x58] sm:$0xff] %vm6701_vm7, %v13085_v38  ;;  %v6016_v29 = vpack.c.bf16 %v5840_v12, %v5904_v27  ;;  %7011 = vmatmul.mubr.bf16.gmra.mrb[68].mxu0 %v12265_v37  ;;  %7312 = vmatmul.mubr.bf16.gmra.mrb[68].mxu1 %v12265_v37  ;;  %v6017_v14 = vpack.c.bf16 %v5843_v58, %v5905_v40  ;;  %v5850_v25 = vrot.slane %v13091_v10, 7  ;;  %v5907_v8 = vsel %vm1590_vm2, 0.0, %v5847_v5  ;;  %v12335_v20 = vld [vmem:[#allocation3 + $0x48] sm:$0xff]  ;;  %v13096_v12 = vld [vmem:[#allocation12_spill] sm:$0xff]  ;;  %v9222_v10 = vld [vmem:[%s12785_s11 + $0x128] sm:$0xff]  }
 0x41d   : > { %6031 = vst.msk [vmem:[#allocation3 + $0x60] sm:$0xff] %vm844_vm0, %v6014_v36  ;;  %6032 = vst.msk [vmem:[#allocation3 + $0x70] sm:$0xff] %vm844_vm0, %v6015_v23  ;;  %8380 = vmatprep.mubr.msk.bf16.mxu0 %vm3540_vm9, %v12282_v17  ;;  %8411 = vmatprep.mubr.msk.bf16.mxu1 %vm3540_vm9, %v12282_v17  ;;  %v5846_v16 = vsel %vm1590_vm2, %v5844_v22, %v5845_v61  ;;  %v5851_v1 = vrot.slane %v13092_v2, 7  ;;  %v5853_v63 = vrot.slane %v13093_v7, 7  ;;  %v5854_v24 = vrot.slane %v13094_v52, 7  ;;  %v12316_v57 = vld [vmem:[#allocation3 + $0x30] sm:$0xff] }
 0x41e   : > { %6160 = vst.msk [vmem:[#allocation3 + $0x60] sm:$0xff] %vm6154_vm10, %v6117_v59  ;;  %v6018_v0 = vpack.c.bf16 %v5846_v16, %v5906_v15  ;;  %v5849_v42 = vsel %vm1590_vm2, %v5847_v5, %v5848_v6  ;;  %v5908_v34 = vsel %vm1590_vm2, 0.0, %v5850_v25  ;;  %7622 = vmatpush1.bf16.msra.mxu0 %v9214_v33  ;;  %v5856_v4 = vrot.slane %v12101_v48, 7  ;;  %6161 = vst.msk [vmem:[#allocation3 + $0x70] sm:$0xff] %vm6154_vm10, %v6119_v3  ;;  %v9217_v23 = vld [vmem:[%s12785_s11 + $0x100] sm:$0xff]   ;;  %v9218_v22 = vld [vmem:[%s12785_s11 + $0x108] sm:$0xff]  }
 0x41f   : > { %6033 = vst.msk [vmem:[#allocation3 + $0x80] sm:$0xff] %vm844_vm0, %v6016_v29  ;;  %6034 = vst.msk [vmem:[#allocation3 + $0x90] sm:$0xff] %vm844_vm0, %v6017_v14  ;;  %v6019_v62 = vpack.c.bf16 %v5849_v42, %v5907_v8  ;;  %v5852_v50 = vsel %vm1590_vm2, %v5850_v25, %v5851_v1  ;;  %7623 = vmatprep.subr.bf16.mxu0 %v11795_v46  ;;  %v5909_v26 = vsel %vm1590_vm2, 0.0, %v5853_v63  ;;  %v5857_v44 = vrot.slane %v12103_v13, 7  ;;  %v9219_v33 = vld [vmem:[%s12785_s11 + $0x110] sm:$0xff]   ;;  %v12374_v41 = vld [vmem:[#allocation3 + $0x68] sm:$0xff] }
 0x420   : > { %6611 = vst.msk [vmem:[#allocation3 + $0x78] sm:$0xff] %vm6604_vm6, %v6569_v54  ;;  %v6020_v11 = vpack.c.bf16 %v5852_v50, %v5908_v34  ;;  %v5855_v49 = vsel %vm1590_vm2, %v5853_v63, %v5854_v24  ;;  %v5859_v18 = vrot.slane %v12140_v21, 7  ;;  %v5860_v43 = vrot.slane %v12155_v47, 7  ;;  %v9220_v61 = vld [vmem:[%s12785_s11 + $0x118] sm:$0xff]   ;;  %v9221_v14 = vld [vmem:[%s12785_s11 + $0x120] sm:$0xff]   ;;  %v9223_v8 = vld [vmem:[%s12785_s11 + $0x130] sm:$0xff]  }
 0x421   : > { %6708 = vst.msk [vmem:[#allocation3 + $0x78] sm:$0xff] %vm6701_vm7, %v13095_v51  ;;  %v6021_v9 = vpack.c.bf16 %v5855_v49, %v5909_v26  ;;  %v5862_v48 = vrot.slane %v12184_v19, 7  ;;  %v5858_v13 = vsel %vm1590_vm2, %v5856_v4, %v5857_v44  ;;  %v5910_v21 = vsel %vm1590_vm2, 0.0, %v5856_v4  ;;  %v13097_v5 = vld [vmem:[#allocation32_spill] sm:$0xff]  ;;  %v13098_v16 = vld [vmem:[#allocation33_spill] sm:$0xff]  ;;  %v13100_v26 = vld [vmem:[#allocation43_spill] sm:$0xff] }
 0x422   : > { %6035 = vst.msk [vmem:[#allocation3 + $0xa0] sm:$0xff] %vm844_vm0, %v6018_v0  ;;  %6036 = vst.msk [vmem:[#allocation3 + $0xb0] sm:$0xff] %vm844_vm0, %v6019_v62  ;;  %7624 = vmatpush1.bf16.msra.mxu0 %v9215_v53  ;;  %v5863_v38 = vrot.slane %v12190_v56, 7  ;;  %v6022_v47 = vpack.c.bf16 %v5858_v13, %v5910_v21  ;;  %v5861_v19 = vsel %vm1590_vm2, %v5859_v18, %v5860_v43  ;;  %v5911_v36 = vsel %vm1590_vm2, 0.0, %v5859_v18  ;;  %v12353_v40 = vld [vmem:[#allocation3 + $0x40] sm:$0xff]  ;;  %v12371_v58 = vld [vmem:[#allocation3 + $0x50] sm:$0xff] }
 0x423   : > { %6037 = vst.msk [vmem:[#allocation3 + $0xc0] sm:$0xff] %vm844_vm0, %v6020_v11  ;;  %6038 = vst.msk [vmem:[#allocation3 + $0xd0] sm:$0xff] %vm844_vm0, %v6021_v9  ;;  %7625 = vmatprep.subr.bf16.mxu0 %v11795_v46  ;;  %v6023_v27 = vpack.c.bf16 %v5861_v19, %v5911_v36  ;;  %v5912_v30 = vsel %vm1590_vm2, 0.0, %v5862_v48  ;;  %v6571_v59 = vpop.permute.xlu0 %6570  ;;  %v12355_v39 = vld [vmem:[#allocation3 + $0x58] sm:$0xff]  ;;  %v9224_v7 = vld [vmem:[%s12785_s11 + $0x138] sm:$0xff]  }
 0x424   : > { %7019 = vmatmul.mubr.bf16.gmra.mrb[72].mxu0 %v12316_v57  ;;  %7320 = vmatmul.mubr.bf16.gmra.mrb[72].mxu1 %v12316_v57  ;;  %v5864_v56 = vsel %vm1590_vm2, %v5862_v48, %v5863_v38  ;;  %6039 = vst.msk [vmem:[#allocation3 + $0xe0] sm:$0xff] %vm844_vm0, %v6022_v47  ;;  %v9225_v63 = vld [vmem:[%s12785_s11 + $0x140] ss:$0 sps:$4 sm:$0xff]   ;;  %v13101_v9 = vld [vmem:[#allocation38_spill] sm:$0xff] }
 0x425   : > { %8381 = vmatprep.mubr.msk.bf16.mxu0 %vm3540_vm9, %v12335_v20  ;;  %8412 = vmatprep.mubr.msk.bf16.mxu1 %vm3540_vm9, %v12335_v20  ;;  %v6024_v32 = vpack.c.bf16 %v5864_v56, %v5912_v30  ;;  %6040 = vst.msk [vmem:[#allocation3 + $0xf0] sm:$0xff] %vm844_vm0, %v6023_v27  ;;  %v12393_v31 = vld [vmem:[#allocation3 + $0x60] sm:$0xff]  ;;  %v12415_v2 = vld [vmem:[#allocation3 + $0x70] sm:$0xff]  ;;  %v7615_v0 = vsel %vm6966_vm8, %v9225_v63, 0  ;;  %v13099_v52 = vld [vmem:[#allocation41_spill] sm:$0xff]  ;;  %v6684_v56 = vpop.permute.xlu1 %6683 }
 0x426   : > { %7626 = vmatpush1.bf16.msra.mxu0 %v9216_v55  ;;  %6612 = vst.msk [vmem:[#allocation3 + $0x88] sm:$0xff] %vm6604_vm6, %v6571_v59 }
 0x427   : > { %7627 = vmatprep.subr.bf16.mxu0 %v11795_v46  ;;  %6041 = vst.msk [vmem:[#allocation3 + $0x100] sm:$0xff] %vm844_vm0, %v6024_v32 }
 0x428   : > { %6709 = vst.msk [vmem:[#allocation3 + $0x88] sm:$0xff] %vm6701_vm7, %v13096_v12  ;;  %v12396_v6 = vld [vmem:[#allocation3 + $0x78] sm:$0xff] }
 0x42a   : > { %7628 = vmatpush1.bf16.msra.mxu0 %v9217_v23 }
 0x42b   : > { %7629 = vmatprep.subr.bf16.mxu0 %v11795_v46  ;;  %v6121_v29 = vpop.permute.xlu0 %6120 }
 0x42c   : > { %7027 = vmatmul.mubr.bf16.gmra.mrb[76].mxu0 %v12353_v40  ;;  %7328 = vmatmul.mubr.bf16.gmra.mrb[76].mxu1 %v12353_v40  ;;  %6162 = vst.msk [vmem:[#allocation3 + $0x80] sm:$0xff] %vm6154_vm10, %v6121_v29 }
 0x42d   : > { %8382 = vmatprep.mubr.msk.bf16.mxu0 %vm3540_vm9, %v12355_v39  ;;  %8413 = vmatprep.mubr.msk.bf16.mxu1 %vm3540_vm9, %v12355_v39 }
 0x42e   : > { %7630 = vmatpush1.bf16.msra.mxu0 %v9218_v22 }
 0x42f   : > { %7631 = vmatprep.subr.bf16.mxu0 %v11795_v46  ;;  %v12417_v1 = vld [vmem:[#allocation3 + $0x88] sm:$0xff] }
 0x431   : > { %v6573_v60 = vpop.permute.xlu0 %6572 }
 0x432   : > { %7632 = vmatpush1.bf16.msra.mxu0 %v9219_v33  ;;  %6613 = vst.msk [vmem:[#allocation3 + $0x98] sm:$0xff] %vm6604_vm6, %v6573_v60 }
 0x433   : > { %7633 = vmatprep.subr.bf16.mxu0 %v11795_v46  ;;  %6710 = vst.msk [vmem:[#allocation3 + $0x98] sm:$0xff] %vm6701_vm7, %v13097_v5  ;;  %v12435_v42 = vld [vmem:[#allocation3 + $0x80] sm:$0xff] }
 0x434   : > { %7035 = vmatmul.mubr.bf16.gmra.mrb[80].mxu0 %v12371_v58  ;;  %7336 = vmatmul.mubr.bf16.gmra.mrb[80].mxu1 %v12371_v58 }
 0x435   : > { %8383 = vmatprep.mubr.msk.bf16.mxu0 %vm3540_vm9, %v12374_v41  ;;  %8414 = vmatprep.mubr.msk.bf16.mxu1 %vm3540_vm9, %v12374_v41  ;;  %v6123_v15 = vpop.permute.xlu0 %6122 }
 0x436   : > { %7634 = vmatpush1.bf16.msra.mxu0 %v9220_v61  ;;  %6163 = vst.msk [vmem:[#allocation3 + $0x90] sm:$0xff] %vm6154_vm10, %v6123_v15 }
 0x437   : > { %7635 = vmatprep.subr.bf16.mxu0 %v11795_v46 }
 0x43a   : > { %7636 = vmatpush1.bf16.msra.mxu0 %v9221_v14  ;;  %v6575_v25 = vpop.permute.xlu0 %6574  ;;  %v12437_v34 = vld [vmem:[#allocation3 + $0x98] sm:$0xff] }
 0x43b   : > { %7637 = vmatprep.subr.bf16.mxu0 %v11795_v46  ;;  %6614 = vst.msk [vmem:[#allocation3 + $0xa8] sm:$0xff] %vm6604_vm6, %v6575_v25 }
 0x43c   : > { %7043 = vmatmul.mubr.bf16.gmra.mrb[84].mxu0 %v12393_v31  ;;  %7344 = vmatmul.mubr.bf16.gmra.mrb[84].mxu1 %v12393_v31  ;;  %6711 = vst.msk [vmem:[#allocation3 + $0xa8] sm:$0xff] %vm6701_vm7, %v13098_v16 }
 0x43d   : > { %8384 = vmatprep.mubr.msk.bf16.mxu0 %vm3540_vm9, %v12396_v6  ;;  %8415 = vmatprep.mubr.msk.bf16.mxu1 %vm3540_vm9, %v12396_v6  ;;  %v12449_v24 = vld [vmem:[#allocation3 + $0x90] sm:$0xff] }
 0x43e   : > { %7638 = vmatpush1.bf16.msra.mxu0 %v9222_v10 }
 0x43f   : > { %7639 = vmatprep.subr.bf16.mxu0 %v11795_v46 }
 0x442   : > { %7640 = vmatpush1.bf16.msra.mxu0 %v9223_v8 }
 0x443   : > { %7641 = vmatprep.subr.bf16.mxu0 %v11795_v46  ;;  %v6125_v54 = vpop.permute.xlu0 %6124  ;;  %v12451_v62 = vld [vmem:[#allocation3 + $0xa8] sm:$0xff] }
 0x444   : > { %7051 = vmatmul.mubr.bf16.gmra.mrb[88].mxu0 %v12415_v2  ;;  %7352 = vmatmul.mubr.bf16.gmra.mrb[88].mxu1 %v12415_v2  ;;  %6164 = vst.msk [vmem:[#allocation3 + $0xa0] sm:$0xff] %vm6154_vm10, %v6125_v54 }
 0x445   : > { %8385 = vmatprep.mubr.msk.bf16.mxu0 %vm3540_vm9, %v12417_v1  ;;  %8416 = vmatprep.mubr.msk.bf16.mxu1 %vm3540_vm9, %v12417_v1 }
 0x446   : > { %7642 = vmatpush1.bf16.msra.mxu0 %v9224_v7 }
 0x447   : > { %7643 = vmatprep.subr.bf16.mxu0 %v11795_v46  ;;  %v6577_v53 = vpop.permute.xlu0 %6576 }
 0x448   : > { %6615 = vst.msk [vmem:[#allocation3 + $0xb8] sm:$0xff] %vm6604_vm6, %v6577_v53 }
 0x449   : > { %6712 = vst.msk [vmem:[#allocation3 + $0xb8] sm:$0xff] %vm6701_vm7, %v13099_v52 }
 0x44a   : > { %7644 = vmatpush1.bf16.msra.mxu0 %v7615_v0 }
 0x44b   : > { %v6127_v46 = vpop.permute.xlu0 %6126  ;;  %v12462_v4 = vld [vmem:[#allocation3 + $0xa0] sm:$0xff] }
 0x44c   : > { %7059 = vmatmul.mubr.bf16.gmra.mrb[92].mxu0 %v12435_v42  ;;  %7360 = vmatmul.mubr.bf16.gmra.mrb[92].mxu1 %v12435_v42  ;;  %6165 = vst.msk [vmem:[#allocation3 + $0xb0] sm:$0xff] %vm6154_vm10, %v6127_v46 }
 0x44d   : > { %8386 = vmatprep.mubr.msk.bf16.mxu0 %vm3540_vm9, %v12437_v34  ;;  %8417 = vmatprep.mubr.msk.bf16.mxu1 %vm3540_vm9, %v12437_v34 }
 0x44f   : > { %v6579_v50 = vpop.permute.xlu0 %6578 }
 0x450   : > { %6616 = vst.msk [vmem:[#allocation3 + $0xc8] sm:$0xff] %vm6604_vm6, %v6579_v50  ;;  %v12464_v51 = vld [vmem:[#allocation3 + $0xb8] sm:$0xff] }
 0x451   : > { %6713 = vst.msk [vmem:[#allocation3 + $0xc8] sm:$0xff] %vm6701_vm7, %v13100_v26 }
 0x453   : > { %v12473_v49 = vld [vmem:[#allocation3 + $0xb0] sm:$0xff] }
 0x454   : > { %7067 = vmatmul.mubr.bf16.gmra.mrb[96].mxu0 %v12449_v24  ;;  %7368 = vmatmul.mubr.bf16.gmra.mrb[96].mxu1 %v12449_v24 }
 0x455   : > { %8387 = vmatprep.mubr.msk.bf16.mxu0 %vm3540_vm9, %v12451_v62  ;;  %8418 = vmatprep.mubr.msk.bf16.mxu1 %vm3540_vm9, %v12451_v62 }
 0x458   : > { %v12475_v44 = vld [vmem:[#allocation3 + $0xc8] sm:$0xff] }
 0x45c   : > { %7075 = vmatmul.mubr.bf16.gmra.mrb[100].mxu0 %v12462_v4  ;;  %7376 = vmatmul.mubr.bf16.gmra.mrb[100].mxu1 %v12462_v4 }
 0x45d   : > { %8388 = vmatprep.mubr.msk.bf16.mxu0 %vm3540_vm9, %v12464_v51  ;;  %8419 = vmatprep.mubr.msk.bf16.mxu1 %vm3540_vm9, %v12464_v51  ;;  %v6129_v11 = vpop.permute.xlu0 %6128 }
 0x45e   : > { %6166 = vst.msk [vmem:[#allocation3 + $0xc0] sm:$0xff] %vm6154_vm10, %v6129_v11 }
 0x463   : > { %v6581_v18 = vpop.permute.xlu0 %6580 }
 0x464   : > { %7083 = vmatmul.mubr.bf16.gmra.mrb[104].mxu0 %v12473_v49  ;;  %7384 = vmatmul.mubr.bf16.gmra.mrb[104].mxu1 %v12473_v49  ;;  %6617 = vst.msk [vmem:[#allocation3 + $0xd8] sm:$0xff] %vm6604_vm6, %v6581_v18 }
 0x465   : > { %6714 = vst.msk [vmem:[#allocation3 + $0xd8] sm:$0xff] %vm6701_vm7, %v13101_v9  ;;  %8389 = vmatprep.mubr.msk.bf16.mxu0 %vm3540_vm9, %v12475_v44  ;;  %8420 = vmatprep.mubr.msk.bf16.mxu1 %vm3540_vm9, %v12475_v44  ;;  %v12487_v48 = vld [vmem:[#allocation3 + $0xc0] sm:$0xff] }
 0x467   : > { %v6131_v43 = vpop.permute.xlu0 %6130 }
 0x468   : > { %6167 = vst.msk [vmem:[#allocation3 + $0xd0] sm:$0xff] %vm6154_vm10, %v6131_v43 }
 0x46b   : > { %v6583_v3 = vpop.permute.xlu0 %6582 }
 0x46c   : > { %7091 = vmatmul.mubr.bf16.gmra.mrb[108].mxu0 %v12487_v48  ;;  %7392 = vmatmul.mubr.bf16.gmra.mrb[108].mxu1 %v12487_v48  ;;  %6618 = vst.msk [vmem:[#allocation3 + $0xe8] sm:$0xff] %vm6604_vm6, %v6583_v3  ;;  %v12492_v55 = vld [vmem:[#allocation3 + $0xd8] sm:$0xff] }
 0x46d   : > { %6715 = vst.msk [vmem:[#allocation3 + $0xe8] sm:$0xff] %vm6701_vm7, %v12130_v35  ;;  %8390 = vmatprep.mubr.msk.bf16.mxu0 %vm3540_vm9, %v12492_v55  ;;  %8421 = vmatprep.mubr.msk.bf16.mxu1 %vm3540_vm9, %v12492_v55 }
 0x46f   : > { %v12500_v13 = vld [vmem:[#allocation3 + $0xd0] sm:$0xff] }
 0x474   : > { %7099 = vmatmul.mubr.bf16.gmra.mrb[112].mxu0 %v12500_v13  ;;  %7400 = vmatmul.mubr.bf16.gmra.mrb[112].mxu1 %v12500_v13  ;;  %v12504_v21 = vld [vmem:[#allocation3 + $0xe8] sm:$0xff] }
 0x475   : > { %8391 = vmatprep.mubr.msk.bf16.mxu0 %vm3540_vm9, %v12504_v21  ;;  %8422 = vmatprep.mubr.msk.bf16.mxu1 %vm3540_vm9, %v12504_v21 }
 0x476   : > { %v6133_v35 = vpop.permute.xlu0 %6132 }
 0x477   : > { %6168 = vst.msk [vmem:[#allocation3 + $0xe0] sm:$0xff] %vm6154_vm10, %v6133_v35 }
 0x47a   : > { %v6585_v38 = vpop.permute.xlu0 %6584 }
 0x47b   : > { %6619 = vst.msk [vmem:[#allocation3 + $0xf8] sm:$0xff] %vm6604_vm6, %v6585_v38 }
 0x47c   : > { %6716 = vst.msk [vmem:[#allocation3 + $0xf8] sm:$0xff] %vm6701_vm7, %v12195_v28 }
 0x47e   : > { %v12514_v47 = vld [vmem:[#allocation3 + $0xe0] sm:$0xff] }
 0x47f   : > { %v6135_v19 = vpop.permute.xlu0 %6134  ;;  %7107 = vmatmul.mubr.bf16.gmra.mrb[116].mxu0 %v12514_v47  ;;  %7408 = vmatmul.mubr.bf16.gmra.mrb[116].mxu1 %v12514_v47 }
 0x480   : > { %6169 = vst.msk [vmem:[#allocation3 + $0xf0] sm:$0xff] %vm6154_vm10, %v6135_v19 }
 0x483   : > { %v6587_v36 = vpop.permute.xlu0 %6586  ;;  %v12519_v27 = vld [vmem:[#allocation3 + $0xf8] sm:$0xff] }
 0x484   : > { %6620 = vst.msk [vmem:[#allocation3 + $0x108] sm:$0xff] %vm6604_vm6, %v6587_v36  ;;  %8392 = vmatprep.mubr.msk.bf16.mxu0 %vm3540_vm9, %v12519_v27  ;;  %8423 = vmatprep.mubr.msk.bf16.mxu1 %vm3540_vm9, %v12519_v27  ;;  %v9230_v36 = vld [vmem:[#allocation2] sm:$0xff] }
 0x485   : > { %6717 = vst.msk [vmem:[#allocation3 + $0x108] sm:$0xff] %vm6701_vm7, %v6684_v56 }
 0x487   : > { %v6137_v28 = vpop.permute.xlu0 %6136  ;;  %v12527_v30 = vld [vmem:[#allocation3 + $0xf0] sm:$0xff] }
 0x488   : > { %6170 = vst.msk [vmem:[#allocation3 + $0x100] sm:$0xff] %vm6154_vm10, %v6137_v28  ;;  %7115 = vmatmul.mubr.bf16.gmra.mrb[120].mxu0 %v12527_v30  ;;  %7416 = vmatmul.mubr.bf16.gmra.mrb[120].mxu1 %v12527_v30 }
 0x48c   : > { %v12532_v32 = vld [vmem:[#allocation3 + $0x108] sm:$0xff] }
 0x48d   : > { %8393 = vmatprep.mubr.msk.bf16.mxu0 %vm3540_vm9, %v12532_v32 }
 0x48f   : > { %v12536_v59 = vld [vmem:[#allocation3 + $0x100] sm:$0xff] }
 0x490   : > { %7123 = vmatmul.mubr.bf16.gmra.mrb[124].mxu0 %v12536_v59 }
 0x491   : > { %8465 = vmatprep.mubr.msk.bf16.mxu0 %vm3540_vm9, %v12219_v45 }
 0x498   : > { %7650 = vmatmul.mubr.bf16.vlgmr.msra.gmra.mrb[128].mxu0 %v12265_v37 }
 0x499   : > { %8466 = vmatprep.mubr.msk.bf16.mxu0 %vm3540_vm9, %v12282_v17 }
 0x4a0   : > { %7658 = vmatmul.mubr.bf16.gmra.mrb[132].mxu0 %v12316_v57 }
 0x4a1   : > { %8467 = vmatprep.mubr.msk.bf16.mxu0 %vm3540_vm9, %v12335_v20 }
 0x4a8   : > { %7666 = vmatmul.mubr.bf16.gmra.mrb[136].mxu0 %v12353_v40 }
 0x4a9   : > { %8468 = vmatprep.mubr.msk.bf16.mxu0 %vm3540_vm9, %v12355_v39 }
 0x4b0   : > { %7674 = vmatmul.mubr.bf16.gmra.mrb[140].mxu0 %v12371_v58 }
 0x4b1   : > { %8469 = vmatprep.mubr.msk.bf16.mxu0 %vm3540_vm9, %v12374_v41  ;;  %v7297_v45 = vpop.f32.mrb[60].mxu1 }
 0x4b2   : > { %v7299_v37 = vpop.f32.mrb[61].mxu1 }
 0x4b3   : > { %v7300_v23 = vpop.f32.mrb[62].mxu1 }
 0x4b4   : > { %v7302_v12 = vpop.f32.mrb[63].mxu1 }
 0x4b8   : > { %7682 = vmatmul.mubr.bf16.gmra.mrb[144].mxu0 %v12393_v31 }
 0x4b9   : > { %8470 = vmatprep.mubr.msk.bf16.mxu0 %vm3540_vm9, %v12396_v6 }
 0x4c0   : > { %7690 = vmatmul.mubr.bf16.gmra.mrb[148].mxu0 %v12415_v2 }
 0x4c1   : > { %8471 = vmatprep.mubr.msk.bf16.mxu0 %vm3540_vm9, %v12417_v1 }
 0x4c8   : > { %7698 = vmatmul.mubr.bf16.gmra.mrb[152].mxu0 %v12435_v42 }
 0x4c9   : > { %8472 = vmatprep.mubr.msk.bf16.mxu0 %vm3540_vm9, %v12437_v34 }
 0x4d0   : > { %7706 = vmatmul.mubr.bf16.gmra.mrb[156].mxu0 %v12449_v24 }
 0x4d1   : > { %8473 = vmatprep.mubr.msk.bf16.mxu0 %vm3540_vm9, %v12451_v62 }
 0x4d8   : > { %7714 = vmatmul.mubr.bf16.gmra.mrb[160].mxu0 %v12462_v4 }
 0x4d9   : > { %8474 = vmatprep.mubr.msk.bf16.mxu0 %vm3540_vm9, %v12464_v51 }
 0x4e0   : > { %7722 = vmatmul.mubr.bf16.gmra.mrb[164].mxu0 %v12473_v49 }
 0x4e1   : > { %8475 = vmatprep.mubr.msk.bf16.mxu0 %vm3540_vm9, %v12475_v44  ;;  %v7456_v44 = vld [vmem:[#allocation3 + $0x118] sm:$0xff] }
 0x4e7   : > { %v7004_v17 = vpop.f32.mrb[64].mxu0  ;;  %v7305_v57 = vpop.f32.mrb[64].mxu1 }
 0x4e8   : > { %7730 = vmatmul.mubr.bf16.gmra.mrb[168].mxu0 %v12487_v48  ;;  %v12572_v20 = vadd.f32 %v7297_v45, %v7004_v17  ;;  %v7006_v40 = vpop.f32.mrb[65].mxu0  ;;  %v7307_v39 = vpop.f32.mrb[65].mxu1 }
 0x4e9   : > { %8476 = vmatprep.mubr.msk.bf16.mxu0 %vm3540_vm9, %v12492_v55  ;;  %v7007_v22 = vpop.f32.mrb[66].mxu0  ;;  %v7308_v33 = vpop.f32.mrb[66].mxu1 }
 0x4ea   : > { %v12576_v29 = vadd.f32 %v7300_v23, %v7007_v22  ;;  %v7009_v58 = vpop.f32.mrb[67].mxu0  ;;  %v7310_v41 = vpop.f32.mrb[67].mxu1 }
 0x4ef   : > { %v7012_v61 = vpop.f32.mrb[68].mxu0  ;;  %v7313_v60 = vpop.f32.mrb[68].mxu1 }
 0x4f0   : > { %7738 = vmatmul.mubr.bf16.gmra.mrb[172].mxu0 %v12500_v13  ;;  %v12579_v5 = vadd.f32 %v7305_v57, %v7012_v61  ;;  %v7014_v14 = vpop.f32.mrb[69].mxu0  ;;  %v7315_v15 = vpop.f32.mrb[69].mxu1 }
 0x4f1   : > { %8477 = vmatprep.mubr.msk.bf16.mxu0 %vm3540_vm9, %v12504_v21  ;;  %v7015_v31 = vpop.f32.mrb[70].mxu0  ;;  %v7316_v6 = vpop.f32.mrb[70].mxu1 }
 0x4f2   : > { %v12583_v10 = vadd.f32 %v7308_v33, %v7015_v31  ;;  %v7017_v25 = vpop.f32.mrb[71].mxu0  ;;  %v7318_v16 = vpop.f32.mrb[71].mxu1 }
 0x4f7   : > { %v7020_v8 = vpop.f32.mrb[72].mxu0  ;;  %v7321_v2 = vpop.f32.mrb[72].mxu1 }
 0x4f8   : > { %7746 = vmatmul.mubr.bf16.gmra.mrb[176].mxu0 %v12514_v47  ;;  %v12586_v1 = vadd.f32 %v7313_v60, %v7020_v8  ;;  %v7022_v7 = vpop.f32.mrb[73].mxu0  ;;  %v7323_v63 = vpop.f32.mrb[73].mxu1 }
 0x4f9   : > { %8478 = vmatprep.mubr.msk.bf16.mxu0 %vm3540_vm9, %v12519_v27  ;;  %v7023_v54 = vpop.f32.mrb[74].mxu0  ;;  %v7324_v0 = vpop.f32.mrb[74].mxu1 }
 0x4fa   : > { %v12590_v42 = vadd.f32 %v7316_v6, %v7023_v54  ;;  %v7025_v34 = vpop.f32.mrb[75].mxu0  ;;  %v7326_v53 = vpop.f32.mrb[75].mxu1 }
 0x4ff   : > { %v7028_v52 = vpop.f32.mrb[76].mxu0  ;;  %v7329_v46 = vpop.f32.mrb[76].mxu1 }
 0x500   : > { %7754 = vmatmul.mubr.bf16.gmra.mrb[180].mxu0 %v12527_v30  ;;  %v12593_v24 = vadd.f32 %v7321_v2, %v7028_v52  ;;  %v7030_v62 = vpop.f32.mrb[77].mxu0  ;;  %v7331_v50 = vpop.f32.mrb[77].mxu1 }
 0x501   : > { %8479 = vmatprep.mubr.msk.bf16.mxu0 %vm3540_vm9, %v12532_v32  ;;  %v7031_v26 = vpop.f32.mrb[78].mxu0  ;;  %v7332_v4 = vpop.f32.mrb[78].mxu1 }
 0x502   : > { %v12597_v51 = vadd.f32 %v7324_v0, %v7031_v26  ;;  %v7033_v11 = vpop.f32.mrb[79].mxu0  ;;  %v7334_v49 = vpop.f32.mrb[79].mxu1 }
 0x507   : > { %v7036_v18 = vpop.f32.mrb[80].mxu0  ;;  %v7337_v9 = vpop.f32.mrb[80].mxu1 }
 0x508   : > { %7762 = vmatmul.mubr.bf16.gmra.mrb[184].mxu0 %v12536_v59  ;;  %v12600_v43 = vadd.f32 %v7329_v46, %v7036_v18  ;;  %v7038_v48 = vpop.f32.mrb[81].mxu0  ;;  %v7339_v3 = vpop.f32.mrb[81].mxu1 }
 0x509   : > { %v7039_v55 = vpop.f32.mrb[82].mxu0  ;;  %v7340_v13 = vpop.f32.mrb[82].mxu1  ;;  %8480 = vmatprep.mubr.msk.bf16.mxu0 %vm3540_vm9, %v7456_v44 }
 0x50a   : > { %v12603_v21 = vadd.f32 %v7332_v4, %v7039_v55  ;;  %v7041_v35 = vpop.f32.mrb[83].mxu0  ;;  %v7342_v38 = vpop.f32.mrb[83].mxu1 }
 0x50f   : > { %v7044_v47 = vpop.f32.mrb[84].mxu0  ;;  %v7345_v19 = vpop.f32.mrb[84].mxu1 }
 0x510   : > { %7770 = vmatmul.mubr.bf16.gmra.mrb[188].mxu0 %v9230_v36  ;;  %v12605_v27 = vadd.f32 %v7337_v9, %v7044_v47  ;;  %v7046_v56 = vpop.f32.mrb[85].mxu0  ;;  %v7347_v28 = vpop.f32.mrb[85].mxu1 }
 0x511   : > { %v7047_v30 = vpop.f32.mrb[86].mxu0  ;;  %v7348_v32 = vpop.f32.mrb[86].mxu1 }
 0x512   : > { %v12607_v59 = vadd.f32 %v7340_v13, %v7047_v30  ;;  %v7049_v45 = vpop.f32.mrb[87].mxu0  ;;  %v7350_v37 = vpop.f32.mrb[87].mxu1 }
 0x517   : > { %v7052_v23 = vpop.f32.mrb[88].mxu0  ;;  %v7353_v12 = vpop.f32.mrb[88].mxu1 }
 0x518   : > { %v12609_v17 = vadd.f32 %v7345_v19, %v7052_v23  ;;  %v7054_v57 = vpop.f32.mrb[89].mxu0  ;;  %v7355_v40 = vpop.f32.mrb[89].mxu1 }
 0x519   : > { %v7055_v39 = vpop.f32.mrb[90].mxu0  ;;  %v7356_v22 = vpop.f32.mrb[90].mxu1 }
 0x51a   : > { %v12611_v33 = vadd.f32 %v7348_v32, %v7055_v39  ;;  %v7057_v58 = vpop.f32.mrb[91].mxu0  ;;  %v7358_v41 = vpop.f32.mrb[91].mxu1 }
 0x51f   : > { %v7060_v61 = vpop.f32.mrb[92].mxu0  ;;  %v7361_v60 = vpop.f32.mrb[92].mxu1 }
 0x520   : > { %v12613_v14 = vadd.f32 %v7353_v12, %v7060_v61  ;;  %v7062_v15 = vpop.f32.mrb[93].mxu0  ;;  %v7363_v31 = vpop.f32.mrb[93].mxu1 }
 0x521   : > { %v7063_v6 = vpop.f32.mrb[94].mxu0  ;;  %v7364_v25 = vpop.f32.mrb[94].mxu1 }
 0x522   : > { %v12615_v16 = vadd.f32 %v7356_v22, %v7063_v6  ;;  %v7065_v8 = vpop.f32.mrb[95].mxu0  ;;  %v7366_v2 = vpop.f32.mrb[95].mxu1 }
 0x527   : > { %v7068_v7 = vpop.f32.mrb[96].mxu0  ;;  %v7369_v63 = vpop.f32.mrb[96].mxu1 }
 0x528   : > { %v12617_v54 = vadd.f32 %v7361_v60, %v7068_v7  ;;  %v7070_v0 = vpop.f32.mrb[97].mxu0  ;;  %v7371_v34 = vpop.f32.mrb[97].mxu1 }
 0x529   : > { %v7071_v53 = vpop.f32.mrb[98].mxu0  ;;  %v7372_v52 = vpop.f32.mrb[98].mxu1 }
 0x52a   : > { %v12619_v46 = vadd.f32 %v7364_v25, %v7071_v53  ;;  %v7073_v62 = vpop.f32.mrb[99].mxu0  ;;  %v7374_v50 = vpop.f32.mrb[99].mxu1 }
 0x52f   : > { %v7076_v26 = vpop.f32.mrb[100].mxu0  ;;  %v7377_v4 = vpop.f32.mrb[100].mxu1 }
 0x530   : > { %v12621_v11 = vadd.f32 %v7369_v63, %v7076_v26  ;;  %v7078_v49 = vpop.f32.mrb[101].mxu0  ;;  %v7379_v44 = vpop.f32.mrb[101].mxu1 }
 0x531   : > { %v7079_v18 = vpop.f32.mrb[102].mxu0  ;;  %v7380_v9 = vpop.f32.mrb[102].mxu1 }
 0x532   : > { %v12623_v48 = vadd.f32 %v7372_v52, %v7079_v18  ;;  %v7081_v3 = vpop.f32.mrb[103].mxu0  ;;  %v7382_v55 = vpop.f32.mrb[103].mxu1 }
 0x537   : > { %v7084_v13 = vpop.f32.mrb[104].mxu0  ;;  %v7385_v35 = vpop.f32.mrb[104].mxu1 }
 0x538   : > { %v12625_v38 = vadd.f32 %v7377_v4, %v7084_v13  ;;  %v7086_v47 = vpop.f32.mrb[105].mxu0  ;;  %v7387_v19 = vpop.f32.mrb[105].mxu1 }
 0x539   : > { %v7087_v36 = vpop.f32.mrb[106].mxu0  ;;  %v7388_v56 = vpop.f32.mrb[106].mxu1 }
 0x53a   : > { %v12627_v28 = vadd.f32 %v7380_v9, %v7087_v36  ;;  %v7089_v30 = vpop.f32.mrb[107].mxu0  ;;  %v7390_v32 = vpop.f32.mrb[107].mxu1 }
 0x53f   : > { %v7092_v45 = vpop.f32.mrb[108].mxu0  ;;  %v7393_v37 = vpop.f32.mrb[108].mxu1 }
 0x540   : > { %v12629_v23 = vadd.f32 %v7385_v35, %v7092_v45  ;;  %v7094_v12 = vpop.f32.mrb[109].mxu0  ;;  %v7395_v57 = vpop.f32.mrb[109].mxu1 }
 0x541   : > { %v7095_v40 = vpop.f32.mrb[110].mxu0  ;;  %v7396_v39 = vpop.f32.mrb[110].mxu1 }
 0x542   : > { %v12631_v22 = vadd.f32 %v7388_v56, %v7095_v40  ;;  %v7097_v58 = vpop.f32.mrb[111].mxu0  ;;  %v7398_v41 = vpop.f32.mrb[111].mxu1 }
 0x547   : > { %v7100_v61 = vpop.f32.mrb[112].mxu0  ;;  %v7401_v60 = vpop.f32.mrb[112].mxu1 }
 0x548   : > { %v12633_v15 = vadd.f32 %v7393_v37, %v7100_v61  ;;  %v7102_v31 = vpop.f32.mrb[113].mxu0  ;;  %v7403_v6 = vpop.f32.mrb[113].mxu1 }
 0x549   : > { %v7103_v25 = vpop.f32.mrb[114].mxu0  ;;  %v7404_v8 = vpop.f32.mrb[114].mxu1 }
 0x54a   : > { %v12635_v2 = vadd.f32 %v7396_v39, %v7103_v25  ;;  %v7105_v7 = vpop.f32.mrb[115].mxu0  ;;  %v7406_v63 = vpop.f32.mrb[115].mxu1  ;;  %v12652_v39 = vld [vmem:[%s12786_s12] ss:$0 sm:$0xff] }
 0x54b   : > { %v12660_v25 = vld [vmem:[%s12787_s13] sm:$0x3] }
 0x54c   : > { %8751 = vmatprep.mubr.msk.bf16.mxu1 %vm844_vm0, %v12660_v25 }
 0x552   : > { %v7108_v0 = vpop.f32.mrb[116].mxu0  ;;  %v7409_v34 = vpop.f32.mrb[116].mxu1 }
 0x553   : > { %v12637_v53 = vadd.f32 %v7401_v60, %v7108_v0  ;;  %v7110_v52 = vpop.f32.mrb[117].mxu0  ;;  %v7411_v62 = vpop.f32.mrb[117].mxu1 }
 0x554   : > { %v7111_v50 = vpop.f32.mrb[118].mxu0  ;;  %v7412_v26 = vpop.f32.mrb[118].mxu1 }
 0x555   : > { %v12639_v4 = vadd.f32 %v7404_v8, %v7111_v50  ;;  %v7113_v49 = vpop.f32.mrb[119].mxu0  ;;  %v7414_v44 = vpop.f32.mrb[119].mxu1 }
 0x55b   : > { %v7116_v18 = vpop.f32.mrb[120].mxu0  ;;  %v7417_v9 = vpop.f32.mrb[120].mxu1 }
 0x55c   : > { %v12641_v3 = vadd.f32 %v7409_v34, %v7116_v18  ;;  %v7118_v55 = vpop.f32.mrb[121].mxu0  ;;  %v7419_v13 = vpop.f32.mrb[121].mxu1 }
 0x55d   : > { %v7119_v35 = vpop.f32.mrb[122].mxu0  ;;  %v7420_v47 = vpop.f32.mrb[122].mxu1 }
 0x55e   : > { %v12643_v19 = vadd.f32 %v7412_v26, %v7119_v35  ;;  %v7121_v36 = vpop.f32.mrb[123].mxu0  ;;  %v7422_v56 = vpop.f32.mrb[123].mxu1 }
 0x563   : > { %v7124_v30 = vpop.f32.mrb[124].mxu0 }
 0x564   : > { %v12645_v32 = vadd.f32 %v7417_v9, %v7124_v30  ;;  %v7126_v45 = vpop.f32.mrb[125].mxu0 }
 0x565   : > { %v7127_v37 = vpop.f32.mrb[126].mxu0 }
 0x566   : > { %v12647_v12 = vadd.f32 %v7420_v47, %v7127_v37  ;;  %v7129_v57 = vpop.f32.mrb[127].mxu0 }
 0x56b   : > { %v7651_v40 = vpop.f32.mrb[128].mxu0 }
 0x56c   : > { %v7778_v58 = vadd.f32 %v7651_v40, %v12572_v20  ;;  %v7653_v41 = vpop.f32.mrb[129].mxu0 }
 0x56d   : > { %v7654_v61 = vpop.f32.mrb[130].mxu0 }
 0x56e   : > { %v7817_v60 = vadd.f32 %v12652_v39, %v7778_v58  ;;  %v7779_v31 = vadd.f32 %v7654_v61, %v12576_v29  ;;  %v7656_v6 = vpop.f32.mrb[131].mxu0 }
 0x570   : > { %v7818_v8 = vadd.f32 %v12652_v39, %v7779_v31  ;;  %v7849_v7 = vmax.f32 %v7817_v60, 0.0 }
 0x572   : > { %v7850_v63 = vmax.f32 %v7818_v8, 0.0 }
 0x573   : > { %v7659_v20 = vpop.f32.mrb[132].mxu0 }
 0x574   : > { %v12665_v0 = vpack.c.bf16 %v7850_v63, %v7849_v7  ;;  %v7780_v34 = vadd.f32 %v7659_v20, %v12579_v5  ;;  %v7661_v52 = vpop.f32.mrb[133].mxu0 }
 0x575   : > { %v7662_v29 = vpop.f32.mrb[134].mxu0 }
 0x576   : > { %v7819_v62 = vadd.f32 %v12652_v39, %v7780_v34  ;;  %v7781_v50 = vadd.f32 %v7662_v29, %v12583_v10  ;;  %v7664_v26 = vpop.f32.mrb[135].mxu0 }
 0x578   : > { %v7820_v49 = vadd.f32 %v12652_v39, %v7781_v50  ;;  %v7851_v44 = vmax.f32 %v7819_v62, 0.0 }
 0x57a   : > { %v7852_v18 = vmax.f32 %v7820_v49, 0.0 }
 0x57b   : > { %v7667_v9 = vpop.f32.mrb[136].mxu0 }
 0x57c   : > { %v12671_v55 = vpack.c.bf16 %v7852_v18, %v7851_v44  ;;  %v7782_v13 = vadd.f32 %v7667_v9, %v12586_v1  ;;  %v7669_v35 = vpop.f32.mrb[137].mxu0 }
 0x57d   : > { %v7670_v47 = vpop.f32.mrb[138].mxu0 }
 0x57e   : > { %v7821_v5 = vadd.f32 %v12652_v39, %v7782_v13  ;;  %v7783_v36 = vadd.f32 %v7670_v47, %v12590_v42  ;;  %v7672_v56 = vpop.f32.mrb[139].mxu0 }
 0x580   : > { %v7822_v30 = vadd.f32 %v12652_v39, %v7783_v36  ;;  %v7853_v10 = vmax.f32 %v7821_v5, 0.0 }
 0x582   : > { %v7854_v45 = vmax.f32 %v7822_v30, 0.0 }
 0x583   : > { %v7675_v37 = vpop.f32.mrb[140].mxu0 }
 0x584   : > { %v12677_v57 = vpack.c.bf16 %v7854_v45, %v7853_v10  ;;  %v7784_v40 = vadd.f32 %v7675_v37, %v12593_v24  ;;  %v7677_v58 = vpop.f32.mrb[141].mxu0 }
 0x585   : > { %v7678_v41 = vpop.f32.mrb[142].mxu0 }
 0x586   : > { %v7823_v1 = vadd.f32 %v12652_v39, %v7784_v40  ;;  %v7785_v61 = vadd.f32 %v7678_v41, %v12597_v51  ;;  %v7680_v60 = vpop.f32.mrb[143].mxu0 }
 0x588   : > { %v7824_v31 = vadd.f32 %v12652_v39, %v7785_v61  ;;  %v7855_v42 = vmax.f32 %v7823_v1, 0.0 }
 0x58a   : > { %v7856_v6 = vmax.f32 %v7824_v31, 0.0 }
 0x58b   : > { %v7683_v8 = vpop.f32.mrb[144].mxu0 }
 0x58c   : > { %v12683_v7 = vpack.c.bf16 %v7856_v6, %v7855_v42  ;;  %v7786_v63 = vadd.f32 %v7683_v8, %v12600_v43  ;;  %v7685_v20 = vpop.f32.mrb[145].mxu0 }
 0x58d   : > { %v7686_v34 = vpop.f32.mrb[146].mxu0 }
 0x58e   : > { %v7825_v24 = vadd.f32 %v12652_v39, %v7786_v63  ;;  %v7787_v52 = vadd.f32 %v7686_v34, %v12603_v21  ;;  %v7688_v29 = vpop.f32.mrb[147].mxu0 }
 0x590   : > { %v7826_v62 = vadd.f32 %v12652_v39, %v7787_v52  ;;  %v7857_v51 = vmax.f32 %v7825_v24, 0.0 }
 0x592   : > { %v7858_v50 = vmax.f32 %v7826_v62, 0.0 }
 0x593   : > { %v7691_v26 = vpop.f32.mrb[148].mxu0 }
 0x594   : > { %v12689_v49 = vpack.c.bf16 %v7858_v50, %v7857_v51  ;;  %v7788_v44 = vadd.f32 %v7691_v26, %v12605_v27  ;;  %v7693_v18 = vpop.f32.mrb[149].mxu0 }
 0x595   : > { %v7694_v9 = vpop.f32.mrb[150].mxu0 }
 0x596   : > { %v7827_v43 = vadd.f32 %v12652_v39, %v7788_v44  ;;  %v7789_v13 = vadd.f32 %v7694_v9, %v12607_v59  ;;  %v7696_v35 = vpop.f32.mrb[151].mxu0 }
 0x598   : > { %v7828_v47 = vadd.f32 %v12652_v39, %v7789_v13  ;;  %v7859_v21 = vmax.f32 %v7827_v43, 0.0 }
 0x59a   : > { %v7860_v5 = vmax.f32 %v7828_v47, 0.0 }
 0x59b   : > { %v7699_v36 = vpop.f32.mrb[152].mxu0 }
 0x59c   : > { %v12695_v56 = vpack.c.bf16 %v7860_v5, %v7859_v21  ;;  %v7790_v30 = vadd.f32 %v7699_v36, %v12609_v17  ;;  %v7701_v10 = vpop.f32.mrb[153].mxu0 }
 0x59d   : > { %v7702_v45 = vpop.f32.mrb[154].mxu0 }
 0x59e   : > { %v7829_v27 = vadd.f32 %v12652_v39, %v7790_v30  ;;  %v7791_v37 = vadd.f32 %v7702_v45, %v12611_v33  ;;  %v7704_v40 = vpop.f32.mrb[155].mxu0 }
 0x5a0   : > { %v7830_v58 = vadd.f32 %v12652_v39, %v7791_v37  ;;  %v7861_v59 = vmax.f32 %v7829_v27, 0.0 }
 0x5a2   : > { %v7862_v41 = vmax.f32 %v7830_v58, 0.0 }
 0x5a3   : > { %v7707_v1 = vpop.f32.mrb[156].mxu0 }
 0x5a4   : > { %v12701_v61 = vpack.c.bf16 %v7862_v41, %v7861_v59  ;;  %v7792_v60 = vadd.f32 %v7707_v1, %v12613_v14  ;;  %v7709_v31 = vpop.f32.mrb[157].mxu0 }
 0x5a5   : > { %v7710_v42 = vpop.f32.mrb[158].mxu0 }
 0x5a6   : > { %v7831_v17 = vadd.f32 %v12652_v39, %v7792_v60  ;;  %v7793_v6 = vadd.f32 %v7710_v42, %v12615_v16  ;;  %v7712_v8 = vpop.f32.mrb[159].mxu0 }
 0x5a8   : > { %v7832_v63 = vadd.f32 %v12652_v39, %v7793_v6  ;;  %v7863_v33 = vmax.f32 %v7831_v17, 0.0 }
 0x5aa   : > { %v7864_v20 = vmax.f32 %v7832_v63, 0.0 }
 0x5ab   : > { %v7715_v34 = vpop.f32.mrb[160].mxu0 }
 0x5ac   : > { %v12707_v24 = vpack.c.bf16 %v7864_v20, %v7863_v33  ;;  %v7794_v52 = vadd.f32 %v7715_v34, %v12617_v54  ;;  %v7717_v29 = vpop.f32.mrb[161].mxu0 }
 0x5ad   : > { %v7718_v62 = vpop.f32.mrb[162].mxu0 }
 0x5ae   : > { %v7833_v14 = vadd.f32 %v12652_v39, %v7794_v52  ;;  %v7795_v51 = vadd.f32 %v7718_v62, %v12619_v46  ;;  %v7720_v50 = vpop.f32.mrb[163].mxu0  ;;  %v7908_v46 = vsel %vm844_vm0, %v12665_v0, 0  ;;  %v7911_v0 = vsel %vm844_vm0, %v12671_v55, 0 }
 0x5af   : > { %v7914_v55 = vsel %vm844_vm0, %v12677_v57, 0  ;;  %v7917_v57 = vsel %vm844_vm0, %v12683_v7, 0  ;;  %v7920_v7 = vsel %vm844_vm0, %v12689_v49, 0  ;;  %v7923_v49 = vsel %vm844_vm0, %v12695_v56, 0 }
 0x5b0   : > { %v7834_v26 = vadd.f32 %v12652_v39, %v7795_v51  ;;  %v7865_v16 = vmax.f32 %v7833_v14, 0.0  ;;  %v7926_v56 = vsel %vm844_vm0, %v12701_v61, 0 }
 0x5b2   : > { %v7866_v44 = vmax.f32 %v7834_v26, 0.0 }
 0x5b3   : > { %v7723_v18 = vpop.f32.mrb[164].mxu0 }
 0x5b4   : > { %v7890_v9 = vpack.c.bf16 %v7866_v44, %v7865_v16  ;;  %v7796_v43 = vadd.f32 %v7723_v18, %v12621_v11  ;;  %v7725_v13 = vpop.f32.mrb[165].mxu0 }
 0x5b5   : > { %v7726_v35 = vpop.f32.mrb[166].mxu0 }
 0x5b6   : > { %v7835_v47 = vadd.f32 %v12652_v39, %v7796_v43  ;;  %v7797_v54 = vadd.f32 %v7726_v35, %v12623_v48  ;;  %v7728_v21 = vpop.f32.mrb[167].mxu0  ;;  %8937 = vmatprep.subr.msk.bf16.mxu1 %vm844_vm0, %v7890_v9 }
 0x5b7   : > { %8736 = vmatpush3.bf16.xpose.msra.mxu1 %v7908_v46 }
 0x5b8   : > { %v7836_v5 = vadd.f32 %v12652_v39, %v7797_v54  ;;  %v7867_v36 = vmax.f32 %v7835_v47, 0.0 }
 0x5ba   : > { %v7868_v30 = vmax.f32 %v7836_v5, 0.0 }
 0x5bb   : > { %v7731_v10 = vpop.f32.mrb[168].mxu0 }
 0x5bc   : > { %v7891_v45 = vpack.c.bf16 %v7868_v30, %v7867_v36  ;;  %v7798_v11 = vadd.f32 %v7731_v10, %v12625_v38  ;;  %v7733_v27 = vpop.f32.mrb[169].mxu0 }
 0x5bd   : > { %v7734_v37 = vpop.f32.mrb[170].mxu0 }
 0x5be   : > { %v7837_v40 = vadd.f32 %v12652_v39, %v7798_v11  ;;  %v7799_v48 = vadd.f32 %v7734_v37, %v12627_v28  ;;  %v7736_v58 = vpop.f32.mrb[171].mxu0  ;;  %8938 = vmatprep.subr.msk.bf16.mxu1 %vm844_vm0, %v7891_v45 }
 0x5bf   : > { %8738 = vmatpush3.bf16.xpose.msra.mxu1 %v7911_v0 }
 0x5c0   : > { %v7838_v59 = vadd.f32 %v12652_v39, %v7799_v48  ;;  %v7869_v41 = vmax.f32 %v7837_v40, 0.0 }
 0x5c2   : > { %v7870_v1 = vmax.f32 %v7838_v59, 0.0 }
 0x5c3   : > { %v7739_v60 = vpop.f32.mrb[172].mxu0 }
 0x5c4   : > { %v7892_v31 = vpack.c.bf16 %v7870_v1, %v7869_v41  ;;  %v7800_v38 = vadd.f32 %v7739_v60, %v12629_v23  ;;  %v7741_v42 = vpop.f32.mrb[173].mxu0 }
 0x5c5   : > { %v7742_v17 = vpop.f32.mrb[174].mxu0 }
 0x5c6   : > { %v7839_v6 = vadd.f32 %v12652_v39, %v7800_v38  ;;  %v7801_v28 = vadd.f32 %v7742_v17, %v12631_v22  ;;  %v7744_v8 = vpop.f32.mrb[175].mxu0  ;;  %8939 = vmatprep.subr.msk.bf16.mxu1 %vm844_vm0, %v7892_v31 }
 0x5c7   : > { %8740 = vmatpush3.bf16.xpose.msra.mxu1 %v7914_v55 }
 0x5c8   : > { %v7840_v63 = vadd.f32 %v12652_v39, %v7801_v28  ;;  %v7871_v33 = vmax.f32 %v7839_v6, 0.0 }
 0x5ca   : > { %v7872_v20 = vmax.f32 %v7840_v63, 0.0 }
 0x5cb   : > { %v7747_v34 = vpop.f32.mrb[176].mxu0 }
 0x5cc   : > { %v7893_v52 = vpack.c.bf16 %v7872_v20, %v7871_v33  ;;  %v7802_v23 = vadd.f32 %v7747_v34, %v12633_v15  ;;  %v7749_v29 = vpop.f32.mrb[177].mxu0 }
 0x5cd   : > { %v7750_v62 = vpop.f32.mrb[178].mxu0 }
 0x5ce   : > { %v7841_v14 = vadd.f32 %v12652_v39, %v7802_v23  ;;  %v7803_v22 = vadd.f32 %v7750_v62, %v12635_v2  ;;  %v7752_v51 = vpop.f32.mrb[179].mxu0  ;;  %8940 = vmatprep.subr.msk.bf16.mxu1 %vm844_vm0, %v7893_v52 }
 0x5cf   : > { %8742 = vmatpush3.bf16.xpose.msra.mxu1 %v7917_v57 }
 0x5d0   : > { %v7842_v50 = vadd.f32 %v12652_v39, %v7803_v22  ;;  %v7873_v26 = vmax.f32 %v7841_v14, 0.0 }
 0x5d2   : > { %v7874_v16 = vmax.f32 %v7842_v50, 0.0 }
 0x5d3   : > { %v7755_v44 = vpop.f32.mrb[180].mxu0 }
 0x5d4   : > { %v7894_v18 = vpack.c.bf16 %v7874_v16, %v7873_v26  ;;  %v7804_v15 = vadd.f32 %v7755_v44, %v12637_v53  ;;  %v7757_v9 = vpop.f32.mrb[181].mxu0 }
 0x5d5   : > { %v7758_v43 = vpop.f32.mrb[182].mxu0 }
 0x5d6   : > { %v7843_v13 = vadd.f32 %v12652_v39, %v7804_v15  ;;  %v7805_v2 = vadd.f32 %v7758_v43, %v12639_v4  ;;  %v7760_v35 = vpop.f32.mrb[183].mxu0  ;;  %8941 = vmatprep.subr.msk.bf16.mxu1 %vm844_vm0, %v7894_v18 }
 0x5d7   : > { %8744 = vmatpush3.bf16.xpose.msra.mxu1 %v7920_v7 }
 0x5d8   : > { %v7844_v47 = vadd.f32 %v12652_v39, %v7805_v2  ;;  %v7875_v54 = vmax.f32 %v7843_v13, 0.0 }
 0x5da   : > { %v7876_v21 = vmax.f32 %v7844_v47, 0.0 }
 0x5db   : > { %v7763_v46 = vpop.f32.mrb[184].mxu0 }
 0x5dc   : > { %v7895_v5 = vpack.c.bf16 %v7876_v21, %v7875_v54  ;;  %v7806_v53 = vadd.f32 %v7763_v46, %v12641_v3  ;;  %v7765_v36 = vpop.f32.mrb[185].mxu0 }
 0x5dd   : > { %v7766_v30 = vpop.f32.mrb[186].mxu0 }
 0x5de   : > { %v7845_v10 = vadd.f32 %v12652_v39, %v7806_v53  ;;  %v7807_v4 = vadd.f32 %v7766_v30, %v12643_v19  ;;  %v7768_v45 = vpop.f32.mrb[187].mxu0  ;;  %8942 = vmatprep.subr.msk.bf16.mxu1 %vm844_vm0, %v7895_v5 }
 0x5df   : > { %8746 = vmatpush3.bf16.xpose.msra.mxu1 %v7923_v49 }
 0x5e0   : > { %v7846_v11 = vadd.f32 %v12652_v39, %v7807_v4  ;;  %v7877_v27 = vmax.f32 %v7845_v10, 0.0 }
 0x5e2   : > { %v7878_v37 = vmax.f32 %v7846_v11, 0.0 }
 0x5e3   : > { %v7771_v40 = vpop.f32.mrb[188].mxu0 }
 0x5e4   : > { %v7896_v48 = vpack.c.bf16 %v7878_v37, %v7877_v27  ;;  %v7808_v3 = vadd.f32 %v7771_v40, %v12645_v32  ;;  %v7773_v58 = vpop.f32.mrb[189].mxu0  ;;  %v7929_v32 = vsel %vm844_vm0, %v12707_v24, 0 }
 0x5e5   : > { %v7774_v0 = vpop.f32.mrb[190].mxu0 }
 0x5e6   : > { %v7847_v59 = vadd.f32 %v12652_v39, %v7808_v3  ;;  %v7809_v19 = vadd.f32 %v7774_v0, %v12647_v12  ;;  %8943 = vmatprep.subr.msk.bf16.mxu1 %vm844_vm0, %v7896_v48  ;;  %v7776_v41 = vpop.f32.mrb[191].mxu0  ;;  %v7902_v12 = vpop.permute.xlu1 %7901 }
 0x5e7   : > { %8748 = vmatpush3.bf16.xpose.msra.mxu1 %v7926_v56 }
 0x5e8   : > { %v7848_v1 = vadd.f32 %v12652_v39, %v7809_v19  ;;  %v7879_v60 = vmax.f32 %v7847_v59, 0.0 }
 0x5ea   : > { %v7880_v31 = vmax.f32 %v7848_v1, 0.0 }
 0x5ec   : > { %v7897_v38 = vpack.c.bf16 %v7880_v31, %v7879_v60 }
 0x5ee   : > { %8944 = vmatprep.subr.msk.bf16.mxu1 %vm844_vm0, %v7897_v38 }
 0x5ef   : > { %8750 = vmatpush3.bf16.xpose.msra.mxu1 %v7929_v32 }
 0x5f6   : > { %8752 = vmatmul.mubr.msk.bf16.vlgmr.msra.gmra.mrb[124].mxu1 %vm844_vm0, %v12660_v25 }
 0x6c9   : > { %v7989_v42 = vpop.f32.mrb[124].mxu1 }
 0x6ca   : > { %v7990_v61 = vadd.f32 %v7989_v42, %v7902_v12  ;;  %v7991_v17 = vpop.f32.mrb[125].mxu1 }
 0x6cb   : > { %v7992_v6 = vadd.f32 %v7991_v17, %v7902_v12  ;;  %v7993_v28 = vpop.f32.mrb[126].mxu1 }
 0x6cc   : > { %v7994_v39 = vpop.f32.mrb[127].mxu1 }
 0x6cd   : > { %v7998_v8 = vcombine.low %v7990_v61, %v7992_v6 }
 0x6cf   : > { %8000 = vst [vmem:[%s534_s24] sm:$0x77] %v7998_v8 }
 0x6d0 PF: > { %s25_s18 = sadd.s32 1, %s9237_s18  }
 0x6d1   : > { %p22_p4 = scmp.ge.s32.totalorder %s25_s18, 4  }
 0x6d3   :  { %24 = sbr.rel (!%p22_p4) target bundleno = 1 (0x1), region = 126 }

</bundles_post_ra>
